<compile_context>
chip_gen: v7x
topology: tpu7x:2x2x1
jax: 0.10.0
libtpu: 0.0.40
codegen_flags: <defaults>
</compile_context>

<pallas_src>
import functools

import jax
import jax.numpy as jnp
from jax.experimental import pallas as pl
from jax.experimental.pallas import tpu as pltpu


# -----------------------------------------------------------------------------
# Kernel 1: hoisted input projection  gx[d] = x @ W_ih[d]^T + (b_ih + b_hh)[d]
# Tiled over rows (tm) and gate columns (tn); grid = (2, nM, nN), all parallel.
# -----------------------------------------------------------------------------
def _proj_kernel(x_ref, w_ref, b_ref, o_ref):
    o_ref[...] = (jnp.dot(x_ref[...], w_ref[...],
                          preferred_element_type=jnp.float32)
                  + b_ref[...]).astype(o_ref.dtype)


# -----------------------------------------------------------------------------
# Kernel 2: fused bidirectional recurrence.  grid = (nT,) time blocks; both
# directions are advanced inside every step (independent chains interleaved).
# -----------------------------------------------------------------------------
def _bidir_recurrent_kernel(gxf_ref, gxr_ref, h0_ref, c0_ref, whh_ref,
                            yf_ref, yr_ref, hT_ref, cT_ref,
                            h_scr, c_scr, *,
                            hidden, time_block, n_blocks, rem):
    H = hidden
    Tb = time_block
    t = pl.program_id(0)

    @pl.when(t == 0)
    def _():
        h_scr[...] = h0_ref[...].astype(jnp.float32)
        c_scr[...] = c0_ref[...].astype(jnp.float32)

    # Loop-invariant weights (already bf16 from the wrapper: no per-step cast).
    whh_f = whh_ref[0]            # (Hp, 4Hp)
    whh_r = whh_ref[1]

    # Carry h/c as values across the unrolled block; scratch is read once here
    # and written once at the end of the block.
    h_f = h_scr[0]
    c_f = c_scr[0]
    h_r = h_scr[1]
    c_r = c_scr[1]

    def cell(gx, h, c, whh):
        gates = gx.astype(jnp.float32) + jnp.dot(
            h.astype(whh.dtype), whh, preferred_element_type=jnp.float32)
        i_g = jax.nn.sigmoid(gates[:, 0 * H:1 * H])
        f_g = jax.nn.sigmoid(gates[:, 1 * H:2 * H])
        g_g = jnp.tanh(gates[:, 2 * H:3 * H])
        o_g = jax.nn.sigmoid(gates[:, 3 * H:4 * H])
        c_new = f_g * c + i_g * g_g
        h_new = o_g * jnp.tanh(c_new)
        return h_new, c_new

    # Static position (within the last forward block) of the true final state.
    cap_fwd_lt = (rem - 1) if rem > 0 else (Tb - 1)

    for lt in range(Tb):
        # forward: global time  t*Tb + lt
        hf_new, cf_new = cell(gxf_ref[lt], h_f, c_f, whh_f)
        # reverse: global time  (n_blocks-1-t)*Tb + (Tb-1-lt), processed in
        # decreasing time order.
        hr_new, cr_new = cell(gxr_ref[Tb - 1 - lt], h_r, c_r, whh_r)

        yf_ref[lt] = hf_new.astype(yf_ref.dtype)            # OOB rows masked
        yr_ref[Tb - 1 - lt] = hr_new.astype(yr_ref.dtype)   # OOB rows masked

        h_f, c_f = hf_new, cf_new
        if rem > 0 and lt < Tb - rem:
            # These reverse steps are out-of-range padding only at grid step 0
            # (partial last time block); keep the previous state there.
            invalid = t == 0
            h_r = jnp.where(invalid, h_r, hr_new)
            c_r = jnp.where(invalid, c_r, cr_new)
        else:
            h_r, c_r = hr_new, cr_new

        if lt == cap_fwd_lt:
            # Forward final state = state right after global time T-1.
            @pl.when(t == n_blocks - 1)
            def _(h_cap=h_f, c_cap=c_f):
                hT_ref[0] = h_cap.astype(hT_ref.dtype)
                cT_ref[0] = c_cap.astype(cT_ref.dtype)

    h_scr[0] = h_f
    c_scr[0] = c_f
    h_scr[1] = h_r
    c_scr[1] = c_r

    @pl.when(t == n_blocks - 1)
    def _():
        # Reverse final state = state right after global time 0 (always the
        # last processed step of the last grid iteration).
        hT_ref[1] = h_r.astype(hT_ref.dtype)
        cT_ref[1] = c_r.astype(cT_ref.dtype)


# -----------------------------------------------------------------------------
# Weight padding helpers: pad each gate's H rows up to Hp (lane alignment).
# -----------------------------------------------------------------------------
def _pad_gates_out(w, H, Hp):
    """(4H, X) -> (4Hp, X): zero-pad every gate's output rows from H to Hp."""
    if Hp == H:
        return w
    X = w.shape[1]
    return jnp.pad(w.reshape(4, H, X),
                   ((0, 0), (0, Hp - H), (0, 0))).reshape(4 * Hp, X)


def _pad_gates_vec(b, H, Hp):
    if Hp == H:
        return b
    return jnp.pad(b.reshape(4, H), ((0, 0), (0, Hp - H))).reshape(4 * Hp)


# -----------------------------------------------------------------------------
# Wrapper: BidirLSTMLayer.forward
# -----------------------------------------------------------------------------
def bidir_lstm_layer(x, states, params, *, time_block=None,
                     whh_dtype=jnp.bfloat16, gx_dtype=jnp.float32):
    """Pallas equivalent of BidirLSTMLayer.forward.

    x: (T, B, I) time-major; states: [(h0_f, c0_f), (h0_r, c0_r)], each (B, H)
    params: [(w_ih, w_hh, b_ih, b_hh)_fwd, (w_ih, w_hh, b_ih, b_hh)_rev]
            w_ih: (4H, I), w_hh: (4H, H), biases: (4H,), gate order (i, f, g, o)
    returns: (T, B, 2H), [(hT_f, cT_f), (hT_r, cT_r)]
    """
    T, B, I = x.shape
    H = states[0][0].shape[-1]
    dtype = x.dtype
    itemsize = jnp.dtype(dtype).itemsize
    gx_itemsize = jnp.dtype(gx_dtype).itemsize

    # --- lane / sublane alignment -------------------------------------------
    Hp = ((H + 127) // 128) * 128                  # gate slices / h stores lane-aligned
    sub = {4: 8, 2: 16, 1: 32}.get(itemsize, 8)    # sublane tile for the I/O dtype
    Bp = ((B + sub - 1) // sub) * sub

    # --- per-generation VMEM budget -----------------------------------------
    try:
        kind = jax.devices()[0].device_kind.lower()
    except Exception:
        kind = ""
    if ("v5" in kind) or ("v6" in kind):
        vmem_limit = 100 * 1024 * 1024
        budget = 80 * 1024 * 1024
    else:                                          # v7x (64 MiB / TC) or unknown
        vmem_limit = 56 * 1024 * 1024
        budget = 40 * 1024 * 1024

    # --- pad inputs / states / weights --------------------------------------
    x_p = x if Bp == B else jnp.pad(x, ((0, 0), (0, Bp - B), (0, 0)))

    def pad_state(s):
        return jnp.pad(s, ((0, Bp - B), (0, Hp - H)))

    h0 = jnp.stack([pad_state(states[0][0]), pad_state(states[1][0])])  # (2,Bp,Hp)
    c0 = jnp.stack([pad_state(states[0][1]), pad_state(states[1][1])])

    def prep(p):
        w_ih, w_hh, b_ih, b_hh = p
        w_ih = _pad_gates_out(w_ih, H, Hp)                   # (4Hp, I)
        w_hh = _pad_gates_out(w_hh, H, Hp)                   # (4Hp, H)
        if Hp != H:
            w_hh = jnp.pad(w_hh, ((0, 0), (0, Hp - H)))      # (4Hp, Hp)
        b = _pad_gates_vec(b_ih + b_hh, H, Hp)               # (4Hp,)
        return w_ih.T, w_hh.T, b

    wih_f, whh_f, b_f = prep(params[0])
    wih_r, whh_r, b_r = prep(params[1])
    wih_t = jnp.stack([wih_f, wih_r])                         # (2, I, 4Hp)
    whh_t = jnp.stack([whh_f, whh_r]).astype(whh_dtype)       # (2, Hp, 4Hp), bf16
    bias = jnp.stack([b_f, b_r]).reshape(2, 1, 4 * Hp).astype(jnp.float32)

    # --- step 1: hoisted input projection (tiled over M and N) --------------
    TB = T * Bp
    x_flat = x_p.reshape(TB, I)
    tn = min(4 * Hp, 512)                    # divides 4*Hp since Hp % 128 == 0
    tm = min(TB, 512)                        # multiple of 8 (Bp is)
    wbytes = I * tn * jnp.dtype(wih_t.dtype).itemsize
    while tm > 8 and 2 * (tm * I * itemsize + tm * tn * gx_itemsize + wbytes) > budget:
        tm = max(8, ((tm // 2) // 8) * 8)
    n_m = -(-TB // tm)
    n_n = (4 * Hp) // tn

    gx = pl.pallas_call(
        _proj_kernel,
        out_shape=jax.ShapeDtypeStruct((2, TB, 4 * Hp), gx_dtype),
        grid_spec=pltpu.PrefetchScalarGridSpec(
            num_scalar_prefetch=0,
            grid=(2, n_m, n_n),
            in_specs=[
                pl.BlockSpec((tm, I), lambda d, m, n: (m, 0)),          # x rows
                pl.BlockSpec((None, I, tn), lambda d, m, n: (d, 0, n)),  # W_ih^T
                pl.BlockSpec((None, 1, tn), lambda d, m, n: (d, 0, n)),  # bias
            ],
            out_specs=pl.BlockSpec((None, tm, tn), lambda d, m, n: (d, m, n)),
        ),
        compiler_params=pltpu.CompilerParams(
            dimension_semantics=("parallel", "parallel", "parallel"),
            vmem_limit_bytes=vmem_limit),
    )(x_flat, wih_t, bias)
    gx = gx.reshape(2, T, Bp, 4 * Hp)        # free reshape (metadata only)

    # --- step 2: fused bidirectional recurrence ------------------------------
    def rec_bytes(tb):
        streamed = 2 * 2 * (tb * Bp * 4 * Hp * gx_itemsize      # gx_f + gx_r
                            + tb * Bp * Hp * itemsize)           # y_f + y_r
        resident = (4 * 2 * Bp * Hp * 4                          # h0/c0 + f32 scratch
                    + 2 * 2 * Bp * Hp * itemsize                 # hT / cT
                    + 2 * Hp * 4 * Hp * jnp.dtype(whh_dtype).itemsize)
        return streamed + 2 * resident

    if time_block is None:
        tb_max = min(16, T)
        while tb_max > 1 and rec_bytes(tb_max) > budget:
            tb_max -= 1
        best_div = 1
        for cand in range(tb_max, 0, -1):
            if T % cand == 0:
                best_div = cand
                break
        # Prefer a divisor (no remainder block); fall back to tb_max with an
        # in-kernel remainder block (e.g. prime T) instead of degenerating to 1.
        Tb = best_div if best_div >= max(1, tb_max // 2) else tb_max
    else:
        Tb = max(1, min(int(time_block), T))
    rem = T % Tb
    nT = T // Tb + (1 if rem else 0)

    kernel = functools.partial(_bidir_recurrent_kernel, hidden=Hp,
                               time_block=Tb, n_blocks=nT, rem=rem)

    y_f, y_r, hT, cT = pl.pallas_call(
        kernel,
        out_shape=(
            jax.ShapeDtypeStruct((T, Bp, Hp), dtype),    # forward outputs
            jax.ShapeDtypeStruct((T, Bp, Hp), dtype),    # reverse outputs
            jax.ShapeDtypeStruct((2, Bp, Hp), dtype),    # final h (fwd, rev)
            jax.ShapeDtypeStruct((2, Bp, Hp), dtype),    # final c (fwd, rev)
        ),
        grid_spec=pltpu.PrefetchScalarGridSpec(
            num_scalar_prefetch=0,
            grid=(nT,),
            in_specs=[
                # same gx array, two views: forward-time and reverse-time blocks
                pl.BlockSpec((None, Tb, Bp, 4 * Hp), lambda t: (0, t, 0, 0)),
                pl.BlockSpec((None, Tb, Bp, 4 * Hp),
                             lambda t: (1, nT - 1 - t, 0, 0)),
                pl.BlockSpec((2, Bp, Hp), lambda t: (0, 0, 0)),   # h0
                pl.BlockSpec((2, Bp, Hp), lambda t: (0, 0, 0)),   # c0
                pl.BlockSpec((2, Hp, 4 * Hp), lambda t: (0, 0, 0)),  # W_hh^T
            ],
            out_specs=[
                pl.BlockSpec((Tb, Bp, Hp), lambda t: (t, 0, 0)),
                pl.BlockSpec((Tb, Bp, Hp), lambda t: (nT - 1 - t, 0, 0)),
                pl.BlockSpec((2, Bp, Hp), lambda t: (0, 0, 0)),
                pl.BlockSpec((2, Bp, Hp), lambda t: (0, 0, 0)),
            ],
            scratch_shapes=[
                pltpu.VMEM((2, Bp, Hp), jnp.float32),   # h (fwd, rev)
                pltpu.VMEM((2, Bp, Hp), jnp.float32),   # c (fwd, rev)
            ],
        ),
        compiler_params=pltpu.CompilerParams(
            dimension_semantics=("arbitrary",),
            vmem_limit_bytes=vmem_limit),
    )(gx, gx, h0, c0, whh_t)

    # TODO(synk): the concat below is one extra XLA pass; a direction-outer
    # grid could write a lane-dense (T, B, 2H) slab directly, but would lose
    # the per-step fwd/rev interleaving that hides latency on single-TC chips.
    y = jnp.concatenate([y_f[:, :B, :H], y_r[:, :B, :H]], axis=-1)
    hT = hT[:, :B, :H]
    cT = cT[:, :B, :H]
    return y, [(hT[0], cT[0]), (hT[1], cT[1])]


# -----------------------------------------------------------------------------
# pure-JAX reference (lax.scan) used only for a correctness check
# -----------------------------------------------------------------------------
def _ref_cell(x_t, h, c, w_ih, w_hh, b_ih, b_hh):
    gates = x_t @ w_ih.T + b_ih + h @ w_hh.T + b_hh
    H = h.shape[-1]
    i = jax.nn.sigmoid(gates[:, 0:H])
    f = jax.nn.sigmoid(gates[:, H:2 * H])
    g = jnp.tanh(gates[:, 2 * H:3 * H])
    o = jax.nn.sigmoid(gates[:, 3 * H:4 * H])
    c_new = f * c + i * g
    h_new = o * jnp.tanh(c_new)
    return h_new, c_new


def _ref_direction(x, h0, c0, w_ih, w_hh, b_ih, b_hh, reverse_dir):
    xs = x[::-1] if reverse_dir else x

    def step(carry, x_t):
        h, c = carry
        h, c = _ref_cell(x_t, h, c, w_ih, w_hh, b_ih, b_hh)
        return (h, c), h

    (hT, cT), outs = jax.lax.scan(step, (h0, c0), xs)
    if reverse_dir:
        outs = outs[::-1]
    return outs, (hT, cT)


if __name__ == "__main__":
    T, B, I, H = 8, 4, 16, 32
    key = jax.random.PRNGKey(0)
    keys = jax.random.split(key, 16)

    x = jax.random.normal(keys[0], (T, B, I), dtype=jnp.float32)

    def make_cell_params(ks):
        w_ih = 0.1 * jax.random.normal(ks[0], (4 * H, I), dtype=jnp.float32)
        w_hh = 0.1 * jax.random.normal(ks[1], (4 * H, H), dtype=jnp.float32)
        b_ih = 0.1 * jax.random.normal(ks[2], (4 * H,), dtype=jnp.float32)
        b_hh = 0.1 * jax.random.normal(ks[3], (4 * H,), dtype=jnp.float32)
        return (w_ih, w_hh, b_ih, b_hh)

    params = [make_cell_params(keys[1:5]), make_cell_params(keys[5:9])]

    states = [
        (jax.random.normal(keys[9], (B, H), dtype=jnp.float32),
         jax.random.normal(keys[10], (B, H), dtype=jnp.float32)),
        (jax.random.normal(keys[11], (B, H), dtype=jnp.float32),
         jax.random.normal(keys[12], (B, H), dtype=jnp.float32)),
    ]

    # reference
    ref_f, ref_sf = _ref_direction(x, states[0][0], states[0][1], *params[0], False)
    ref_r, ref_sr = _ref_direction(x, states[1][0], states[1][1], *params[1], True)
    ref_out = jnp.concatenate([ref_f, ref_r], axis=-1)

    tol = dict(atol=2e-2, rtol=2e-2)   # bf16 h@W_hh operands (f32 accumulate)

    # 1) default config: single time block (Tb = T)
    run = jax.jit(bidir_lstm_layer)
    out, out_states = run(x, states, params)
    out = jax.block_until_ready(out)

    assert out.shape == (T, B, 2 * H)
    assert jnp.allclose(out, ref_out, **tol)
    assert jnp.allclose(out_states[0][0], ref_sf[0], **tol)
    assert jnp.allclose(out_states[0][1], ref_sf[1], **tol)
    assert jnp.allclose(out_states[1][0], ref_sr[0], **tol)
    assert jnp.allclose(out_states[1][1], ref_sr[1], **tol)

    # 2) multi-block time path: state carried across grid steps in VMEM scratch
    run4 = jax.jit(functools.partial(bidir_lstm_layer, time_block=4))
    out4, out_states4 = run4(x, states, params)
    out4 = jax.block_until_ready(out4)
    assert jnp.allclose(out4, ref_out, **tol)
    assert jnp.allclose(out_states4[0][0], ref_sf[0], **tol)
    assert jnp.allclose(out_states4[1][0], ref_sr[0], **tol)
    assert jnp.allclose(out_states4[1][1], ref_sr[1], **tol)

    print("KERNEL_OK")
</pallas_src>

<mosaic_0001>
module attributes {stable_mosaic.version = 11 : i64} {
  func.func @_proj_kernel(%arg0: i32, %arg1: i32, %arg2: i32, %arg3: memref<64x16xf32, #tpu.memory_space<vmem>>, %arg4: memref<1x16x512xf32, #tpu.memory_space<vmem>>, %arg5: memref<1x1x512xf32, #tpu.memory_space<vmem>>, %arg6: memref<1x64x512xf32, #tpu.memory_space<vmem>>) attributes {dimension_semantics = [#tpu.dimension_semantics<parallel>, #tpu.dimension_semantics<parallel>, #tpu.dimension_semantics<parallel>], iteration_bounds = array<i64: 2, 1, 1>, scalar_prefetch = 0 : i64, scratch_operands = 0 : i64, tpu.core_type = #tpu.core_type<tc>, window_params = [{transform_indices = @transform_0, window_bounds = array<i64: 64, 16>}, {transform_indices = @transform_1, window_bounds = array<i64: 1, 16, 512>}, {transform_indices = @transform_2, window_bounds = array<i64: 1, 1, 512>}, {transform_indices = @transform_3, window_bounds = array<i64: 1, 64, 512>}]} {
    %c0 = arith.constant 0 : index
    %c0_0 = arith.constant 0 : index
    %0 = vector.load %arg3[%c0, %c0_0] : memref<64x16xf32, #tpu.memory_space<vmem>>, vector<64x16xf32>
    %c0_1 = arith.constant 0 : index
    %c0_2 = arith.constant 0 : index
    %c0_3 = arith.constant 0 : index
    %1 = vector.load %arg4[%c0_1, %c0_2, %c0_3] : memref<1x16x512xf32, #tpu.memory_space<vmem>>, vector<1x16x512xf32>
    %2 = vector.shape_cast %1 : vector<1x16x512xf32> to vector<16x512xf32>
    %cst = arith.constant dense<0.000000e+00> : vector<64x512xf32>
    %3 = tpu.matmul %0, %2, %cst {dimension_numbers = #tpu.dot_dimension_numbers<[1], [0], [0], [1], [0, 0, 1, 1], [], []>} : vector<64x16xf32>, vector<16x512xf32>, vector<64x512xf32> -> vector<64x512xf32>
    %c0_4 = arith.constant 0 : index
    %c0_5 = arith.constant 0 : index
    %c0_6 = arith.constant 0 : index
    %4 = vector.load %arg5[%c0_4, %c0_5, %c0_6] : memref<1x1x512xf32, #tpu.memory_space<vmem>>, vector<1x1x512xf32>
    %5 = vector.shape_cast %4 : vector<1x1x512xf32> to vector<1x512xf32>
    %6 = vector.broadcast %5 : vector<1x512xf32> to vector<64x512xf32>
    %7 = arith.addf %3, %6 : vector<64x512xf32>
    %c0_7 = arith.constant 0 : index
    %c0_8 = arith.constant 0 : index
    %c0_9 = arith.constant 0 : index
    %8 = vector.load %arg6[%c0_7, %c0_8, %c0_9] : memref<1x64x512xf32, #tpu.memory_space<vmem>>, vector<1x64x512xf32>
    %9 = vector.shape_cast %8 : vector<1x64x512xf32> to vector<64x512xf32>
    %10 = vector.shape_cast %7 : vector<64x512xf32> to vector<1x64x512xf32>
    tpu.vector_store %arg6[%c0_7, %c0_8, %c0_9], %10 {strides = array<i32>} : memref<1x64x512xf32, #tpu.memory_space<vmem>>, vector<1x64x512xf32>,
    return
  }
  func.func @transform_0(%arg0: i32, %arg1: i32, %arg2: i32) -> (i32, i32) {
    %c0_i32 = arith.constant 0 : i32
    %c0_i32_0 = arith.constant 0 : i32
    return %arg1, %c0_i32 : i32, i32
  }
  func.func @transform_1(%arg0: i32, %arg1: i32, %arg2: i32) -> (i32, i32, i32) {
    %c0_i32 = arith.constant 0 : i32
    %c0_i32_0 = arith.constant 0 : i32
    return %arg0, %c0_i32, %arg2 : i32, i32, i32
  }
  func.func @transform_2(%arg0: i32, %arg1: i32, %arg2: i32) -> (i32, i32, i32) {
    %c0_i32 = arith.constant 0 : i32
    %c0_i32_0 = arith.constant 0 : i32
    return %arg0, %c0_i32, %arg2 : i32, i32, i32
  }
  func.func @transform_3(%arg0: i32, %arg1: i32, %arg2: i32) -> (i32, i32, i32) {
    %c0_i32 = arith.constant 0 : i32
    return %arg0, %arg1, %arg2 : i32, i32, i32
  }
}

module attributes {stable_mosaic.version = 11 : i64} {
  func.func @_bidir_recurrent_kernel(%arg0: i32, %arg1: memref<1x8x8x512xf32, #tpu.memory_space<vmem>>, %arg2: memref<1x8x8x512xf32, #tpu.memory_space<vmem>>, %arg3: memref<2x8x128xf32, #tpu.memory_space<vmem>>, %arg4: memref<2x8x128xf32, #tpu.memory_space<vmem>>, %arg5: memref<2x128x512xbf16, #tpu.memory_space<vmem>>, %arg6: memref<8x8x128xf32, #tpu.memory_space<vmem>>, %arg7: memref<8x8x128xf32, #tpu.memory_space<vmem>>, %arg8: memref<2x8x128xf32, #tpu.memory_space<vmem>>, %arg9: memref<2x8x128xf32, #tpu.memory_space<vmem>>, %arg10: memref<2x8x128xf32, #tpu.memory_space<vmem>>, %arg11: memref<2x8x128xf32, #tpu.memory_space<vmem>>) attributes {dimension_semantics = [#tpu.dimension_semantics<arbitrary>], iteration_bounds = array<i64: 1>, scalar_prefetch = 0 : i64, scratch_operands = 2 : i64, tpu.core_type = #tpu.core_type<tc>, window_params = [{transform_indices = @transform_0, window_bounds = array<i64: 1, 8, 8, 512>}, {transform_indices = @transform_1, window_bounds = array<i64: 1, 8, 8, 512>}, {pipeline_mode = #tpu.pipeline_mode<synchronous>, transform_indices = @transform_2, window_bounds = array<i64: 2, 8, 128>}, {pipeline_mode = #tpu.pipeline_mode<synchronous>, transform_indices = @transform_3, window_bounds = array<i64: 2, 8, 128>}, {pipeline_mode = #tpu.pipeline_mode<synchronous>, transform_indices = @transform_4, window_bounds = array<i64: 2, 128, 512>}, {transform_indices = @transform_5, window_bounds = array<i64: 8, 8, 128>}, {transform_indices = @transform_6, window_bounds = array<i64: 8, 8, 128>}, {pipeline_mode = #tpu.pipeline_mode<synchronous>, transform_indices = @transform_7, window_bounds = array<i64: 2, 8, 128>}, {pipeline_mode = #tpu.pipeline_mode<synchronous>, transform_indices = @transform_8, window_bounds = array<i64: 2, 8, 128>}]} {
    %c0_i32 = arith.constant 0 : i32
    %0 = arith.cmpi eq, %arg0, %c0_i32 : i32
    %1 = arith.extui %0 : i1 to i32
    %c0_i32_0 = arith.constant 0 : i32
    %2 = arith.cmpi ne, %1, %c0_i32_0 : i32
    scf.if %2 {
      %c0_202 = arith.constant 0 : index
      %c0_203 = arith.constant 0 : index
      %c0_204 = arith.constant 0 : index
      %561 = vector.load %arg3[%c0_202, %c0_203, %c0_204] : memref<2x8x128xf32, #tpu.memory_space<vmem>>, vector<2x8x128xf32>
      %c0_205 = arith.constant 0 : index
      %c0_206 = arith.constant 0 : index
      %c0_207 = arith.constant 0 : index
      %562 = vector.load %arg10[%c0_205, %c0_206, %c0_207] : memref<2x8x128xf32, #tpu.memory_space<vmem>>, vector<2x8x128xf32>
      tpu.vector_store %arg10[%c0_205, %c0_206, %c0_207], %561 {strides = array<i32>} : memref<2x8x128xf32, #tpu.memory_space<vmem>>, vector<2x8x128xf32>,
      %c0_208 = arith.constant 0 : index
      %c0_209 = arith.constant 0 : index
      %c0_210 = arith.constant 0 : index
      %563 = vector.load %arg4[%c0_208, %c0_209, %c0_210] : memref<2x8x128xf32, #tpu.memory_space<vmem>>, vector<2x8x128xf32>
      %c0_211 = arith.constant 0 : index
      %c0_212 = arith.constant 0 : index
      %c0_213 = arith.constant 0 : index
      %564 = vector.load %arg11[%c0_211, %c0_212, %c0_213] : memref<2x8x128xf32, #tpu.memory_space<vmem>>, vector<2x8x128xf32>
      tpu.vector_store %arg11[%c0_211, %c0_212, %c0_213], %563 {strides = array<i32>} : memref<2x8x128xf32, #tpu.memory_space<vmem>>, vector<2x8x128xf32>,
    } else {
    }
    %c0 = arith.constant 0 : index
    %c0_1 = arith.constant 0 : index
    %c0_2 = arith.constant 0 : index
    %3 = vector.load %arg5[%c0, %c0_1, %c0_2] : memref<2x128x512xbf16, #tpu.memory_space<vmem>>, vector<1x128x512xbf16>
    %4 = vector.shape_cast %3 : vector<1x128x512xbf16> to vector<128x512xbf16>
    %c1 = arith.constant 1 : index
    %c0_3 = arith.constant 0 : index
    %c0_4 = arith.constant 0 : index
    %5 = vector.load %arg5[%c1, %c0_3, %c0_4] : memref<2x128x512xbf16, #tpu.memory_space<vmem>>, vector<1x128x512xbf16>
    %6 = vector.shape_cast %5 : vector<1x128x512xbf16> to vector<128x512xbf16>
    %c0_5 = arith.constant 0 : index
    %c0_6 = arith.constant 0 : index
    %c0_7 = arith.constant 0 : index
    %7 = vector.load %arg10[%c0_5, %c0_6, %c0_7] : memref<2x8x128xf32, #tpu.memory_space<vmem>>, vector<1x8x128xf32>
    %8 = vector.shape_cast %7 : vector<1x8x128xf32> to vector<8x128xf32>
    %c0_8 = arith.constant 0 : index
    %c0_9 = arith.constant 0 : index
    %c0_10 = arith.constant 0 : index
    %9 = vector.load %arg11[%c0_8, %c0_9, %c0_10] : memref<2x8x128xf32, #tpu.memory_space<vmem>>, vector<1x8x128xf32>
    %10 = vector.shape_cast %9 : vector<1x8x128xf32> to vector<8x128xf32>
    %c1_11 = arith.constant 1 : index
    %c0_12 = arith.constant 0 : index
    %c0_13 = arith.constant 0 : index
    %11 = vector.load %arg10[%c1_11, %c0_12, %c0_13] : memref<2x8x128xf32, #tpu.memory_space<vmem>>, vector<1x8x128xf32>
    %12 = vector.shape_cast %11 : vector<1x8x128xf32> to vector<8x128xf32>
    %c1_14 = arith.constant 1 : index
    %c0_15 = arith.constant 0 : index
    %c0_16 = arith.constant 0 : index
    %13 = vector.load %arg11[%c1_14, %c0_15, %c0_16] : memref<2x8x128xf32, #tpu.memory_space<vmem>>, vector<1x8x128xf32>
    %14 = vector.shape_cast %13 : vector<1x8x128xf32> to vector<8x128xf32>
    %c0_17 = arith.constant 0 : index
    %c0_18 = arith.constant 0 : index
    %c0_19 = arith.constant 0 : index
    %c0_20 = arith.constant 0 : index
    %15 = vector.load %arg1[%c0_17, %c0_18, %c0_19, %c0_20] : memref<1x8x8x512xf32, #tpu.memory_space<vmem>>, vector<1x1x8x512xf32>
    %16 = vector.shape_cast %15 : vector<1x1x8x512xf32> to vector<8x512xf32>
    %17 = arith.truncf %8 : vector<8x128xf32> to vector<8x128xbf16>
    %cst = arith.constant dense<0.000000e+00> : vector<8x512xf32>
    %18 = tpu.matmul %17, %4, %cst {dimension_numbers = #tpu.dot_dimension_numbers<[1], [0], [0], [1], [0, 0, 1, 1], [], []>} : vector<8x128xbf16>, vector<128x512xbf16>, vector<8x512xf32> -> vector<8x512xf32>
    %19 = arith.addf %16, %18 : vector<8x512xf32>
    %20 = vector.extract_strided_slice %19 {offsets = [0, 0], sizes = [8, 128], strides = [1, 1]} : vector<8x512xf32> to vector<8x128xf32>
    %21 = arith.negf %20 : vector<8x128xf32>
    %22 = math.exp %21 : vector<8x128xf32>
    %cst_21 = arith.constant 1.000000e+00 : f32
    %23 = vector.broadcast %cst_21 : f32 to vector<8x128xf32>
    %24 = arith.addf %23, %22 : vector<8x128xf32>
    %25 = arith.divf %23, %24 : vector<8x128xf32>
    %26 = vector.extract_strided_slice %19 {offsets = [0, 128], sizes = [8, 128], strides = [1, 1]} : vector<8x512xf32> to vector<8x128xf32>
    %27 = arith.negf %26 : vector<8x128xf32>
    %28 = math.exp %27 : vector<8x128xf32>
    %cst_22 = arith.constant 1.000000e+00 : f32
    %29 = vector.broadcast %cst_22 : f32 to vector<8x128xf32>
    %30 = arith.addf %29, %28 : vector<8x128xf32>
    %31 = arith.divf %29, %30 : vector<8x128xf32>
    %32 = vector.extract_strided_slice %19 {offsets = [0, 256], sizes = [8, 128], strides = [1, 1]} : vector<8x512xf32> to vector<8x128xf32>
    %33 = math.tanh %32 : vector<8x128xf32>
    %34 = vector.extract_strided_slice %19 {offsets = [0, 384], sizes = [8, 128], strides = [1, 1]} : vector<8x512xf32> to vector<8x128xf32>
    %35 = arith.negf %34 : vector<8x128xf32>
    %36 = math.exp %35 : vector<8x128xf32>
    %cst_23 = arith.constant 1.000000e+00 : f32
    %37 = vector.broadcast %cst_23 : f32 to vector<8x128xf32>
    %38 = arith.addf %37, %36 : vector<8x128xf32>
    %39 = arith.divf %37, %38 : vector<8x128xf32>
    %40 = arith.mulf %31, %10 : vector<8x128xf32>
    %41 = arith.mulf %25, %33 : vector<8x128xf32>
    %42 = arith.addf %40, %41 : vector<8x128xf32>
    %43 = math.tanh %42 : vector<8x128xf32>
    %44 = arith.mulf %39, %43 : vector<8x128xf32>
    %c0_24 = arith.constant 0 : index
    %c7 = arith.constant 7 : index
    %c0_25 = arith.constant 0 : index
    %c0_26 = arith.constant 0 : index
    %45 = vector.load %arg2[%c0_24, %c7, %c0_25, %c0_26] : memref<1x8x8x512xf32, #tpu.memory_space<vmem>>, vector<1x1x8x512xf32>
    %46 = vector.shape_cast %45 : vector<1x1x8x512xf32> to vector<8x512xf32>
    %47 = arith.truncf %12 : vector<8x128xf32> to vector<8x128xbf16>
    %cst_27 = arith.constant dense<0.000000e+00> : vector<8x512xf32>
    %48 = tpu.matmul %47, %6, %cst_27 {dimension_numbers = #tpu.dot_dimension_numbers<[1], [0], [0], [1], [0, 0, 1, 1], [], []>} : vector<8x128xbf16>, vector<128x512xbf16>, vector<8x512xf32> -> vector<8x512xf32>
    %49 = arith.addf %46, %48 : vector<8x512xf32>
    %50 = vector.extract_strided_slice %49 {offsets = [0, 0], sizes = [8, 128], strides = [1, 1]} : vector<8x512xf32> to vector<8x128xf32>
    %51 = arith.negf %50 : vector<8x128xf32>
    %52 = math.exp %51 : vector<8x128xf32>
    %cst_28 = arith.constant 1.000000e+00 : f32
    %53 = vector.broadcast %cst_28 : f32 to vector<8x128xf32>
    %54 = arith.addf %53, %52 : vector<8x128xf32>
    %55 = arith.divf %53, %54 : vector<8x128xf32>
    %56 = vector.extract_strided_slice %49 {offsets = [0, 128], sizes = [8, 128], strides = [1, 1]} : vector<8x512xf32> to vector<8x128xf32>
    %57 = arith.negf %56 : vector<8x128xf32>
    %58 = math.exp %57 : vector<8x128xf32>
    %cst_29 = arith.constant 1.000000e+00 : f32
    %59 = vector.broadcast %cst_29 : f32 to vector<8x128xf32>
    %60 = arith.addf %59, %58 : vector<8x128xf32>
    %61 = arith.divf %59, %60 : vector<8x128xf32>
    %62 = vector.extract_strided_slice %49 {offsets = [0, 256], sizes = [8, 128], strides = [1, 1]} : vector<8x512xf32> to vector<8x128xf32>
    %63 = math.tanh %62 : vector<8x128xf32>
    %64 = vector.extract_strided_slice %49 {offsets = [0, 384], sizes = [8, 128], strides = [1, 1]} : vector<8x512xf32> to vector<8x128xf32>
    %65 = arith.negf %64 : vector<8x128xf32>
    %66 = math.exp %65 : vector<8x128xf32>
    %cst_30 = arith.constant 1.000000e+00 : f32
    %67 = vector.broadcast %cst_30 : f32 to vector<8x128xf32>
    %68 = arith.addf %67, %66 : vector<8x128xf32>
    %69 = arith.divf %67, %68 : vector<8x128xf32>
    %70 = arith.mulf %61, %14 : vector<8x128xf32>
    %71 = arith.mulf %55, %63 : vector<8x128xf32>
    %72 = arith.addf %70, %71 : vector<8x128xf32>
    %73 = math.tanh %72 : vector<8x128xf32>
    %74 = arith.mulf %69, %73 : vector<8x128xf32>
    %c0_31 = arith.constant 0 : index
    %c0_32 = arith.constant 0 : index
    %c0_33 = arith.constant 0 : index
    %75 = vector.load %arg6[%c0_31, %c0_32, %c0_33] : memref<8x8x128xf32, #tpu.memory_space<vmem>>, vector<1x8x128xf32>
    %76 = vector.shape_cast %75 : vector<1x8x128xf32> to vector<8x128xf32>
    %77 = vector.shape_cast %44 : vector<8x128xf32> to vector<1x8x128xf32>
    tpu.vector_store %arg6[%c0_31, %c0_32, %c0_33], %77 {strides = array<i32>} : memref<8x8x128xf32, #tpu.memory_space<vmem>>, vector<1x8x128xf32>,
    %c7_34 = arith.constant 7 : index
    %c0_35 = arith.constant 0 : index
    %c0_36 = arith.constant 0 : index
    %78 = vector.load %arg7[%c7_34, %c0_35, %c0_36] : memref<8x8x128xf32, #tpu.memory_space<vmem>>, vector<1x8x128xf32>
    %79 = vector.shape_cast %78 : vector<1x8x128xf32> to vector<8x128xf32>
    %80 = vector.shape_cast %74 : vector<8x128xf32> to vector<1x8x128xf32>
    tpu.vector_store %arg7[%c7_34, %c0_35, %c0_36], %80 {strides = array<i32>} : memref<8x8x128xf32, #tpu.memory_space<vmem>>, vector<1x8x128xf32>,
    %c0_37 = arith.constant 0 : index
    %c1_38 = arith.constant 1 : index
    %c0_39 = arith.constant 0 : index
    %c0_40 = arith.constant 0 : index
    %81 = vector.load %arg1[%c0_37, %c1_38, %c0_39, %c0_40] : memref<1x8x8x512xf32, #tpu.memory_space<vmem>>, vector<1x1x8x512xf32>
    %82 = vector.shape_cast %81 : vector<1x1x8x512xf32> to vector<8x512xf32>
    %83 = arith.truncf %44 : vector<8x128xf32> to vector<8x128xbf16>
    %cst_41 = arith.constant dense<0.000000e+00> : vector<8x512xf32>
    %84 = tpu.matmul %83, %4, %cst_41 {dimension_numbers = #tpu.dot_dimension_numbers<[1], [0], [0], [1], [0, 0, 1, 1], [], []>} : vector<8x128xbf16>, vector<128x512xbf16>, vector<8x512xf32> -> vector<8x512xf32>
    %85 = arith.addf %82, %84 : vector<8x512xf32>
    %86 = vector.extract_strided_slice %85 {offsets = [0, 0], sizes = [8, 128], strides = [1, 1]} : vector<8x512xf32> to vector<8x128xf32>
    %87 = arith.negf %86 : vector<8x128xf32>
    %88 = math.exp %87 : vector<8x128xf32>
    %cst_42 = arith.constant 1.000000e+00 : f32
    %89 = vector.broadcast %cst_42 : f32 to vector<8x128xf32>
    %90 = arith.addf %89, %88 : vector<8x128xf32>
    %91 = arith.divf %89, %90 : vector<8x128xf32>
    %92 = vector.extract_strided_slice %85 {offsets = [0, 128], sizes = [8, 128], strides = [1, 1]} : vector<8x512xf32> to vector<8x128xf32>
    %93 = arith.negf %92 : vector<8x128xf32>
    %94 = math.exp %93 : vector<8x128xf32>
    %cst_43 = arith.constant 1.000000e+00 : f32
    %95 = vector.broadcast %cst_43 : f32 to vector<8x128xf32>
    %96 = arith.addf %95, %94 : vector<8x128xf32>
    %97 = arith.divf %95, %96 : vector<8x128xf32>
    %98 = vector.extract_strided_slice %85 {offsets = [0, 256], sizes = [8, 128], strides = [1, 1]} : vector<8x512xf32> to vector<8x128xf32>
    %99 = math.tanh %98 : vector<8x128xf32>
    %100 = vector.extract_strided_slice %85 {offsets = [0, 384], sizes = [8, 128], strides = [1, 1]} : vector<8x512xf32> to vector<8x128xf32>
    %101 = arith.negf %100 : vector<8x128xf32>
    %102 = math.exp %101 : vector<8x128xf32>
    %cst_44 = arith.constant 1.000000e+00 : f32
    %103 = vector.broadcast %cst_44 : f32 to vector<8x128xf32>
    %104 = arith.addf %103, %102 : vector<8x128xf32>
    %105 = arith.divf %103, %104 : vector<8x128xf32>
    %106 = arith.mulf %97, %42 : vector<8x128xf32>
    %107 = arith.mulf %91, %99 : vector<8x128xf32>
    %108 = arith.addf %106, %107 : vector<8x128xf32>
    %109 = math.tanh %108 : vector<8x128xf32>
    %110 = arith.mulf %105, %109 : vector<8x128xf32>
    %c0_45 = arith.constant 0 : index
    %c6 = arith.constant 6 : index
    %c0_46 = arith.constant 0 : index
    %c0_47 = arith.constant 0 : index
    %111 = vector.load %arg2[%c0_45, %c6, %c0_46, %c0_47] : memref<1x8x8x512xf32, #tpu.memory_space<vmem>>, vector<1x1x8x512xf32>
    %112 = vector.shape_cast %111 : vector<1x1x8x512xf32> to vector<8x512xf32>
    %113 = arith.truncf %74 : vector<8x128xf32> to vector<8x128xbf16>
    %cst_48 = arith.constant dense<0.000000e+00> : vector<8x512xf32>
    %114 = tpu.matmul %113, %6, %cst_48 {dimension_numbers = #tpu.dot_dimension_numbers<[1], [0], [0], [1], [0, 0, 1, 1], [], []>} : vector<8x128xbf16>, vector<128x512xbf16>, vector<8x512xf32> -> vector<8x512xf32>
    %115 = arith.addf %112, %114 : vector<8x512xf32>
    %116 = vector.extract_strided_slice %115 {offsets = [0, 0], sizes = [8, 128], strides = [1, 1]} : vector<8x512xf32> to vector<8x128xf32>
    %117 = arith.negf %116 : vector<8x128xf32>
    %118 = math.exp %117 : vector<8x128xf32>
    %cst_49 = arith.constant 1.000000e+00 : f32
    %119 = vector.broadcast %cst_49 : f32 to vector<8x128xf32>
    %120 = arith.addf %119, %118 : vector<8x128xf32>
    %121 = arith.divf %119, %120 : vector<8x128xf32>
    %122 = vector.extract_strided_slice %115 {offsets = [0, 128], sizes = [8, 128], strides = [1, 1]} : vector<8x512xf32> to vector<8x128xf32>
    %123 = arith.negf %122 : vector<8x128xf32>
    %124 = math.exp %123 : vector<8x128xf32>
    %cst_50 = arith.constant 1.000000e+00 : f32
    %125 = vector.broadcast %cst_50 : f32 to vector<8x128xf32>
    %126 = arith.addf %125, %124 : vector<8x128xf32>
    %127 = arith.divf %125, %126 : vector<8x128xf32>
    %128 = vector.extract_strided_slice %115 {offsets = [0, 256], sizes = [8, 128], strides = [1, 1]} : vector<8x512xf32> to vector<8x128xf32>
    %129 = math.tanh %128 : vector<8x128xf32>
    %130 = vector.extract_strided_slice %115 {offsets = [0, 384], sizes = [8, 128], strides = [1, 1]} : vector<8x512xf32> to vector<8x128xf32>
    %131 = arith.negf %130 : vector<8x128xf32>
    %132 = math.exp %131 : vector<8x128xf32>
    %cst_51 = arith.constant 1.000000e+00 : f32
    %133 = vector.broadcast %cst_51 : f32 to vector<8x128xf32>
    %134 = arith.addf %133, %132 : vector<8x128xf32>
    %135 = arith.divf %133, %134 : vector<8x128xf32>
    %136 = arith.mulf %127, %72 : vector<8x128xf32>
    %137 = arith.mulf %121, %129 : vector<8x128xf32>
    %138 = arith.addf %136, %137 : vector<8x128xf32>
    %139 = math.tanh %138 : vector<8x128xf32>
    %140 = arith.mulf %135, %139 : vector<8x128xf32>
    %c1_52 = arith.constant 1 : index
    %c0_53 = arith.constant 0 : index
    %c0_54 = arith.constant 0 : index
    %141 = vector.load %arg6[%c1_52, %c0_53, %c0_54] : memref<8x8x128xf32, #tpu.memory_space<vmem>>, vector<1x8x128xf32>
    %142 = vector.shape_cast %141 : vector<1x8x128xf32> to vector<8x128xf32>
    %143 = vector.shape_cast %110 : vector<8x128xf32> to vector<1x8x128xf32>
    tpu.vector_store %arg6[%c1_52, %c0_53, %c0_54], %143 {strides = array<i32>} : memref<8x8x128xf32, #tpu.memory_space<vmem>>, vector<1x8x128xf32>,
    %c6_55 = arith.constant 6 : index
    %c0_56 = arith.constant 0 : index
    %c0_57 = arith.constant 0 : index
    %144 = vector.load %arg7[%c6_55, %c0_56, %c0_57] : memref<8x8x128xf32, #tpu.memory_space<vmem>>, vector<1x8x128xf32>
    %145 = vector.shape_cast %144 : vector<1x8x128xf32> to vector<8x128xf32>
    %146 = vector.shape_cast %140 : vector<8x128xf32> to vector<1x8x128xf32>
    tpu.vector_store %arg7[%c6_55, %c0_56, %c0_57], %146 {strides = array<i32>} : memref<8x8x128xf32, #tpu.memory_space<vmem>>, vector<1x8x128xf32>,
    %c0_58 = arith.constant 0 : index
    %c2 = arith.constant 2 : index
    %c0_59 = arith.constant 0 : index
    %c0_60 = arith.constant 0 : index
    %147 = vector.load %arg1[%c0_58, %c2, %c0_59, %c0_60] : memref<1x8x8x512xf32, #tpu.memory_space<vmem>>, vector<1x1x8x512xf32>
    %148 = vector.shape_cast %147 : vector<1x1x8x512xf32> to vector<8x512xf32>
    %149 = arith.truncf %110 : vector<8x128xf32> to vector<8x128xbf16>
    %cst_61 = arith.constant dense<0.000000e+00> : vector<8x512xf32>
    %150 = tpu.matmul %149, %4, %cst_61 {dimension_numbers = #tpu.dot_dimension_numbers<[1], [0], [0], [1], [0, 0, 1, 1], [], []>} : vector<8x128xbf16>, vector<128x512xbf16>, vector<8x512xf32> -> vector<8x512xf32>
    %151 = arith.addf %148, %150 : vector<8x512xf32>
    %152 = vector.extract_strided_slice %151 {offsets = [0, 0], sizes = [8, 128], strides = [1, 1]} : vector<8x512xf32> to vector<8x128xf32>
    %153 = arith.negf %152 : vector<8x128xf32>
    %154 = math.exp %153 : vector<8x128xf32>
    %cst_62 = arith.constant 1.000000e+00 : f32
    %155 = vector.broadcast %cst_62 : f32 to vector<8x128xf32>
    %156 = arith.addf %155, %154 : vector<8x128xf32>
    %157 = arith.divf %155, %156 : vector<8x128xf32>
    %158 = vector.extract_strided_slice %151 {offsets = [0, 128], sizes = [8, 128], strides = [1, 1]} : vector<8x512xf32> to vector<8x128xf32>
    %159 = arith.negf %158 : vector<8x128xf32>
    %160 = math.exp %159 : vector<8x128xf32>
    %cst_63 = arith.constant 1.000000e+00 : f32
    %161 = vector.broadcast %cst_63 : f32 to vector<8x128xf32>
    %162 = arith.addf %161, %160 : vector<8x128xf32>
    %163 = arith.divf %161, %162 : vector<8x128xf32>
    %164 = vector.extract_strided_slice %151 {offsets = [0, 256], sizes = [8, 128], strides = [1, 1]} : vector<8x512xf32> to vector<8x128xf32>
    %165 = math.tanh %164 : vector<8x128xf32>
    %166 = vector.extract_strided_slice %151 {offsets = [0, 384], sizes = [8, 128], strides = [1, 1]} : vector<8x512xf32> to vector<8x128xf32>
    %167 = arith.negf %166 : vector<8x128xf32>
    %168 = math.exp %167 : vector<8x128xf32>
    %cst_64 = arith.constant 1.000000e+00 : f32
    %169 = vector.broadcast %cst_64 : f32 to vector<8x128xf32>
    %170 = arith.addf %169, %168 : vector<8x128xf32>
    %171 = arith.divf %169, %170 : vector<8x128xf32>
    %172 = arith.mulf %163, %108 : vector<8x128xf32>
    %173 = arith.mulf %157, %165 : vector<8x128xf32>
    %174 = arith.addf %172, %173 : vector<8x128xf32>
    %175 = math.tanh %174 : vector<8x128xf32>
    %176 = arith.mulf %171, %175 : vector<8x128xf32>
    %c0_65 = arith.constant 0 : index
    %c5 = arith.constant 5 : index
    %c0_66 = arith.constant 0 : index
    %c0_67 = arith.constant 0 : index
    %177 = vector.load %arg2[%c0_65, %c5, %c0_66, %c0_67] : memref<1x8x8x512xf32, #tpu.memory_space<vmem>>, vector<1x1x8x512xf32>
    %178 = vector.shape_cast %177 : vector<1x1x8x512xf32> to vector<8x512xf32>
    %179 = arith.truncf %140 : vector<8x128xf32> to vector<8x128xbf16>
    %cst_68 = arith.constant dense<0.000000e+00> : vector<8x512xf32>
    %180 = tpu.matmul %179, %6, %cst_68 {dimension_numbers = #tpu.dot_dimension_numbers<[1], [0], [0], [1], [0, 0, 1, 1], [], []>} : vector<8x128xbf16>, vector<128x512xbf16>, vector<8x512xf32> -> vector<8x512xf32>
    %181 = arith.addf %178, %180 : vector<8x512xf32>
    %182 = vector.extract_strided_slice %181 {offsets = [0, 0], sizes = [8, 128], strides = [1, 1]} : vector<8x512xf32> to vector<8x128xf32>
    %183 = arith.negf %182 : vector<8x128xf32>
    %184 = math.exp %183 : vector<8x128xf32>
    %cst_69 = arith.constant 1.000000e+00 : f32
    %185 = vector.broadcast %cst_69 : f32 to vector<8x128xf32>
    %186 = arith.addf %185, %184 : vector<8x128xf32>
    %187 = arith.divf %185, %186 : vector<8x128xf32>
    %188 = vector.extract_strided_slice %181 {offsets = [0, 128], sizes = [8, 128], strides = [1, 1]} : vector<8x512xf32> to vector<8x128xf32>
    %189 = arith.negf %188 : vector<8x128xf32>
    %190 = math.exp %189 : vector<8x128xf32>
    %cst_70 = arith.constant 1.000000e+00 : f32
    %191 = vector.broadcast %cst_70 : f32 to vector<8x128xf32>
    %192 = arith.addf %191, %190 : vector<8x128xf32>
    %193 = arith.divf %191, %192 : vector<8x128xf32>
    %194 = vector.extract_strided_slice %181 {offsets = [0, 256], sizes = [8, 128], strides = [1, 1]} : vector<8x512xf32> to vector<8x128xf32>
    %195 = math.tanh %194 : vector<8x128xf32>
    %196 = vector.extract_strided_slice %181 {offsets = [0, 384], sizes = [8, 128], strides = [1, 1]} : vector<8x512xf32> to vector<8x128xf32>
    %197 = arith.negf %196 : vector<8x128xf32>
    %198 = math.exp %197 : vector<8x128xf32>
    %cst_71 = arith.constant 1.000000e+00 : f32
    %199 = vector.broadcast %cst_71 : f32 to vector<8x128xf32>
    %200 = arith.addf %199, %198 : vector<8x128xf32>
    %201 = arith.divf %199, %200 : vector<8x128xf32>
    %202 = arith.mulf %193, %138 : vector<8x128xf32>
    %203 = arith.mulf %187, %195 : vector<8x128xf32>
    %204 = arith.addf %202, %203 : vector<8x128xf32>
    %205 = math.tanh %204 : vector<8x128xf32>
    %206 = arith.mulf %201, %205 : vector<8x128xf32>
    %c2_72 = arith.constant 2 : index
    %c0_73 = arith.constant 0 : index
    %c0_74 = arith.constant 0 : index
    %207 = vector.load %arg6[%c2_72, %c0_73, %c0_74] : memref<8x8x128xf32, #tpu.memory_space<vmem>>, vector<1x8x128xf32>
    %208 = vector.shape_cast %207 : vector<1x8x128xf32> to vector<8x128xf32>
    %209 = vector.shape_cast %176 : vector<8x128xf32> to vector<1x8x128xf32>
    tpu.vector_store %arg6[%c2_72, %c0_73, %c0_74], %209 {strides = array<i32>} : memref<8x8x128xf32, #tpu.memory_space<vmem>>, vector<1x8x128xf32>,
    %c5_75 = arith.constant 5 : index
    %c0_76 = arith.constant 0 : index
    %c0_77 = arith.constant 0 : index
    %210 = vector.load %arg7[%c5_75, %c0_76, %c0_77] : memref<8x8x128xf32, #tpu.memory_space<vmem>>, vector<1x8x128xf32>
    %211 = vector.shape_cast %210 : vector<1x8x128xf32> to vector<8x128xf32>
    %212 = vector.shape_cast %206 : vector<8x128xf32> to vector<1x8x128xf32>
    tpu.vector_store %arg7[%c5_75, %c0_76, %c0_77], %212 {strides = array<i32>} : memref<8x8x128xf32, #tpu.memory_space<vmem>>, vector<1x8x128xf32>,
    %c0_78 = arith.constant 0 : index
    %c3 = arith.constant 3 : index
    %c0_79 = arith.constant 0 : index
    %c0_80 = arith.constant 0 : index
    %213 = vector.load %arg1[%c0_78, %c3, %c0_79, %c0_80] : memref<1x8x8x512xf32, #tpu.memory_space<vmem>>, vector<1x1x8x512xf32>
    %214 = vector.shape_cast %213 : vector<1x1x8x512xf32> to vector<8x512xf32>
    %215 = arith.truncf %176 : vector<8x128xf32> to vector<8x128xbf16>
    %cst_81 = arith.constant dense<0.000000e+00> : vector<8x512xf32>
    %216 = tpu.matmul %215, %4, %cst_81 {dimension_numbers = #tpu.dot_dimension_numbers<[1], [0], [0], [1], [0, 0, 1, 1], [], []>} : vector<8x128xbf16>, vector<128x512xbf16>, vector<8x512xf32> -> vector<8x512xf32>
    %217 = arith.addf %214, %216 : vector<8x512xf32>
    %218 = vector.extract_strided_slice %217 {offsets = [0, 0], sizes = [8, 128], strides = [1, 1]} : vector<8x512xf32> to vector<8x128xf32>
    %219 = arith.negf %218 : vector<8x128xf32>
    %220 = math.exp %219 : vector<8x128xf32>
    %cst_82 = arith.constant 1.000000e+00 : f32
    %221 = vector.broadcast %cst_82 : f32 to vector<8x128xf32>
    %222 = arith.addf %221, %220 : vector<8x128xf32>
    %223 = arith.divf %221, %222 : vector<8x128xf32>
    %224 = vector.extract_strided_slice %217 {offsets = [0, 128], sizes = [8, 128], strides = [1, 1]} : vector<8x512xf32> to vector<8x128xf32>
    %225 = arith.negf %224 : vector<8x128xf32>
    %226 = math.exp %225 : vector<8x128xf32>
    %cst_83 = arith.constant 1.000000e+00 : f32
    %227 = vector.broadcast %cst_83 : f32 to vector<8x128xf32>
    %228 = arith.addf %227, %226 : vector<8x128xf32>
    %229 = arith.divf %227, %228 : vector<8x128xf32>
    %230 = vector.extract_strided_slice %217 {offsets = [0, 256], sizes = [8, 128], strides = [1, 1]} : vector<8x512xf32> to vector<8x128xf32>
    %231 = math.tanh %230 : vector<8x128xf32>
    %232 = vector.extract_strided_slice %217 {offsets = [0, 384], sizes = [8, 128], strides = [1, 1]} : vector<8x512xf32> to vector<8x128xf32>
    %233 = arith.negf %232 : vector<8x128xf32>
    %234 = math.exp %233 : vector<8x128xf32>
    %cst_84 = arith.constant 1.000000e+00 : f32
    %235 = vector.broadcast %cst_84 : f32 to vector<8x128xf32>
    %236 = arith.addf %235, %234 : vector<8x128xf32>
    %237 = arith.divf %235, %236 : vector<8x128xf32>
    %238 = arith.mulf %229, %174 : vector<8x128xf32>
    %239 = arith.mulf %223, %231 : vector<8x128xf32>
    %240 = arith.addf %238, %239 : vector<8x128xf32>
    %241 = math.tanh %240 : vector<8x128xf32>
    %242 = arith.mulf %237, %241 : vector<8x128xf32>
    %c0_85 = arith.constant 0 : index
    %c4 = arith.constant 4 : index
    %c0_86 = arith.constant 0 : index
    %c0_87 = arith.constant 0 : index
    %243 = vector.load %arg2[%c0_85, %c4, %c0_86, %c0_87] : memref<1x8x8x512xf32, #tpu.memory_space<vmem>>, vector<1x1x8x512xf32>
    %244 = vector.shape_cast %243 : vector<1x1x8x512xf32> to vector<8x512xf32>
    %245 = arith.truncf %206 : vector<8x128xf32> to vector<8x128xbf16>
    %cst_88 = arith.constant dense<0.000000e+00> : vector<8x512xf32>
    %246 = tpu.matmul %245, %6, %cst_88 {dimension_numbers = #tpu.dot_dimension_numbers<[1], [0], [0], [1], [0, 0, 1, 1], [], []>} : vector<8x128xbf16>, vector<128x512xbf16>, vector<8x512xf32> -> vector<8x512xf32>
    %247 = arith.addf %244, %246 : vector<8x512xf32>
    %248 = vector.extract_strided_slice %247 {offsets = [0, 0], sizes = [8, 128], strides = [1, 1]} : vector<8x512xf32> to vector<8x128xf32>
    %249 = arith.negf %248 : vector<8x128xf32>
    %250 = math.exp %249 : vector<8x128xf32>
    %cst_89 = arith.constant 1.000000e+00 : f32
    %251 = vector.broadcast %cst_89 : f32 to vector<8x128xf32>
    %252 = arith.addf %251, %250 : vector<8x128xf32>
    %253 = arith.divf %251, %252 : vector<8x128xf32>
    %254 = vector.extract_strided_slice %247 {offsets = [0, 128], sizes = [8, 128], strides = [1, 1]} : vector<8x512xf32> to vector<8x128xf32>
    %255 = arith.negf %254 : vector<8x128xf32>
    %256 = math.exp %255 : vector<8x128xf32>
    %cst_90 = arith.constant 1.000000e+00 : f32
    %257 = vector.broadcast %cst_90 : f32 to vector<8x128xf32>
    %258 = arith.addf %257, %256 : vector<8x128xf32>
    %259 = arith.divf %257, %258 : vector<8x128xf32>
    %260 = vector.extract_strided_slice %247 {offsets = [0, 256], sizes = [8, 128], strides = [1, 1]} : vector<8x512xf32> to vector<8x128xf32>
    %261 = math.tanh %260 : vector<8x128xf32>
    %262 = vector.extract_strided_slice %247 {offsets = [0, 384], sizes = [8, 128], strides = [1, 1]} : vector<8x512xf32> to vector<8x128xf32>
    %263 = arith.negf %262 : vector<8x128xf32>
    %264 = math.exp %263 : vector<8x128xf32>
    %cst_91 = arith.constant 1.000000e+00 : f32
    %265 = vector.broadcast %cst_91 : f32 to vector<8x128xf32>
    %266 = arith.addf %265, %264 : vector<8x128xf32>
    %267 = arith.divf %265, %266 : vector<8x128xf32>
    %268 = arith.mulf %259, %204 : vector<8x128xf32>
    %269 = arith.mulf %253, %261 : vector<8x128xf32>
    %270 = arith.addf %268, %269 : vector<8x128xf32>
    %271 = math.tanh %270 : vector<8x128xf32>
    %272 = arith.mulf %267, %271 : vector<8x128xf32>
    %c3_92 = arith.constant 3 : index
    %c0_93 = arith.constant 0 : index
    %c0_94 = arith.constant 0 : index
    %273 = vector.load %arg6[%c3_92, %c0_93, %c0_94] : memref<8x8x128xf32, #tpu.memory_space<vmem>>, vector<1x8x128xf32>
    %274 = vector.shape_cast %273 : vector<1x8x128xf32> to vector<8x128xf32>
    %275 = vector.shape_cast %242 : vector<8x128xf32> to vector<1x8x128xf32>
    tpu.vector_store %arg6[%c3_92, %c0_93, %c0_94], %275 {strides = array<i32>} : memref<8x8x128xf32, #tpu.memory_space<vmem>>, vector<1x8x128xf32>,
    %c4_95 = arith.constant 4 : index
    %c0_96 = arith.constant 0 : index
    %c0_97 = arith.constant 0 : index
    %276 = vector.load %arg7[%c4_95, %c0_96, %c0_97] : memref<8x8x128xf32, #tpu.memory_space<vmem>>, vector<1x8x128xf32>
    %277 = vector.shape_cast %276 : vector<1x8x128xf32> to vector<8x128xf32>
    %278 = vector.shape_cast %272 : vector<8x128xf32> to vector<1x8x128xf32>
    tpu.vector_store %arg7[%c4_95, %c0_96, %c0_97], %278 {strides = array<i32>} : memref<8x8x128xf32, #tpu.memory_space<vmem>>, vector<1x8x128xf32>,
    %c0_98 = arith.constant 0 : index
    %c4_99 = arith.constant 4 : index
    %c0_100 = arith.constant 0 : index
    %c0_101 = arith.constant 0 : index
    %279 = vector.load %arg1[%c0_98, %c4_99, %c0_100, %c0_101] : memref<1x8x8x512xf32, #tpu.memory_space<vmem>>, vector<1x1x8x512xf32>
    %280 = vector.shape_cast %279 : vector<1x1x8x512xf32> to vector<8x512xf32>
    %281 = arith.truncf %242 : vector<8x128xf32> to vector<8x128xbf16>
    %cst_102 = arith.constant dense<0.000000e+00> : vector<8x512xf32>
    %282 = tpu.matmul %281, %4, %cst_102 {dimension_numbers = #tpu.dot_dimension_numbers<[1], [0], [0], [1], [0, 0, 1, 1], [], []>} : vector<8x128xbf16>, vector<128x512xbf16>, vector<8x512xf32> -> vector<8x512xf32>
    %283 = arith.addf %280, %282 : vector<8x512xf32>
    %284 = vector.extract_strided_slice %283 {offsets = [0, 0], sizes = [8, 128], strides = [1, 1]} : vector<8x512xf32> to vector<8x128xf32>
    %285 = arith.negf %284 : vector<8x128xf32>
    %286 = math.exp %285 : vector<8x128xf32>
    %cst_103 = arith.constant 1.000000e+00 : f32
    %287 = vector.broadcast %cst_103 : f32 to vector<8x128xf32>
    %288 = arith.addf %287, %286 : vector<8x128xf32>
    %289 = arith.divf %287, %288 : vector<8x128xf32>
    %290 = vector.extract_strided_slice %283 {offsets = [0, 128], sizes = [8, 128], strides = [1, 1]} : vector<8x512xf32> to vector<8x128xf32>
    %291 = arith.negf %290 : vector<8x128xf32>
    %292 = math.exp %291 : vector<8x128xf32>
    %cst_104 = arith.constant 1.000000e+00 : f32
    %293 = vector.broadcast %cst_104 : f32 to vector<8x128xf32>
    %294 = arith.addf %293, %292 : vector<8x128xf32>
    %295 = arith.divf %293, %294 : vector<8x128xf32>
    %296 = vector.extract_strided_slice %283 {offsets = [0, 256], sizes = [8, 128], strides = [1, 1]} : vector<8x512xf32> to vector<8x128xf32>
    %297 = math.tanh %296 : vector<8x128xf32>
    %298 = vector.extract_strided_slice %283 {offsets = [0, 384], sizes = [8, 128], strides = [1, 1]} : vector<8x512xf32> to vector<8x128xf32>
    %299 = arith.negf %298 : vector<8x128xf32>
    %300 = math.exp %299 : vector<8x128xf32>
    %cst_105 = arith.constant 1.000000e+00 : f32
    %301 = vector.broadcast %cst_105 : f32 to vector<8x128xf32>
    %302 = arith.addf %301, %300 : vector<8x128xf32>
    %303 = arith.divf %301, %302 : vector<8x128xf32>
    %304 = arith.mulf %295, %240 : vector<8x128xf32>
    %305 = arith.mulf %289, %297 : vector<8x128xf32>
    %306 = arith.addf %304, %305 : vector<8x128xf32>
    %307 = math.tanh %306 : vector<8x128xf32>
    %308 = arith.mulf %303, %307 : vector<8x128xf32>
    %c0_106 = arith.constant 0 : index
    %c3_107 = arith.constant 3 : index
    %c0_108 = arith.constant 0 : index
    %c0_109 = arith.constant 0 : index
    %309 = vector.load %arg2[%c0_106, %c3_107, %c0_108, %c0_109] : memref<1x8x8x512xf32, #tpu.memory_space<vmem>>, vector<1x1x8x512xf32>
    %310 = vector.shape_cast %309 : vector<1x1x8x512xf32> to vector<8x512xf32>
    %311 = arith.truncf %272 : vector<8x128xf32> to vector<8x128xbf16>
    %cst_110 = arith.constant dense<0.000000e+00> : vector<8x512xf32>
    %312 = tpu.matmul %311, %6, %cst_110 {dimension_numbers = #tpu.dot_dimension_numbers<[1], [0], [0], [1], [0, 0, 1, 1], [], []>} : vector<8x128xbf16>, vector<128x512xbf16>, vector<8x512xf32> -> vector<8x512xf32>
    %313 = arith.addf %310, %312 : vector<8x512xf32>
    %314 = vector.extract_strided_slice %313 {offsets = [0, 0], sizes = [8, 128], strides = [1, 1]} : vector<8x512xf32> to vector<8x128xf32>
    %315 = arith.negf %314 : vector<8x128xf32>
    %316 = math.exp %315 : vector<8x128xf32>
    %cst_111 = arith.constant 1.000000e+00 : f32
    %317 = vector.broadcast %cst_111 : f32 to vector<8x128xf32>
    %318 = arith.addf %317, %316 : vector<8x128xf32>
    %319 = arith.divf %317, %318 : vector<8x128xf32>
    %320 = vector.extract_strided_slice %313 {offsets = [0, 128], sizes = [8, 128], strides = [1, 1]} : vector<8x512xf32> to vector<8x128xf32>
    %321 = arith.negf %320 : vector<8x128xf32>
    %322 = math.exp %321 : vector<8x128xf32>
    %cst_112 = arith.constant 1.000000e+00 : f32
    %323 = vector.broadcast %cst_112 : f32 to vector<8x128xf32>
    %324 = arith.addf %323, %322 : vector<8x128xf32>
    %325 = arith.divf %323, %324 : vector<8x128xf32>
    %326 = vector.extract_strided_slice %313 {offsets = [0, 256], sizes = [8, 128], strides = [1, 1]} : vector<8x512xf32> to vector<8x128xf32>
    %327 = math.tanh %326 : vector<8x128xf32>
    %328 = vector.extract_strided_slice %313 {offsets = [0, 384], sizes = [8, 128], strides = [1, 1]} : vector<8x512xf32> to vector<8x128xf32>
    %329 = arith.negf %328 : vector<8x128xf32>
    %330 = math.exp %329 : vector<8x128xf32>
    %cst_113 = arith.constant 1.000000e+00 : f32
    %331 = vector.broadcast %cst_113 : f32 to vector<8x128xf32>
    %332 = arith.addf %331, %330 : vector<8x128xf32>
    %333 = arith.divf %331, %332 : vector<8x128xf32>
    %334 = arith.mulf %325, %270 : vector<8x128xf32>
    %335 = arith.mulf %319, %327 : vector<8x128xf32>
    %336 = arith.addf %334, %335 : vector<8x128xf32>
    %337 = math.tanh %336 : vector<8x128xf32>
    %338 = arith.mulf %333, %337 : vector<8x128xf32>
    %c4_114 = arith.constant 4 : index
    %c0_115 = arith.constant 0 : index
    %c0_116 = arith.constant 0 : index
    %339 = vector.load %arg6[%c4_114, %c0_115, %c0_116] : memref<8x8x128xf32, #tpu.memory_space<vmem>>, vector<1x8x128xf32>
    %340 = vector.shape_cast %339 : vector<1x8x128xf32> to vector<8x128xf32>
    %341 = vector.shape_cast %308 : vector<8x128xf32> to vector<1x8x128xf32>
    tpu.vector_store %arg6[%c4_114, %c0_115, %c0_116], %341 {strides = array<i32>} : memref<8x8x128xf32, #tpu.memory_space<vmem>>, vector<1x8x128xf32>,
    %c3_117 = arith.constant 3 : index
    %c0_118 = arith.constant 0 : index
    %c0_119 = arith.constant 0 : index
    %342 = vector.load %arg7[%c3_117, %c0_118, %c0_119] : memref<8x8x128xf32, #tpu.memory_space<vmem>>, vector<1x8x128xf32>
    %343 = vector.shape_cast %342 : vector<1x8x128xf32> to vector<8x128xf32>
    %344 = vector.shape_cast %338 : vector<8x128xf32> to vector<1x8x128xf32>
    tpu.vector_store %arg7[%c3_117, %c0_118, %c0_119], %344 {strides = array<i32>} : memref<8x8x128xf32, #tpu.memory_space<vmem>>, vector<1x8x128xf32>,
    %c0_120 = arith.constant 0 : index
    %c5_121 = arith.constant 5 : index
    %c0_122 = arith.constant 0 : index
    %c0_123 = arith.constant 0 : index
    %345 = vector.load %arg1[%c0_120, %c5_121, %c0_122, %c0_123] : memref<1x8x8x512xf32, #tpu.memory_space<vmem>>, vector<1x1x8x512xf32>
    %346 = vector.shape_cast %345 : vector<1x1x8x512xf32> to vector<8x512xf32>
    %347 = arith.truncf %308 : vector<8x128xf32> to vector<8x128xbf16>
    %cst_124 = arith.constant dense<0.000000e+00> : vector<8x512xf32>
    %348 = tpu.matmul %347, %4, %cst_124 {dimension_numbers = #tpu.dot_dimension_numbers<[1], [0], [0], [1], [0, 0, 1, 1], [], []>} : vector<8x128xbf16>, vector<128x512xbf16>, vector<8x512xf32> -> vector<8x512xf32>
    %349 = arith.addf %346, %348 : vector<8x512xf32>
    %350 = vector.extract_strided_slice %349 {offsets = [0, 0], sizes = [8, 128], strides = [1, 1]} : vector<8x512xf32> to vector<8x128xf32>
    %351 = arith.negf %350 : vector<8x128xf32>
    %352 = math.exp %351 : vector<8x128xf32>
    %cst_125 = arith.constant 1.000000e+00 : f32
    %353 = vector.broadcast %cst_125 : f32 to vector<8x128xf32>
    %354 = arith.addf %353, %352 : vector<8x128xf32>
    %355 = arith.divf %353, %354 : vector<8x128xf32>
    %356 = vector.extract_strided_slice %349 {offsets = [0, 128], sizes = [8, 128], strides = [1, 1]} : vector<8x512xf32> to vector<8x128xf32>
    %357 = arith.negf %356 : vector<8x128xf32>
    %358 = math.exp %357 : vector<8x128xf32>
    %cst_126 = arith.constant 1.000000e+00 : f32
    %359 = vector.broadcast %cst_126 : f32 to vector<8x128xf32>
    %360 = arith.addf %359, %358 : vector<8x128xf32>
    %361 = arith.divf %359, %360 : vector<8x128xf32>
    %362 = vector.extract_strided_slice %349 {offsets = [0, 256], sizes = [8, 128], strides = [1, 1]} : vector<8x512xf32> to vector<8x128xf32>
    %363 = math.tanh %362 : vector<8x128xf32>
    %364 = vector.extract_strided_slice %349 {offsets = [0, 384], sizes = [8, 128], strides = [1, 1]} : vector<8x512xf32> to vector<8x128xf32>
    %365 = arith.negf %364 : vector<8x128xf32>
    %366 = math.exp %365 : vector<8x128xf32>
    %cst_127 = arith.constant 1.000000e+00 : f32
    %367 = vector.broadcast %cst_127 : f32 to vector<8x128xf32>
    %368 = arith.addf %367, %366 : vector<8x128xf32>
    %369 = arith.divf %367, %368 : vector<8x128xf32>
    %370 = arith.mulf %361, %306 : vector<8x128xf32>
    %371 = arith.mulf %355, %363 : vector<8x128xf32>
    %372 = arith.addf %370, %371 : vector<8x128xf32>
    %373 = math.tanh %372 : vector<8x128xf32>
    %374 = arith.mulf %369, %373 : vector<8x128xf32>
    %c0_128 = arith.constant 0 : index
    %c2_129 = arith.constant 2 : index
    %c0_130 = arith.constant 0 : index
    %c0_131 = arith.constant 0 : index
    %375 = vector.load %arg2[%c0_128, %c2_129, %c0_130, %c0_131] : memref<1x8x8x512xf32, #tpu.memory_space<vmem>>, vector<1x1x8x512xf32>
    %376 = vector.shape_cast %375 : vector<1x1x8x512xf32> to vector<8x512xf32>
    %377 = arith.truncf %338 : vector<8x128xf32> to vector<8x128xbf16>
    %cst_132 = arith.constant dense<0.000000e+00> : vector<8x512xf32>
    %378 = tpu.matmul %377, %6, %cst_132 {dimension_numbers = #tpu.dot_dimension_numbers<[1], [0], [0], [1], [0, 0, 1, 1], [], []>} : vector<8x128xbf16>, vector<128x512xbf16>, vector<8x512xf32> -> vector<8x512xf32>
    %379 = arith.addf %376, %378 : vector<8x512xf32>
    %380 = vector.extract_strided_slice %379 {offsets = [0, 0], sizes = [8, 128], strides = [1, 1]} : vector<8x512xf32> to vector<8x128xf32>
    %381 = arith.negf %380 : vector<8x128xf32>
    %382 = math.exp %381 : vector<8x128xf32>
    %cst_133 = arith.constant 1.000000e+00 : f32
    %383 = vector.broadcast %cst_133 : f32 to vector<8x128xf32>
    %384 = arith.addf %383, %382 : vector<8x128xf32>
    %385 = arith.divf %383, %384 : vector<8x128xf32>
    %386 = vector.extract_strided_slice %379 {offsets = [0, 128], sizes = [8, 128], strides = [1, 1]} : vector<8x512xf32> to vector<8x128xf32>
    %387 = arith.negf %386 : vector<8x128xf32>
    %388 = math.exp %387 : vector<8x128xf32>
    %cst_134 = arith.constant 1.000000e+00 : f32
    %389 = vector.broadcast %cst_134 : f32 to vector<8x128xf32>
    %390 = arith.addf %389, %388 : vector<8x128xf32>
    %391 = arith.divf %389, %390 : vector<8x128xf32>
    %392 = vector.extract_strided_slice %379 {offsets = [0, 256], sizes = [8, 128], strides = [1, 1]} : vector<8x512xf32> to vector<8x128xf32>
    %393 = math.tanh %392 : vector<8x128xf32>
    %394 = vector.extract_strided_slice %379 {offsets = [0, 384], sizes = [8, 128], strides = [1, 1]} : vector<8x512xf32> to vector<8x128xf32>
    %395 = arith.negf %394 : vector<8x128xf32>
    %396 = math.exp %395 : vector<8x128xf32>
    %cst_135 = arith.constant 1.000000e+00 : f32
    %397 = vector.broadcast %cst_135 : f32 to vector<8x128xf32>
    %398 = arith.addf %397, %396 : vector<8x128xf32>
    %399 = arith.divf %397, %398 : vector<8x128xf32>
    %400 = arith.mulf %391, %336 : vector<8x128xf32>
    %401 = arith.mulf %385, %393 : vector<8x128xf32>
    %402 = arith.addf %400, %401 : vector<8x128xf32>
    %403 = math.tanh %402 : vector<8x128xf32>
    %404 = arith.mulf %399, %403 : vector<8x128xf32>
    %c5_136 = arith.constant 5 : index
    %c0_137 = arith.constant 0 : index
    %c0_138 = arith.constant 0 : index
    %405 = vector.load %arg6[%c5_136, %c0_137, %c0_138] : memref<8x8x128xf32, #tpu.memory_space<vmem>>, vector<1x8x128xf32>
    %406 = vector.shape_cast %405 : vector<1x8x128xf32> to vector<8x128xf32>
    %407 = vector.shape_cast %374 : vector<8x128xf32> to vector<1x8x128xf32>
    tpu.vector_store %arg6[%c5_136, %c0_137, %c0_138], %407 {strides = array<i32>} : memref<8x8x128xf32, #tpu.memory_space<vmem>>, vector<1x8x128xf32>,
    %c2_139 = arith.constant 2 : index
    %c0_140 = arith.constant 0 : index
    %c0_141 = arith.constant 0 : index
    %408 = vector.load %arg7[%c2_139, %c0_140, %c0_141] : memref<8x8x128xf32, #tpu.memory_space<vmem>>, vector<1x8x128xf32>
    %409 = vector.shape_cast %408 : vector<1x8x128xf32> to vector<8x128xf32>
    %410 = vector.shape_cast %404 : vector<8x128xf32> to vector<1x8x128xf32>
    tpu.vector_store %arg7[%c2_139, %c0_140, %c0_141], %410 {strides = array<i32>} : memref<8x8x128xf32, #tpu.memory_space<vmem>>, vector<1x8x128xf32>,
    %c0_142 = arith.constant 0 : index
    %c6_143 = arith.constant 6 : index
    %c0_144 = arith.constant 0 : index
    %c0_145 = arith.constant 0 : index
    %411 = vector.load %arg1[%c0_142, %c6_143, %c0_144, %c0_145] : memref<1x8x8x512xf32, #tpu.memory_space<vmem>>, vector<1x1x8x512xf32>
    %412 = vector.shape_cast %411 : vector<1x1x8x512xf32> to vector<8x512xf32>
    %413 = arith.truncf %374 : vector<8x128xf32> to vector<8x128xbf16>
    %cst_146 = arith.constant dense<0.000000e+00> : vector<8x512xf32>
    %414 = tpu.matmul %413, %4, %cst_146 {dimension_numbers = #tpu.dot_dimension_numbers<[1], [0], [0], [1], [0, 0, 1, 1], [], []>} : vector<8x128xbf16>, vector<128x512xbf16>, vector<8x512xf32> -> vector<8x512xf32>
    %415 = arith.addf %412, %414 : vector<8x512xf32>
    %416 = vector.extract_strided_slice %415 {offsets = [0, 0], sizes = [8, 128], strides = [1, 1]} : vector<8x512xf32> to vector<8x128xf32>
    %417 = arith.negf %416 : vector<8x128xf32>
    %418 = math.exp %417 : vector<8x128xf32>
    %cst_147 = arith.constant 1.000000e+00 : f32
    %419 = vector.broadcast %cst_147 : f32 to vector<8x128xf32>
    %420 = arith.addf %419, %418 : vector<8x128xf32>
    %421 = arith.divf %419, %420 : vector<8x128xf32>
    %422 = vector.extract_strided_slice %415 {offsets = [0, 128], sizes = [8, 128], strides = [1, 1]} : vector<8x512xf32> to vector<8x128xf32>
    %423 = arith.negf %422 : vector<8x128xf32>
    %424 = math.exp %423 : vector<8x128xf32>
    %cst_148 = arith.constant 1.000000e+00 : f32
    %425 = vector.broadcast %cst_148 : f32 to vector<8x128xf32>
    %426 = arith.addf %425, %424 : vector<8x128xf32>
    %427 = arith.divf %425, %426 : vector<8x128xf32>
    %428 = vector.extract_strided_slice %415 {offsets = [0, 256], sizes = [8, 128], strides = [1, 1]} : vector<8x512xf32> to vector<8x128xf32>
    %429 = math.tanh %428 : vector<8x128xf32>
    %430 = vector.extract_strided_slice %415 {offsets = [0, 384], sizes = [8, 128], strides = [1, 1]} : vector<8x512xf32> to vector<8x128xf32>
    %431 = arith.negf %430 : vector<8x128xf32>
    %432 = math.exp %431 : vector<8x128xf32>
    %cst_149 = arith.constant 1.000000e+00 : f32
    %433 = vector.broadcast %cst_149 : f32 to vector<8x128xf32>
    %434 = arith.addf %433, %432 : vector<8x128xf32>
    %435 = arith.divf %433, %434 : vector<8x128xf32>
    %436 = arith.mulf %427, %372 : vector<8x128xf32>
    %437 = arith.mulf %421, %429 : vector<8x128xf32>
    %438 = arith.addf %436, %437 : vector<8x128xf32>
    %439 = math.tanh %438 : vector<8x128xf32>
    %440 = arith.mulf %435, %439 : vector<8x128xf32>
    %c0_150 = arith.constant 0 : index
    %c1_151 = arith.constant 1 : index
    %c0_152 = arith.constant 0 : index
    %c0_153 = arith.constant 0 : index
    %441 = vector.load %arg2[%c0_150, %c1_151, %c0_152, %c0_153] : memref<1x8x8x512xf32, #tpu.memory_space<vmem>>, vector<1x1x8x512xf32>
    %442 = vector.shape_cast %441 : vector<1x1x8x512xf32> to vector<8x512xf32>
    %443 = arith.truncf %404 : vector<8x128xf32> to vector<8x128xbf16>
    %cst_154 = arith.constant dense<0.000000e+00> : vector<8x512xf32>
    %444 = tpu.matmul %443, %6, %cst_154 {dimension_numbers = #tpu.dot_dimension_numbers<[1], [0], [0], [1], [0, 0, 1, 1], [], []>} : vector<8x128xbf16>, vector<128x512xbf16>, vector<8x512xf32> -> vector<8x512xf32>
    %445 = arith.addf %442, %444 : vector<8x512xf32>
    %446 = vector.extract_strided_slice %445 {offsets = [0, 0], sizes = [8, 128], strides = [1, 1]} : vector<8x512xf32> to vector<8x128xf32>
    %447 = arith.negf %446 : vector<8x128xf32>
    %448 = math.exp %447 : vector<8x128xf32>
    %cst_155 = arith.constant 1.000000e+00 : f32
    %449 = vector.broadcast %cst_155 : f32 to vector<8x128xf32>
    %450 = arith.addf %449, %448 : vector<8x128xf32>
    %451 = arith.divf %449, %450 : vector<8x128xf32>
    %452 = vector.extract_strided_slice %445 {offsets = [0, 128], sizes = [8, 128], strides = [1, 1]} : vector<8x512xf32> to vector<8x128xf32>
    %453 = arith.negf %452 : vector<8x128xf32>
    %454 = math.exp %453 : vector<8x128xf32>
    %cst_156 = arith.constant 1.000000e+00 : f32
    %455 = vector.broadcast %cst_156 : f32 to vector<8x128xf32>
    %456 = arith.addf %455, %454 : vector<8x128xf32>
    %457 = arith.divf %455, %456 : vector<8x128xf32>
    %458 = vector.extract_strided_slice %445 {offsets = [0, 256], sizes = [8, 128], strides = [1, 1]} : vector<8x512xf32> to vector<8x128xf32>
    %459 = math.tanh %458 : vector<8x128xf32>
    %460 = vector.extract_strided_slice %445 {offsets = [0, 384], sizes = [8, 128], strides = [1, 1]} : vector<8x512xf32> to vector<8x128xf32>
    %461 = arith.negf %460 : vector<8x128xf32>
    %462 = math.exp %461 : vector<8x128xf32>
    %cst_157 = arith.constant 1.000000e+00 : f32
    %463 = vector.broadcast %cst_157 : f32 to vector<8x128xf32>
    %464 = arith.addf %463, %462 : vector<8x128xf32>
    %465 = arith.divf %463, %464 : vector<8x128xf32>
    %466 = arith.mulf %457, %402 : vector<8x128xf32>
    %467 = arith.mulf %451, %459 : vector<8x128xf32>
    %468 = arith.addf %466, %467 : vector<8x128xf32>
    %469 = math.tanh %468 : vector<8x128xf32>
    %470 = arith.mulf %465, %469 : vector<8x128xf32>
    %c6_158 = arith.constant 6 : index
    %c0_159 = arith.constant 0 : index
    %c0_160 = arith.constant 0 : index
    %471 = vector.load %arg6[%c6_158, %c0_159, %c0_160] : memref<8x8x128xf32, #tpu.memory_space<vmem>>, vector<1x8x128xf32>
    %472 = vector.shape_cast %471 : vector<1x8x128xf32> to vector<8x128xf32>
    %473 = vector.shape_cast %440 : vector<8x128xf32> to vector<1x8x128xf32>
    tpu.vector_store %arg6[%c6_158, %c0_159, %c0_160], %473 {strides = array<i32>} : memref<8x8x128xf32, #tpu.memory_space<vmem>>, vector<1x8x128xf32>,
    %c1_161 = arith.constant 1 : index
    %c0_162 = arith.constant 0 : index
    %c0_163 = arith.constant 0 : index
    %474 = vector.load %arg7[%c1_161, %c0_162, %c0_163] : memref<8x8x128xf32, #tpu.memory_space<vmem>>, vector<1x8x128xf32>
    %475 = vector.shape_cast %474 : vector<1x8x128xf32> to vector<8x128xf32>
    %476 = vector.shape_cast %470 : vector<8x128xf32> to vector<1x8x128xf32>
    tpu.vector_store %arg7[%c1_161, %c0_162, %c0_163], %476 {strides = array<i32>} : memref<8x8x128xf32, #tpu.memory_space<vmem>>, vector<1x8x128xf32>,
    %c0_164 = arith.constant 0 : index
    %c7_165 = arith.constant 7 : index
    %c0_166 = arith.constant 0 : index
    %c0_167 = arith.constant 0 : index
    %477 = vector.load %arg1[%c0_164, %c7_165, %c0_166, %c0_167] : memref<1x8x8x512xf32, #tpu.memory_space<vmem>>, vector<1x1x8x512xf32>
    %478 = vector.shape_cast %477 : vector<1x1x8x512xf32> to vector<8x512xf32>
    %479 = arith.truncf %440 : vector<8x128xf32> to vector<8x128xbf16>
    %cst_168 = arith.constant dense<0.000000e+00> : vector<8x512xf32>
    %480 = tpu.matmul %479, %4, %cst_168 {dimension_numbers = #tpu.dot_dimension_numbers<[1], [0], [0], [1], [0, 0, 1, 1], [], []>} : vector<8x128xbf16>, vector<128x512xbf16>, vector<8x512xf32> -> vector<8x512xf32>
    %481 = arith.addf %478, %480 : vector<8x512xf32>
    %482 = vector.extract_strided_slice %481 {offsets = [0, 0], sizes = [8, 128], strides = [1, 1]} : vector<8x512xf32> to vector<8x128xf32>
    %483 = arith.negf %482 : vector<8x128xf32>
    %484 = math.exp %483 : vector<8x128xf32>
    %cst_169 = arith.constant 1.000000e+00 : f32
    %485 = vector.broadcast %cst_169 : f32 to vector<8x128xf32>
    %486 = arith.addf %485, %484 : vector<8x128xf32>
    %487 = arith.divf %485, %486 : vector<8x128xf32>
    %488 = vector.extract_strided_slice %481 {offsets = [0, 128], sizes = [8, 128], strides = [1, 1]} : vector<8x512xf32> to vector<8x128xf32>
    %489 = arith.negf %488 : vector<8x128xf32>
    %490 = math.exp %489 : vector<8x128xf32>
    %cst_170 = arith.constant 1.000000e+00 : f32
    %491 = vector.broadcast %cst_170 : f32 to vector<8x128xf32>
    %492 = arith.addf %491, %490 : vector<8x128xf32>
    %493 = arith.divf %491, %492 : vector<8x128xf32>
    %494 = vector.extract_strided_slice %481 {offsets = [0, 256], sizes = [8, 128], strides = [1, 1]} : vector<8x512xf32> to vector<8x128xf32>
    %495 = math.tanh %494 : vector<8x128xf32>
    %496 = vector.extract_strided_slice %481 {offsets = [0, 384], sizes = [8, 128], strides = [1, 1]} : vector<8x512xf32> to vector<8x128xf32>
    %497 = arith.negf %496 : vector<8x128xf32>
    %498 = math.exp %497 : vector<8x128xf32>
    %cst_171 = arith.constant 1.000000e+00 : f32
    %499 = vector.broadcast %cst_171 : f32 to vector<8x128xf32>
    %500 = arith.addf %499, %498 : vector<8x128xf32>
    %501 = arith.divf %499, %500 : vector<8x128xf32>
    %502 = arith.mulf %493, %438 : vector<8x128xf32>
    %503 = arith.mulf %487, %495 : vector<8x128xf32>
    %504 = arith.addf %502, %503 : vector<8x128xf32>
    %505 = math.tanh %504 : vector<8x128xf32>
    %506 = arith.mulf %501, %505 : vector<8x128xf32>
    %c0_172 = arith.constant 0 : index
    %c0_173 = arith.constant 0 : index
    %c0_174 = arith.constant 0 : index
    %c0_175 = arith.constant 0 : index
    %507 = vector.load %arg2[%c0_172, %c0_173, %c0_174, %c0_175] : memref<1x8x8x512xf32, #tpu.memory_space<vmem>>, vector<1x1x8x512xf32>
    %508 = vector.shape_cast %507 : vector<1x1x8x512xf32> to vector<8x512xf32>
    %509 = arith.truncf %470 : vector<8x128xf32> to vector<8x128xbf16>
    %cst_176 = arith.constant dense<0.000000e+00> : vector<8x512xf32>
    %510 = tpu.matmul %509, %6, %cst_176 {dimension_numbers = #tpu.dot_dimension_numbers<[1], [0], [0], [1], [0, 0, 1, 1], [], []>} : vector<8x128xbf16>, vector<128x512xbf16>, vector<8x512xf32> -> vector<8x512xf32>
    %511 = arith.addf %508, %510 : vector<8x512xf32>
    %512 = vector.extract_strided_slice %511 {offsets = [0, 0], sizes = [8, 128], strides = [1, 1]} : vector<8x512xf32> to vector<8x128xf32>
    %513 = arith.negf %512 : vector<8x128xf32>
    %514 = math.exp %513 : vector<8x128xf32>
    %cst_177 = arith.constant 1.000000e+00 : f32
    %515 = vector.broadcast %cst_177 : f32 to vector<8x128xf32>
    %516 = arith.addf %515, %514 : vector<8x128xf32>
    %517 = arith.divf %515, %516 : vector<8x128xf32>
    %518 = vector.extract_strided_slice %511 {offsets = [0, 128], sizes = [8, 128], strides = [1, 1]} : vector<8x512xf32> to vector<8x128xf32>
    %519 = arith.negf %518 : vector<8x128xf32>
    %520 = math.exp %519 : vector<8x128xf32>
    %cst_178 = arith.constant 1.000000e+00 : f32
    %521 = vector.broadcast %cst_178 : f32 to vector<8x128xf32>
    %522 = arith.addf %521, %520 : vector<8x128xf32>
    %523 = arith.divf %521, %522 : vector<8x128xf32>
    %524 = vector.extract_strided_slice %511 {offsets = [0, 256], sizes = [8, 128], strides = [1, 1]} : vector<8x512xf32> to vector<8x128xf32>
    %525 = math.tanh %524 : vector<8x128xf32>
    %526 = vector.extract_strided_slice %511 {offsets = [0, 384], sizes = [8, 128], strides = [1, 1]} : vector<8x512xf32> to vector<8x128xf32>
    %527 = arith.negf %526 : vector<8x128xf32>
    %528 = math.exp %527 : vector<8x128xf32>
    %cst_179 = arith.constant 1.000000e+00 : f32
    %529 = vector.broadcast %cst_179 : f32 to vector<8x128xf32>
    %530 = arith.addf %529, %528 : vector<8x128xf32>
    %531 = arith.divf %529, %530 : vector<8x128xf32>
    %532 = arith.mulf %523, %468 : vector<8x128xf32>
    %533 = arith.mulf %517, %525 : vector<8x128xf32>
    %534 = arith.addf %532, %533 : vector<8x128xf32>
    %535 = math.tanh %534 : vector<8x128xf32>
    %536 = arith.mulf %531, %535 : vector<8x128xf32>
    %c7_180 = arith.constant 7 : index
    %c0_181 = arith.constant 0 : index
    %c0_182 = arith.constant 0 : index
    %537 = vector.load %arg6[%c7_180, %c0_181, %c0_182] : memref<8x8x128xf32, #tpu.memory_space<vmem>>, vector<1x8x128xf32>
    %538 = vector.shape_cast %537 : vector<1x8x128xf32> to vector<8x128xf32>
    %539 = vector.shape_cast %506 : vector<8x128xf32> to vector<1x8x128xf32>
    tpu.vector_store %arg6[%c7_180, %c0_181, %c0_182], %539 {strides = array<i32>} : memref<8x8x128xf32, #tpu.memory_space<vmem>>, vector<1x8x128xf32>,
    %c0_183 = arith.constant 0 : index
    %c0_184 = arith.constant 0 : index
    %c0_185 = arith.constant 0 : index
    %540 = vector.load %arg7[%c0_183, %c0_184, %c0_185] : memref<8x8x128xf32, #tpu.memory_space<vmem>>, vector<1x8x128xf32>
    %541 = vector.shape_cast %540 : vector<1x8x128xf32> to vector<8x128xf32>
    %542 = vector.shape_cast %536 : vector<8x128xf32> to vector<1x8x128xf32>
    tpu.vector_store %arg7[%c0_183, %c0_184, %c0_185], %542 {strides = array<i32>} : memref<8x8x128xf32, #tpu.memory_space<vmem>>, vector<1x8x128xf32>,
    %c0_i32_186 = arith.constant 0 : i32
    %543 = arith.cmpi eq, %arg0, %c0_i32_186 : i32
    %544 = arith.extui %543 : i1 to i32
    %c0_i32_187 = arith.constant 0 : i32
    %545 = arith.cmpi ne, %544, %c0_i32_187 : i32
    scf.if %545 {
      %c0_202 = arith.constant 0 : index
      %c0_203 = arith.constant 0 : index
      %c0_204 = arith.constant 0 : index
      %561 = vector.load %arg8[%c0_202, %c0_203, %c0_204] : memref<2x8x128xf32, #tpu.memory_space<vmem>>, vector<1x8x128xf32>
      %562 = vector.shape_cast %561 : vector<1x8x128xf32> to vector<8x128xf32>
      %563 = vector.shape_cast %506 : vector<8x128xf32> to vector<1x8x128xf32>
      tpu.vector_store %arg8[%c0_202, %c0_203, %c0_204], %563 {strides = array<i32>} : memref<2x8x128xf32, #tpu.memory_space<vmem>>, vector<1x8x128xf32>,
      %c0_205 = arith.constant 0 : index
      %c0_206 = arith.constant 0 : index
      %c0_207 = arith.constant 0 : index
      %564 = vector.load %arg9[%c0_205, %c0_206, %c0_207] : memref<2x8x128xf32, #tpu.memory_space<vmem>>, vector<1x8x128xf32>
      %565 = vector.shape_cast %564 : vector<1x8x128xf32> to vector<8x128xf32>
      %566 = vector.shape_cast %504 : vector<8x128xf32> to vector<1x8x128xf32>
      tpu.vector_store %arg9[%c0_205, %c0_206, %c0_207], %566 {strides = array<i32>} : memref<2x8x128xf32, #tpu.memory_space<vmem>>, vector<1x8x128xf32>,
    } else {
    }
    %c0_188 = arith.constant 0 : index
    %c0_189 = arith.constant 0 : index
    %c0_190 = arith.constant 0 : index
    %546 = vector.load %arg10[%c0_188, %c0_189, %c0_190] : memref<2x8x128xf32, #tpu.memory_space<vmem>>, vector<1x8x128xf32>
    %547 = vector.shape_cast %546 : vector<1x8x128xf32> to vector<8x128xf32>
    %548 = vector.shape_cast %506 : vector<8x128xf32> to vector<1x8x128xf32>
    tpu.vector_store %arg10[%c0_188, %c0_189, %c0_190], %548 {strides = array<i32>} : memref<2x8x128xf32, #tpu.memory_space<vmem>>, vector<1x8x128xf32>,
    %c0_191 = arith.constant 0 : index
    %c0_192 = arith.constant 0 : index
    %c0_193 = arith.constant 0 : index
    %549 = vector.load %arg11[%c0_191, %c0_192, %c0_193] : memref<2x8x128xf32, #tpu.memory_space<vmem>>, vector<1x8x128xf32>
    %550 = vector.shape_cast %549 : vector<1x8x128xf32> to vector<8x128xf32>
    %551 = vector.shape_cast %504 : vector<8x128xf32> to vector<1x8x128xf32>
    tpu.vector_store %arg11[%c0_191, %c0_192, %c0_193], %551 {strides = array<i32>} : memref<2x8x128xf32, #tpu.memory_space<vmem>>, vector<1x8x128xf32>,
    %c1_194 = arith.constant 1 : index
    %c0_195 = arith.constant 0 : index
    %c0_196 = arith.constant 0 : index
    %552 = vector.load %arg10[%c1_194, %c0_195, %c0_196] : memref<2x8x128xf32, #tpu.memory_space<vmem>>, vector<1x8x128xf32>
    %553 = vector.shape_cast %552 : vector<1x8x128xf32> to vector<8x128xf32>
    %554 = vector.shape_cast %536 : vector<8x128xf32> to vector<1x8x128xf32>
    tpu.vector_store %arg10[%c1_194, %c0_195, %c0_196], %554 {strides = array<i32>} : memref<2x8x128xf32, #tpu.memory_space<vmem>>, vector<1x8x128xf32>,
    %c1_197 = arith.constant 1 : index
    %c0_198 = arith.constant 0 : index
    %c0_199 = arith.constant 0 : index
    %555 = vector.load %arg11[%c1_197, %c0_198, %c0_199] : memref<2x8x128xf32, #tpu.memory_space<vmem>>, vector<1x8x128xf32>
    %556 = vector.shape_cast %555 : vector<1x8x128xf32> to vector<8x128xf32>
    %557 = vector.shape_cast %534 : vector<8x128xf32> to vector<1x8x128xf32>
    tpu.vector_store %arg11[%c1_197, %c0_198, %c0_199], %557 {strides = array<i32>} : memref<2x8x128xf32, #tpu.memory_space<vmem>>, vector<1x8x128xf32>,
    %c0_i32_200 = arith.constant 0 : i32
    %558 = arith.cmpi eq, %arg0, %c0_i32_200 : i32
    %559 = arith.extui %558 : i1 to i32
    %c0_i32_201 = arith.constant 0 : i32
    %560 = arith.cmpi ne, %559, %c0_i32_201 : i32
    scf.if %560 {
      %c1_202 = arith.constant 1 : index
      %c0_203 = arith.constant 0 : index
      %c0_204 = arith.constant 0 : index
      %561 = vector.load %arg8[%c1_202, %c0_203, %c0_204] : memref<2x8x128xf32, #tpu.memory_space<vmem>>, vector<1x8x128xf32>
      %562 = vector.shape_cast %561 : vector<1x8x128xf32> to vector<8x128xf32>
      %563 = vector.shape_cast %536 : vector<8x128xf32> to vector<1x8x128xf32>
      tpu.vector_store %arg8[%c1_202, %c0_203, %c0_204], %563 {strides = array<i32>} : memref<2x8x128xf32, #tpu.memory_space<vmem>>, vector<1x8x128xf32>,
      %c1_205 = arith.constant 1 : index
      %c0_206 = arith.constant 0 : index
      %c0_207 = arith.constant 0 : index
      %564 = vector.load %arg9[%c1_205, %c0_206, %c0_207] : memref<2x8x128xf32, #tpu.memory_space<vmem>>, vector<1x8x128xf32>
      %565 = vector.shape_cast %564 : vector<1x8x128xf32> to vector<8x128xf32>
      %566 = vector.shape_cast %534 : vector<8x128xf32> to vector<1x8x128xf32>
      tpu.vector_store %arg9[%c1_205, %c0_206, %c0_207], %566 {strides = array<i32>} : memref<2x8x128xf32, #tpu.memory_space<vmem>>, vector<1x8x128xf32>,
    } else {
    }
    return
  }
  func.func @transform_0(%arg0: i32) -> (i32, i32, i32, i32) {
    %c0_i32 = arith.constant 0 : i32
    %c0_i32_0 = arith.constant 0 : i32
    %c0_i32_1 = arith.constant 0 : i32
    %c0_i32_2 = arith.constant 0 : i32
    return %c0_i32, %arg0, %c0_i32_0, %c0_i32_1 : i32, i32, i32, i32
  }
  func.func @transform_1(%arg0: i32) -> (i32, i32, i32, i32) {
    %c0_i32 = arith.constant 0 : i32
    %0 = arith.subi %c0_i32, %arg0 : i32
    %c1_i32 = arith.constant 1 : i32
    %c0_i32_0 = arith.constant 0 : i32
    %c0_i32_1 = arith.constant 0 : i32
    %c0_i32_2 = arith.constant 0 : i32
    return %c1_i32, %0, %c0_i32_0, %c0_i32_1 : i32, i32, i32, i32
  }
  func.func @transform_2(%arg0: i32) -> (i32, i32, i32) {
    %c0_i32 = arith.constant 0 : i32
    %c0_i32_0 = arith.constant 0 : i32
    %c0_i32_1 = arith.constant 0 : i32
    %c0_i32_2 = arith.constant 0 : i32
    return %c0_i32, %c0_i32_0, %c0_i32_1 : i32, i32, i32
  }
  func.func @transform_3(%arg0: i32) -> (i32, i32, i32) {
    %c0_i32 = arith.constant 0 : i32
    %c0_i32_0 = arith.constant 0 : i32
    %c0_i32_1 = arith.constant 0 : i32
    %c0_i32_2 = arith.constant 0 : i32
    return %c0_i32, %c0_i32_0, %c0_i32_1 : i32, i32, i32
  }
  func.func @transform_4(%arg0: i32) -> (i32, i32, i32) {
    %c0_i32 = arith.constant 0 : i32
    %c0_i32_0 = arith.constant 0 : i32
    %c0_i32_1 = arith.constant 0 : i32
    %c0_i32_2 = arith.constant 0 : i32
    return %c0_i32, %c0_i32_0, %c0_i32_1 : i32, i32, i32
  }
  func.func @transform_5(%arg0: i32) -> (i32, i32, i32) {
    %c0_i32 = arith.constant 0 : i32
    %c0_i32_0 = arith.constant 0 : i32
    %c0_i32_1 = arith.constant 0 : i32
    return %arg0, %c0_i32, %c0_i32_0 : i32, i32, i32
  }
  func.func @transform_6(%arg0: i32) -> (i32, i32, i32) {
    %c0_i32 = arith.constant 0 : i32
    %0 = arith.subi %c0_i32, %arg0 : i32
    %c0_i32_0 = arith.constant 0 : i32
    %c0_i32_1 = arith.constant 0 : i32
    %c0_i32_2 = arith.constant 0 : i32
    return %0, %c0_i32_0, %c0_i32_1 : i32, i32, i32
  }
  func.func @transform_7(%arg0: i32) -> (i32, i32, i32) {
    %c0_i32 = arith.constant 0 : i32
    %c0_i32_0 = arith.constant 0 : i32
    %c0_i32_1 = arith.constant 0 : i32
    %c0_i32_2 = arith.constant 0 : i32
    return %c0_i32, %c0_i32_0, %c0_i32_1 : i32, i32, i32
  }
  func.func @transform_8(%arg0: i32) -> (i32, i32, i32) {
    %c0_i32 = arith.constant 0 : i32
    %c0_i32_0 = arith.constant 0 : i32
    %c0_i32_1 = arith.constant 0 : i32
    %c0_i32_2 = arith.constant 0 : i32
    return %c0_i32, %c0_i32_0, %c0_i32_1 : i32, i32, i32
  }
}

</mosaic_0001>

<bundles_post_ra>
// kernel: bidir_lstm_layer.2
= control target key start
LH: loop header
LB: loop body
LE: loop exit
PB: predicated region body
PF: predicated region fallthrough
CT: control target
= control target key end

     0   :  { %s854_s12 = smov 0   ;;  %s856_s13 = smov 0   ;;  %s1009_s0 = inlined_call_operand.vmem [shape: f32[64,16], index: 0, kind: input, shape index: {}]   ;;  %s1010_s1 = inlined_call_operand.vmem [shape: f32[2,16,512], index: 1, kind: input, shape index: {}]   ;;  %s1011_s2 = inlined_call_operand.vmem [shape: f32[2,1,512], index: 2, kind: input, shape index: {}]   ;;  %s1012_s3 = inlined_call_operand.vmem [shape: f32[2,64,512], index: 3, kind: output, shape index: {}]  }
   0x1   :  { %s858_s14 = smov 0  }
   0x2 LB: > { %s32_s15 = sadd.s32 1, %s827_s13  ;;  %p750_p0 = scmp.ge.s32.totalorder %s831_s14, 1  ;;  %s831_s14 = sphi %s858_s14, %s13_s14   ;;  %s827_s13 = sphi %s856_s13, %s1014_s13   ;;  %s823_s12 = sphi %s854_s12, %s1013_s12  }
   0x3   : > { %p34_p1 = scmp.ge.s32.totalorder %s32_s15, 2  ;;  %p194_p2 = scmp.lt.s32.totalorder %s831_s14, 3 }
   0x5   : > { %s1016_s15 = smov (%p34_p1, %s32_s15), 0  ;;  %p195_p3 = pnand %p750_p0, %p194_p2 }
   0x6   : > { %p251_p4 = scmp.lt.s32.totalorder (!%p195_p3), %s823_s12, 1  ;;  %v833_v0 = vmov (!%p195_p3), 0.0   ;;  %v285_v13 = vld [vmem:[%s1009_s0] sm:$0xff] (!%p195_p3)  ;;  %vm323_vm0 = vcmask (!%p195_p3), 130048   ;;  %v286_v14 = vld [vmem:[%s1009_s0 + $0x8] sm:$0xff] (!%p195_p3)  ;;  %v287_v15 = vld [vmem:[%s1009_s0 + $0x10] sm:$0xff] (!%p195_p3)  ;;  %v303_v21 = vlaneseq (!%p195_p3) }
   0x7   : > { %198 = sbr.rel (%p195_p3) target bundleno = 270 (0x10e), region = 32  ;;  %412 = vmatprep.mubr.f32.mxu0 (!%p195_p3), %v833_v0  ;;  %525 = vmatprep.mubr.f32.mxu1 (!%p195_p3), %v833_v0  ;;  %v288_v16 = vld [vmem:[%s1009_s0 + $0x18] sm:$0xff] (!%p195_p3)  ;;  %v289_v17 = vld [vmem:[%s1009_s0 + $0x20] sm:$0xff] (!%p195_p3)  ;;  %v290_v18 = vld [vmem:[%s1009_s0 + $0x28] sm:$0xff] (!%p195_p3) }
   0x8   : > { %v291_v19 = vld [vmem:[%s1009_s0 + $0x30] sm:$0xff] (!%p195_p3)  ;;  %v292_v20 = vld [vmem:[%s1009_s0 + $0x38] sm:$0xff] (!%p195_p3)  ;;  %v304_v22 = vshrl.u32 (!%p195_p3), %v303_v21, 7 }
   0xa   : > { %v305_v23 = vsub.s32 (!%p195_p3), 0, %v304_v22  ;;  %v313_v25 = vsub.s32 (!%p195_p3), 2, %v304_v22  ;;  %v309_v26 = vsub.s32 (!%p195_p3), 1, %v304_v22  ;;  %v317_v27 = vsub.s32 (!%p195_p3), 3, %v304_v22 }
   0xe   : > { %s1018_s12 = smov (!%p251_p4, %s823_s12), 1 }
   0xf   : > { %s774_s16 = sshll.u32 %s1018_s12, 6  ;;  %s753_s9 = sshll.u32 %s1018_s12, 2 }
  0x10   : > { %s258_s19 = scalar_lea.vmem %s1010_s1, %s774_s16  ;;  %s267_s16 = scalar_lea.vmem %s1011_s2, %s753_s9 }
  0x11   : > { %v294_v1 = vld [vmem:[%s258_s19 + $0x8] sm:$0xff]  ;;  %v296_v3 = vld [vmem:[%s258_s19 + $0x18] sm:$0xff]  ;;  %v293_v6 = vld [vmem:[%s258_s19] sm:$0xff]  ;;  %s775_s17 = sshll.u32 %s1018_s12, 8 }
  0x12   : > { %v298_v2 = vld [vmem:[%s258_s19 + $0x28] sm:$0xff]  ;;  %v300_v5 = vld [vmem:[%s258_s19 + $0x38] sm:$0xff]  ;;  %v297_v7 = vld [vmem:[%s258_s19 + $0x20] sm:$0xff]  ;;  %s934_s20 = scalar_lea.vmem %s1012_s3, %s775_s17 }
  0x13   : > { %v776_v4 = vpack.c.bf16 %v298_v2, %v294_v1  ;;  %v780_v8 = vpack.c.bf16 %v300_v5, %v296_v3  ;;  %v778_v9 = vpack.c.bf16 %v297_v7, %v293_v6  ;;  %v295_v10 = vld [vmem:[%s258_s19 + $0x10] sm:$0xff]  ;;  %v301_v24 = vld [vmem:[%s267_s16] sm:$0xf] }
  0x14   : > { %v299_v11 = vld [vmem:[%s258_s19 + $0x30] sm:$0xff]  ;;  %v923_v28 = vrot.slane %v301_v24, %v305_v23  ;;  %v925_v29 = vrot.slane %v301_v24, %v313_v25  ;;  %v927_v30 = vrot.slane %v301_v24, %v309_v26  ;;  %v929_v31 = vrot.slane %v301_v24, %v317_v27 }
  0x15   : > { %777 = vmatprep.subr.bf16.mxu0 %v776_v4  ;;  %v782_v12 = vpack.c.bf16 %v299_v11, %v295_v10  ;;  %781 = vmatprep.subr.bf16.mxu1 %v780_v8 }
  0x16   : > { %779 = vmatpush1.bf16.msra.mxu0 %v778_v9 }
  0x17   : > { %783 = vmatpush1.bf16.msra.mxu1 %v782_v12 }
  0x19   : > { %756 = vmatmul.mubr.msk.f32.vlgmr.msra.gmra.mrb[0].mxu0 %vm323_vm0, %v285_v13 }
  0x1a   : > { %764 = vmatmul.mubr.msk.f32.vlgmr.msra.gmra.mrb[0].mxu1 %vm323_vm0, %v285_v13  ;;  %418 = vmatprep.mubr.f32.mxu0 %v833_v0 }
  0x1b   : > { %531 = vmatprep.mubr.f32.mxu1 %v833_v0 }
  0x1d   : > { %757 = vmatmul.mubr.msk.f32.gmra.mrb[2].mxu0 %vm323_vm0, %v286_v14 }
  0x1e   : > { %765 = vmatmul.mubr.msk.f32.gmra.mrb[2].mxu1 %vm323_vm0, %v286_v14  ;;  %424 = vmatprep.mubr.f32.mxu0 %v833_v0 }
  0x1f   : > { %537 = vmatprep.mubr.f32.mxu1 %v833_v0 }
  0x21   : > { %758 = vmatmul.mubr.msk.f32.gmra.mrb[4].mxu0 %vm323_vm0, %v287_v15 }
  0x22   : > { %766 = vmatmul.mubr.msk.f32.gmra.mrb[4].mxu1 %vm323_vm0, %v287_v15  ;;  %430 = vmatprep.mubr.f32.mxu0 %v833_v0 }
  0x23   : > { %543 = vmatprep.mubr.f32.mxu1 %v833_v0 }
  0x25   : > { %759 = vmatmul.mubr.msk.f32.gmra.mrb[6].mxu0 %vm323_vm0, %v288_v16 }
  0x26   : > { %767 = vmatmul.mubr.msk.f32.gmra.mrb[6].mxu1 %vm323_vm0, %v288_v16  ;;  %436 = vmatprep.mubr.f32.mxu0 %v833_v0 }
  0x27   : > { %549 = vmatprep.mubr.f32.mxu1 %v833_v0 }
  0x29   : > { %760 = vmatmul.mubr.msk.f32.gmra.mrb[8].mxu0 %vm323_vm0, %v289_v17 }
  0x2a   : > { %768 = vmatmul.mubr.msk.f32.gmra.mrb[8].mxu1 %vm323_vm0, %v289_v17  ;;  %442 = vmatprep.mubr.f32.mxu0 %v833_v0 }
  0x2b   : > { %555 = vmatprep.mubr.f32.mxu1 %v833_v0 }
  0x2d   : > { %761 = vmatmul.mubr.msk.f32.gmra.mrb[10].mxu0 %vm323_vm0, %v290_v18 }
  0x2e   : > { %769 = vmatmul.mubr.msk.f32.gmra.mrb[10].mxu1 %vm323_vm0, %v290_v18  ;;  %448 = vmatprep.mubr.f32.mxu0 %v833_v0 }
  0x2f   : > { %561 = vmatprep.mubr.f32.mxu1 %v833_v0 }
  0x31   : > { %762 = vmatmul.mubr.msk.f32.gmra.mrb[12].mxu0 %vm323_vm0, %v291_v19 }
  0x32   : > { %770 = vmatmul.mubr.msk.f32.gmra.mrb[12].mxu1 %vm323_vm0, %v291_v19  ;;  %454 = vmatprep.mubr.f32.mxu0 %v833_v0 }
  0x33   : > { %567 = vmatprep.mubr.f32.mxu1 %v833_v0 }
  0x35   : > { %763 = vmatmul.mubr.msk.f32.gmra.mrb[14].mxu0 %vm323_vm0, %v292_v20 }
  0x36   : > { %771 = vmatmul.mubr.msk.f32.gmra.mrb[14].mxu1 %vm323_vm0, %v292_v20 }
  0xec   : > { %v414_v32 = vpop.f32.mrb[0].mxu0 }
  0xed   : > { %v415_v33 = vadd.f32 %v414_v32, %v923_v28  ;;  %v527_v34 = vpop.f32.mrb[0].mxu1  ;;  %v416_v35 = vpop.f32.mrb[1].mxu0 }
  0xee   : > { %v528_v36 = vadd.f32 %v527_v34, %v925_v29  ;;  %v417_v37 = vadd.f32 %v416_v35, %v927_v30  ;;  %v529_v38 = vpop.f32.mrb[1].mxu1 }
  0xef   : > { %574 = vst [vmem:[%s934_s20] sm:$0xff] %v415_v33  ;;  %v530_v39 = vadd.f32 %v529_v38, %v929_v31 }
  0xf0   : > { %576 = vst [vmem:[%s934_s20 + $0x10] sm:$0xff] %v528_v36  ;;  %575 = vst [vmem:[%s934_s20 + $0x8] sm:$0xff] %v417_v37  ;;  %v420_v40 = vpop.f32.mrb[2].mxu0 }
  0xf1   : > { %577 = vst [vmem:[%s934_s20 + $0x18] sm:$0xff] %v530_v39  ;;  %v421_v41 = vadd.f32 %v420_v40, %v923_v28  ;;  %v533_v42 = vpop.f32.mrb[2].mxu1  ;;  %v422_v43 = vpop.f32.mrb[3].mxu0 }
  0xf2   : > { %v534_v44 = vadd.f32 %v533_v42, %v925_v29  ;;  %v423_v45 = vadd.f32 %v422_v43, %v927_v30  ;;  %v535_v46 = vpop.f32.mrb[3].mxu1 }
  0xf3   : > { %578 = vst [vmem:[%s934_s20 + $0x20] sm:$0xff] %v421_v41  ;;  %v536_v47 = vadd.f32 %v535_v46, %v929_v31 }
  0xf4   : > { %580 = vst [vmem:[%s934_s20 + $0x30] sm:$0xff] %v534_v44  ;;  %579 = vst [vmem:[%s934_s20 + $0x28] sm:$0xff] %v423_v45  ;;  %v426_v48 = vpop.f32.mrb[4].mxu0 }
  0xf5   : > { %581 = vst [vmem:[%s934_s20 + $0x38] sm:$0xff] %v536_v47  ;;  %v427_v49 = vadd.f32 %v426_v48, %v923_v28  ;;  %v539_v50 = vpop.f32.mrb[4].mxu1  ;;  %v428_v51 = vpop.f32.mrb[5].mxu0 }
  0xf6   : > { %v540_v52 = vadd.f32 %v539_v50, %v925_v29  ;;  %v429_v53 = vadd.f32 %v428_v51, %v927_v30  ;;  %v541_v54 = vpop.f32.mrb[5].mxu1 }
  0xf7   : > { %582 = vst [vmem:[%s934_s20 + $0x40] sm:$0xff] %v427_v49  ;;  %v542_v55 = vadd.f32 %v541_v54, %v929_v31 }
  0xf8   : > { %584 = vst [vmem:[%s934_s20 + $0x50] sm:$0xff] %v540_v52  ;;  %583 = vst [vmem:[%s934_s20 + $0x48] sm:$0xff] %v429_v53  ;;  %v432_v56 = vpop.f32.mrb[6].mxu0 }
  0xf9   : > { %585 = vst [vmem:[%s934_s20 + $0x58] sm:$0xff] %v542_v55  ;;  %v433_v57 = vadd.f32 %v432_v56, %v923_v28  ;;  %v545_v58 = vpop.f32.mrb[6].mxu1  ;;  %v434_v59 = vpop.f32.mrb[7].mxu0 }
  0xfa   : > { %v546_v60 = vadd.f32 %v545_v58, %v925_v29  ;;  %v435_v61 = vadd.f32 %v434_v59, %v927_v30  ;;  %v547_v62 = vpop.f32.mrb[7].mxu1 }
  0xfb   : > { %586 = vst [vmem:[%s934_s20 + $0x60] sm:$0xff] %v433_v57  ;;  %v548_v63 = vadd.f32 %v547_v62, %v929_v31 }
  0xfc   : > { %588 = vst [vmem:[%s934_s20 + $0x70] sm:$0xff] %v546_v60  ;;  %587 = vst [vmem:[%s934_s20 + $0x68] sm:$0xff] %v435_v61  ;;  %v438_v0 = vpop.f32.mrb[8].mxu0 }
  0xfd   : > { %589 = vst [vmem:[%s934_s20 + $0x78] sm:$0xff] %v548_v63  ;;  %v439_v1 = vadd.f32 %v438_v0, %v923_v28  ;;  %v551_v2 = vpop.f32.mrb[8].mxu1  ;;  %v440_v3 = vpop.f32.mrb[9].mxu0 }
  0xfe   : > { %v552_v4 = vadd.f32 %v551_v2, %v925_v29  ;;  %v441_v5 = vadd.f32 %v440_v3, %v927_v30  ;;  %v553_v6 = vpop.f32.mrb[9].mxu1 }
  0xff   : > { %590 = vst [vmem:[%s934_s20 + $0x80] sm:$0xff] %v439_v1  ;;  %v554_v7 = vadd.f32 %v553_v6, %v929_v31 }
 0x100   : > { %592 = vst [vmem:[%s934_s20 + $0x90] sm:$0xff] %v552_v4  ;;  %591 = vst [vmem:[%s934_s20 + $0x88] sm:$0xff] %v441_v5  ;;  %v444_v8 = vpop.f32.mrb[10].mxu0 }
 0x101   : > { %593 = vst [vmem:[%s934_s20 + $0x98] sm:$0xff] %v554_v7  ;;  %v445_v9 = vadd.f32 %v444_v8, %v923_v28  ;;  %v557_v10 = vpop.f32.mrb[10].mxu1  ;;  %v446_v11 = vpop.f32.mrb[11].mxu0 }
 0x102   : > { %v558_v12 = vadd.f32 %v557_v10, %v925_v29  ;;  %v447_v13 = vadd.f32 %v446_v11, %v927_v30  ;;  %v559_v14 = vpop.f32.mrb[11].mxu1 }
 0x103   : > { %594 = vst [vmem:[%s934_s20 + $0xa0] sm:$0xff] %v445_v9  ;;  %v560_v15 = vadd.f32 %v559_v14, %v929_v31 }
 0x104   : > { %596 = vst [vmem:[%s934_s20 + $0xb0] sm:$0xff] %v558_v12  ;;  %595 = vst [vmem:[%s934_s20 + $0xa8] sm:$0xff] %v447_v13  ;;  %v450_v16 = vpop.f32.mrb[12].mxu0 }
 0x105   : > { %597 = vst [vmem:[%s934_s20 + $0xb8] sm:$0xff] %v560_v15  ;;  %v451_v17 = vadd.f32 %v450_v16, %v923_v28  ;;  %v563_v18 = vpop.f32.mrb[12].mxu1  ;;  %v452_v19 = vpop.f32.mrb[13].mxu0 }
 0x106   : > { %v564_v20 = vadd.f32 %v563_v18, %v925_v29  ;;  %v453_v21 = vadd.f32 %v452_v19, %v927_v30  ;;  %v565_v22 = vpop.f32.mrb[13].mxu1 }
 0x107   : > { %598 = vst [vmem:[%s934_s20 + $0xc0] sm:$0xff] %v451_v17  ;;  %v566_v23 = vadd.f32 %v565_v22, %v929_v31 }
 0x108   : > { %600 = vst [vmem:[%s934_s20 + $0xd0] sm:$0xff] %v564_v20  ;;  %599 = vst [vmem:[%s934_s20 + $0xc8] sm:$0xff] %v453_v21  ;;  %v456_v24 = vpop.f32.mrb[14].mxu0 }
 0x109   : > { %601 = vst [vmem:[%s934_s20 + $0xd8] sm:$0xff] %v566_v23  ;;  %v457_v25 = vadd.f32 %v456_v24, %v923_v28  ;;  %v569_v26 = vpop.f32.mrb[14].mxu1  ;;  %v458_v27 = vpop.f32.mrb[15].mxu0 }
 0x10a   : > { %v570_v32 = vadd.f32 %v569_v26, %v925_v29  ;;  %v459_v33 = vadd.f32 %v458_v27, %v927_v30  ;;  %v571_v34 = vpop.f32.mrb[15].mxu1 }
 0x10b   : > { %602 = vst [vmem:[%s934_s20 + $0xe0] sm:$0xff] %v457_v25  ;;  %v572_v35 = vadd.f32 %v571_v34, %v929_v31 }
 0x10c   : > { %604 = vst [vmem:[%s934_s20 + $0xf0] sm:$0xff] %v570_v32  ;;  %603 = vst [vmem:[%s934_s20 + $0xe8] sm:$0xff] %v459_v33 }
 0x10d   : > { %605 = vst [vmem:[%s934_s20 + $0xf8] sm:$0xff] %v572_v35 }
 0x10e PF: > { %s13_s14 = sadd.s32 1, %s831_s14   ;;  %s1013_s12 = smov %s827_s13 }
 0x10f   : > { %p10_p5 = scmp.ge.s32.totalorder %s13_s14, 4   ;;  %s1014_s13 = smov %s1016_s15 }
 0x111   :  { %12 = sbr.rel (!%p10_p5) target bundleno = 2 (0x2), region = 68 }

// kernel: bidir_lstm_layer.3
= control target key start
LH: loop header
LB: loop body
LE: loop exit
PB: predicated region body
PF: predicated region fallthrough
CT: control target
= control target key end

     0   :  { %v4662_v1 = vmov 0   ;;  %s4653_s4 = inlined_call_operand.vmem [shape: bf16[2,128,512], index: 4, kind: input, shape index: {}]   ;;  %s4654_s2 = inlined_call_operand.vmem [shape: f32[2,8,128], index: 2, kind: input, shape index: {}]   ;;  %s4655_s0 = inlined_call_operand.vmem [shape: f32[2,8,8,512], index: 0, kind: input, shape index: {}, may-alias: {0,1}]   ;;  %s4656_s3 = inlined_call_operand.vmem [shape: f32[2,8,128], index: 3, kind: input, shape index: {}]   ;;  %s4657_s1 = inlined_call_operand.vmem [shape: f32[2,8,8,512], index: 1, kind: input, shape index: {}, may-alias: {0,1}]   ;;  %s4658_s5 = inlined_call_operand.vmem [shape: f32[8,8,128], index: 5, kind: output, shape index: {0}]   ;;  %s4659_s6 = inlined_call_operand.vmem [shape: f32[8,8,128], index: 6, kind: output, shape index: {1}]   ;;  %s4660_s8 = inlined_call_operand.vmem [shape: f32[2,8,128], index: 8, kind: output, shape index: {3}]   ;;  %s4661_s7 = inlined_call_operand.vmem [shape: f32[2,8,128], index: 7, kind: output, shape index: {2}]  }
   0x1   :  { %v3126_v0 = vld [vmem:[%s4653_s4 + $0x4] ss:$16 sps:$4 sm:$0xff]   ;;  %347 = vmatprep.mubr.bf16.mxu0 %v4662_v1  ;;  %388 = vmatprep.mubr.bf16.mxu1 %v4662_v1  ;;  %v3133_v2 = vld [vmem:[%s4653_s4] ss:$16 sps:$4 sm:$0xff]   ;;  %v3156_v6 = vld [vmem:[%s4653_s4 + $0xc] ss:$16 sps:$4 sm:$0xff]  }
   0x2   :  { %315 = vmatprep.subr.bf16.mxu0 %v3126_v0  ;;  %v3139_v3 = vld [vmem:[%s4653_s4 + $0x24] ss:$16 sps:$4 sm:$0xff]   ;;  %v3145_v4 = vld [vmem:[%s4653_s4 + $0x20] ss:$16 sps:$4 sm:$0xff]   ;;  %v3161_v7 = vld [vmem:[%s4653_s4 + $0x8] ss:$16 sps:$4 sm:$0xff]   ;;  %356 = vmatprep.subr.bf16.mxu1 %v3156_v6 }
   0x3   :  { %316 = vmatpush1.bf16.msra.mxu0 %v3133_v2  ;;  %v3151_v5 = vld [vmem:[%s4653_s4 + $0x44] ss:$16 sps:$4 sm:$0xff]   ;;  %v3167_v8 = vld [vmem:[%s4653_s4 + $0x40] ss:$16 sps:$4 sm:$0xff]   ;;  %357 = vmatpush1.bf16.msra.mxu1 %v3161_v7  ;;  %v3180_v10 = vld [vmem:[%s4653_s4 + $0x2c] ss:$16 sps:$4 sm:$0xff]  }
   0x4   :  { %317 = vmatprep.subr.bf16.mxu0 %v3139_v3  ;;  %v3174_v9 = vld [vmem:[%s4653_s4 + $0x64] ss:$16 sps:$4 sm:$0xff]   ;;  %v3185_v11 = vld [vmem:[%s4653_s4 + $0x28] ss:$16 sps:$4 sm:$0xff]   ;;  %358 = vmatprep.subr.bf16.mxu1 %v3180_v10  ;;  %v3192_v12 = vld [vmem:[%s4653_s4 + $0x60] ss:$16 sps:$4 sm:$0xff]  }
   0x5   :  { %v3197_v13 = vld [vmem:[%s4653_s4 + $0x84] ss:$16 sps:$4 sm:$0xff]   ;;  %v3202_v14 = vld [vmem:[%s4653_s4 + $0x4c] ss:$16 sps:$4 sm:$0xff]   ;;  %v3209_v15 = vld [vmem:[%s4653_s4 + $0x48] ss:$16 sps:$4 sm:$0xff]  }
   0x6   :  { %v3215_v16 = vld [vmem:[%s4653_s4 + $0x6c] ss:$16 sps:$4 sm:$0xff]   ;;  %v3221_v17 = vld [vmem:[%s4653_s4 + $0x80] ss:$16 sps:$4 sm:$0xff]   ;;  %v3227_v18 = vld [vmem:[%s4653_s4 + $0xa4] ss:$16 sps:$4 sm:$0xff]  }
   0x7   :  { %318 = vmatpush1.bf16.msra.mxu0 %v3145_v4  ;;  %359 = vmatpush1.bf16.msra.mxu1 %v3185_v11  ;;  %4740 = vst [vmem:[#allocation4_spill] sm:$0xff] %v3227_v18  ;;  %v3233_v19 = vld [vmem:[%s4653_s4 + $0x68] ss:$16 sps:$4 sm:$0xff]   ;;  %v3239_v20 = vld [vmem:[%s4653_s4 + $0x8c] ss:$16 sps:$4 sm:$0xff]   ;;  %v71_v30 = vld [vmem:[%s4654_s2] sm:$0xff] }
   0x8   :  { %319 = vmatprep.subr.bf16.mxu0 %v3151_v5  ;;  %360 = vmatprep.subr.bf16.mxu1 %v3202_v14  ;;  %v3245_v21 = vld [vmem:[%s4653_s4 + $0xa0] ss:$16 sps:$4 sm:$0xff]   ;;  %v3251_v22 = vld [vmem:[%s4653_s4 + $0xc4] ss:$16 sps:$4 sm:$0xff]   ;;  %v3257_v23 = vld [vmem:[%s4653_s4 + $0x88] ss:$16 sps:$4 sm:$0xff]   ;;  %v154_v34 = vpack.c.bf16 %v71_v30, %v71_v30 }
   0x9   :  { %4741 = vst [vmem:[#allocation5_spill] sm:$0xff] %v3245_v21  ;;  %4742 = vst [vmem:[#allocation6_spill] sm:$0xff] %v3251_v22  ;;  %v3263_v24 = vld [vmem:[%s4653_s4 + $0xac] ss:$16 sps:$4 sm:$0xff]   ;;  %v3268_v25 = vld [vmem:[%s4653_s4 + $0xc0] ss:$16 sps:$4 sm:$0xff]  }
   0xa   :  { %4743 = vst [vmem:[#allocation7_spill] sm:$0xff] %v3257_v23  ;;  %4744 = vst [vmem:[#allocation8_spill] sm:$0xff] %v3263_v24  ;;  %v3274_v26 = vld [vmem:[%s4653_s4 + $0xe4] ss:$16 sps:$4 sm:$0xff]   ;;  %v3281_v27 = vld [vmem:[%s4653_s4 + $0xa8] ss:$16 sps:$4 sm:$0xff]  }
   0xb   :  { %320 = vmatpush1.bf16.msra.mxu0 %v3167_v8  ;;  %361 = vmatpush1.bf16.msra.mxu1 %v3209_v15  ;;  %4745 = vst [vmem:[#allocation9_spill] sm:$0xff] %v3268_v25  ;;  %4746 = vst [vmem:[#allocation10_spill] sm:$0xff] %v3274_v26  ;;  %v3287_v28 = vld [vmem:[%s4653_s4 + $0xcc] ss:$16 sps:$4 sm:$0xff]   ;;  %v3292_v29 = vld [vmem:[%s4653_s4 + $0xe0] ss:$16 sps:$4 sm:$0xff]  }
   0xc   :  { %321 = vmatprep.subr.bf16.mxu0 %v3174_v9  ;;  %362 = vmatprep.subr.bf16.mxu1 %v3215_v16  ;;  %4747 = vst [vmem:[#allocation11_spill] sm:$0xff] %v3281_v27  ;;  %4748 = vst [vmem:[#allocation12_spill] sm:$0xff] %v3287_v28  ;;  %v3302_v31 = vld [vmem:[%s4653_s4 + $0x104] ss:$16 sps:$4 sm:$0xff]   ;;  %v3308_v32 = vld [vmem:[%s4653_s4 + $0xc8] ss:$16 sps:$4 sm:$0xff]  }
   0xd   :  { %4749 = vst [vmem:[#allocation13_spill] sm:$0xff] %v3292_v29  ;;  %4750 = vst [vmem:[#allocation14_spill] sm:$0xff] %v3302_v31  ;;  %v3314_v33 = vld [vmem:[%s4653_s4 + $0xec] ss:$16 sps:$4 sm:$0xff]   ;;  %v3319_v35 = vld [vmem:[%s4653_s4 + $0x100] ss:$16 sps:$4 sm:$0xff]  }
   0xe   :  { %4751 = vst [vmem:[#allocation15_spill] sm:$0xff] %v3308_v32  ;;  %4752 = vst [vmem:[#allocation16_spill] sm:$0xff] %v3314_v33  ;;  %v3325_v36 = vld [vmem:[%s4653_s4 + $0x124] ss:$16 sps:$4 sm:$0xff]   ;;  %v3332_v37 = vld [vmem:[%s4653_s4 + $0xe8] ss:$16 sps:$4 sm:$0xff]  }
   0xf   :  { %322 = vmatpush1.bf16.msra.mxu0 %v3192_v12  ;;  %363 = vmatpush1.bf16.msra.mxu1 %v3233_v19  ;;  %4753 = vst [vmem:[#allocation17_spill] sm:$0xff] %v3332_v37  ;;  %v3338_v38 = vld [vmem:[%s4653_s4 + $0x10c] ss:$16 sps:$4 sm:$0xff]   ;;  %v3344_v39 = vld [vmem:[%s4653_s4 + $0x120] ss:$16 sps:$4 sm:$0xff]  }
  0x10   :  { %323 = vmatprep.subr.bf16.mxu0 %v3197_v13  ;;  %364 = vmatprep.subr.bf16.mxu1 %v3239_v20  ;;  %4754 = vst [vmem:[#allocation18_spill] sm:$0xff] %v3338_v38  ;;  %v3351_v40 = vld [vmem:[%s4653_s4 + $0x144] ss:$16 sps:$4 sm:$0xff]   ;;  %v3357_v41 = vld [vmem:[%s4653_s4 + $0x108] ss:$16 sps:$4 sm:$0xff]  }
  0x11   :  { %v3363_v42 = vld [vmem:[%s4653_s4 + $0x12c] ss:$16 sps:$4 sm:$0xff]   ;;  %v3369_v43 = vld [vmem:[%s4653_s4 + $0x140] ss:$16 sps:$4 sm:$0xff]   ;;  %v3375_v44 = vld [vmem:[%s4653_s4 + $0x164] ss:$16 sps:$4 sm:$0xff]  }
  0x12   :  { %v3381_v45 = vld [vmem:[%s4653_s4 + $0x128] ss:$16 sps:$4 sm:$0xff]   ;;  %v3387_v46 = vld [vmem:[%s4653_s4 + $0x14c] ss:$16 sps:$4 sm:$0xff]   ;;  %v3394_v47 = vld [vmem:[%s4653_s4 + $0x160] ss:$16 sps:$4 sm:$0xff]  }
  0x13   :  { %324 = vmatpush1.bf16.msra.mxu0 %v3221_v17  ;;  %365 = vmatpush1.bf16.msra.mxu1 %v3257_v23  ;;  %v3400_v48 = vld [vmem:[%s4653_s4 + $0x184] ss:$16 sps:$4 sm:$0xff]   ;;  %v3406_v49 = vld [vmem:[%s4653_s4 + $0x148] ss:$16 sps:$4 sm:$0xff]   ;;  %v3412_v50 = vld [vmem:[%s4653_s4 + $0x16c] ss:$16 sps:$4 sm:$0xff]  }
  0x14   :  { %325 = vmatprep.subr.bf16.mxu0 %v3227_v18  ;;  %366 = vmatprep.subr.bf16.mxu1 %v3263_v24  ;;  %v3418_v51 = vld [vmem:[%s4653_s4 + $0x180] ss:$16 sps:$4 sm:$0xff]   ;;  %v3424_v52 = vld [vmem:[%s4653_s4 + $0x1a4] ss:$16 sps:$4 sm:$0xff]   ;;  %v3430_v53 = vld [vmem:[%s4653_s4 + $0x168] ss:$16 sps:$4 sm:$0xff]  }
  0x15   :  { %v3436_v54 = vld [vmem:[%s4653_s4 + $0x18c] ss:$16 sps:$4 sm:$0xff]   ;;  %v3442_v55 = vld [vmem:[%s4653_s4 + $0x1a0] ss:$16 sps:$4 sm:$0xff]   ;;  %v3448_v56 = vld [vmem:[%s4653_s4 + $0x1c4] ss:$16 sps:$4 sm:$0xff]  }
  0x16   :  { %v3454_v57 = vld [vmem:[%s4653_s4 + $0x188] ss:$16 sps:$4 sm:$0xff]   ;;  %v3460_v58 = vld [vmem:[%s4653_s4 + $0x1ac] ss:$16 sps:$4 sm:$0xff]   ;;  %v3466_v59 = vld [vmem:[%s4653_s4 + $0x1c0] ss:$16 sps:$4 sm:$0xff]  }
  0x17   :  { %326 = vmatpush1.bf16.msra.mxu0 %v3245_v21  ;;  %367 = vmatpush1.bf16.msra.mxu1 %v3281_v27  ;;  %4755 = vst [vmem:[#allocation19_spill] sm:$0xff] %v3466_v59  ;;  %v3472_v60 = vld [vmem:[%s4653_s4 + $0x1e4] ss:$16 sps:$4 sm:$0xff]   ;;  %v3478_v61 = vld [vmem:[%s4653_s4 + $0x1a8] ss:$16 sps:$4 sm:$0xff]  }
  0x18   :  { %327 = vmatprep.subr.bf16.mxu0 %v3251_v22  ;;  %368 = vmatprep.subr.bf16.mxu1 %v3287_v28  ;;  %4756 = vst [vmem:[#allocation20_spill] sm:$0xff] %v3472_v60  ;;  %v3484_v62 = vld [vmem:[%s4653_s4 + $0x1cc] ss:$16 sps:$4 sm:$0xff]   ;;  %v3493_v30 = vld [vmem:[%s4653_s4 + $0x1e0] ss:$16 sps:$4 sm:$0xff]  }
  0x19   :  { %4757 = vst [vmem:[#allocation21_spill] sm:$0xff] %v3484_v62  ;;  %v72_v63 = vld [vmem:[%s4654_s2 + $0x8] sm:$0xff] }
  0x1b   :  { %328 = vmatpush1.bf16.msra.mxu0 %v3268_v25  ;;  %369 = vmatpush1.bf16.msra.mxu1 %v3308_v32 }
  0x1c   :  { %329 = vmatprep.subr.bf16.mxu0 %v3274_v26  ;;  %370 = vmatprep.subr.bf16.mxu1 %v3314_v33 }
  0x1f   :  { %330 = vmatpush1.bf16.msra.mxu0 %v3292_v29  ;;  %371 = vmatpush1.bf16.msra.mxu1 %v3332_v37 }
  0x20   :  { %591 = vmatprep.subr.bf16.mxu0 %v3302_v31  ;;  %632 = vmatprep.subr.bf16.mxu1 %v3338_v38 }
  0x22   :  { %348 = vmatmul.mubr.bf16.vlgmr.msra.gmra.mrb[0].mxu0 %v154_v34  ;;  %389 = vmatmul.mubr.bf16.vlgmr.msra.gmra.mrb[0].mxu1 %v154_v34  ;;  %v3500_v34 = vld [vmem:[%s4653_s4 + $0x1c8] ss:$16 sps:$4 sm:$0xff]  }
  0x23   :  { %592 = vmatpush1.bf16.msra.mxu0 %v3319_v35  ;;  %623 = vmatprep.mubr.bf16.mxu0 %v4662_v1 }
  0x24   :  { %593 = vmatprep.subr.bf16.mxu0 %v3325_v36  ;;  %633 = vmatpush1.bf16.msra.mxu1 %v3357_v41 }
  0x25   :  { %634 = vmatprep.subr.bf16.mxu1 %v3363_v42  ;;  %664 = vmatprep.mubr.bf16.mxu1 %v4662_v1  ;;  %v3506_v1 = vld [vmem:[%s4653_s4 + $0x1ec] ss:$16 sps:$4 sm:$0xff]  }
  0x27   :  { %594 = vmatpush1.bf16.msra.mxu0 %v3344_v39 }
  0x28   :  { %595 = vmatprep.subr.bf16.mxu0 %v3351_v40  ;;  %635 = vmatpush1.bf16.msra.mxu1 %v3381_v45 }
  0x29   :  { %636 = vmatprep.subr.bf16.mxu1 %v3387_v46 }
  0x2b   :  { %596 = vmatpush1.bf16.msra.mxu0 %v3369_v43 }
  0x2c   :  { %597 = vmatprep.subr.bf16.mxu0 %v3375_v44  ;;  %637 = vmatpush1.bf16.msra.mxu1 %v3406_v49 }
  0x2d   :  { %638 = vmatprep.subr.bf16.mxu1 %v3412_v50 }
  0x2f   :  { %598 = vmatpush1.bf16.msra.mxu0 %v3394_v47 }
  0x30   :  { %599 = vmatprep.subr.bf16.mxu0 %v3400_v48  ;;  %639 = vmatpush1.bf16.msra.mxu1 %v3430_v53 }
  0x31   :  { %640 = vmatprep.subr.bf16.mxu1 %v3436_v54 }
  0x33   :  { %600 = vmatpush1.bf16.msra.mxu0 %v3418_v51 }
  0x34   :  { %601 = vmatprep.subr.bf16.mxu0 %v3424_v52  ;;  %641 = vmatpush1.bf16.msra.mxu1 %v3454_v57 }
  0x35   :  { %642 = vmatprep.subr.bf16.mxu1 %v3460_v58 }
  0x37   :  { %602 = vmatpush1.bf16.msra.mxu0 %v3442_v55 }
  0x38   :  { %603 = vmatprep.subr.bf16.mxu0 %v3448_v56  ;;  %643 = vmatpush1.bf16.msra.mxu1 %v3478_v61 }
  0x39   :  { %644 = vmatprep.subr.bf16.mxu1 %v3484_v62  ;;  %v4758_v62 = vmov 0  }
  0x3b   :  { %604 = vmatpush1.bf16.msra.mxu0 %v3466_v59  ;;  %v430_v59 = vpack.c.bf16 %v72_v63, %v72_v63  ;;  %v151_v63 = vld [vmem:[%s4655_s0 + $0x8] sm:$0xff] }
  0x3c   :  { %605 = vmatprep.subr.bf16.mxu0 %v3472_v60  ;;  %645 = vmatpush1.bf16.msra.mxu1 %v3500_v34  ;;  %v3513_v60 = vld [vmem:[%s4653_s4 + $0x1e8] ss:$16 sps:$4 sm:$0xff]  }
  0x3d   :  { %646 = vmatprep.subr.bf16.mxu1 %v3506_v1 }
  0x3f   :  { %606 = vmatpush1.bf16.msra.mxu0 %v3493_v30 }
  0x40   :  { %710 = vmatprep.subr.bf16.mxu0 %v3126_v0  ;;  %647 = vmatpush1.bf16.msra.mxu1 %v3513_v60 }
  0x41   :  { %751 = vmatprep.subr.bf16.mxu1 %v3156_v6 }
  0x42   :  { %624 = vmatmul.mubr.bf16.vlgmr.msra.gmra.mrb[4].mxu0 %v430_v59 }
  0x43   :  { %711 = vmatpush1.bf16.msra.mxu0 %v3133_v2  ;;  %742 = vmatprep.mubr.bf16.mxu0 %v4758_v62 }
  0x44   :  { %712 = vmatprep.subr.bf16.mxu0 %v3139_v3  ;;  %665 = vmatmul.mubr.bf16.vlgmr.msra.gmra.mrb[4].mxu1 %v430_v59  ;;  %v150_v59 = vld [vmem:[%s4655_s0] sm:$0xff] }
  0x45   :  { %752 = vmatpush1.bf16.msra.mxu1 %v3161_v7  ;;  %783 = vmatprep.mubr.bf16.mxu1 %v4758_v62 }
  0x46   :  { %753 = vmatprep.subr.bf16.mxu1 %v3180_v10 }
  0x47   :  { %713 = vmatpush1.bf16.msra.mxu0 %v3145_v4 }
  0x48   :  { %714 = vmatprep.subr.bf16.mxu0 %v3151_v5 }
  0x49   :  { %754 = vmatpush1.bf16.msra.mxu1 %v3185_v11 }
  0x4a   :  { %755 = vmatprep.subr.bf16.mxu1 %v3202_v14 }
  0x4b   :  { %715 = vmatpush1.bf16.msra.mxu0 %v3167_v8 }
  0x4c   :  { %716 = vmatprep.subr.bf16.mxu0 %v3174_v9 }
  0x4d   :  { %756 = vmatpush1.bf16.msra.mxu1 %v3209_v15 }
  0x4e   :  { %757 = vmatprep.subr.bf16.mxu1 %v3215_v16 }
  0x4f   :  { %717 = vmatpush1.bf16.msra.mxu0 %v3192_v12 }
  0x50   :  { %718 = vmatprep.subr.bf16.mxu0 %v3197_v13 }
  0x51   :  { %758 = vmatpush1.bf16.msra.mxu1 %v3233_v19 }
  0x52   :  { %759 = vmatprep.subr.bf16.mxu1 %v3239_v20 }
  0x53   :  { %719 = vmatpush1.bf16.msra.mxu0 %v3221_v17 }
  0x54   :  { %720 = vmatprep.subr.bf16.mxu0 %v3227_v18 }
  0x55   :  { %760 = vmatpush1.bf16.msra.mxu1 %v3257_v23 }
  0x56   :  { %761 = vmatprep.subr.bf16.mxu1 %v3263_v24 }
  0x57   :  { %721 = vmatpush1.bf16.msra.mxu0 %v3245_v21 }
  0x58   :  { %722 = vmatprep.subr.bf16.mxu0 %v3251_v22 }
  0x59   :  { %762 = vmatpush1.bf16.msra.mxu1 %v3281_v27 }
  0x5a   :  { %763 = vmatprep.subr.bf16.mxu1 %v3287_v28 }
  0x5b   :  { %723 = vmatpush1.bf16.msra.mxu0 %v3268_v25 }
  0x5c   :  { %724 = vmatprep.subr.bf16.mxu0 %v3274_v26 }
  0x5d   :  { %764 = vmatpush1.bf16.msra.mxu1 %v3308_v32 }
  0x5e   :  { %765 = vmatprep.subr.bf16.mxu1 %v3314_v33 }
  0x5f   :  { %725 = vmatpush1.bf16.msra.mxu0 %v3292_v29 }
  0x60   :  { %826 = vmatprep.subr.bf16.mxu0 %v3302_v31 }
  0x61   :  { %766 = vmatpush1.bf16.msra.mxu1 %v3332_v37 }
  0x62   :  { %867 = vmatprep.subr.bf16.mxu1 %v3338_v38  ;;  %v153_v38 = vld [vmem:[%s4655_s0 + $0x18] sm:$0xff] }
  0xf5   :  { %v349_v26 = vpop.f32.mrb[0].mxu0  ;;  %v390_v37 = vpop.f32.mrb[0].mxu1 }
  0xf6   :  { %v397_v29 = vadd.f32 %v349_v26, %v150_v59  ;;  %v351_v25 = vpop.f32.mrb[1].mxu0  ;;  %v392_v27 = vpop.f32.mrb[1].mxu1  ;;  %v152_v26 = vld [vmem:[%s4655_s0 + $0x10] sm:$0xff] }
  0xf7   :  { %v398_v32 = vadd.f32 %v351_v25, %v151_v63  ;;  %v353_v28 = vpop.f32.mrb[2].mxu0  ;;  %v400_v21 = vadd.f32 %v392_v27, %v153_v38  ;;  %v394_v24 = vpop.f32.mrb[2].mxu1 }
  0xf8   :  { %v2491_v31 = vmul.f32 -1.442695, %v397_v29  ;;  %v354_v22 = vpop.f32.mrb[3].mxu0  ;;  %v395_v18 = vpop.f32.mrb[3].mxu1  ;;  %v399_v28 = vadd.f32 %v390_v37, %v152_v26  ;;  %v2494_v37 = vld [vmem:[%s4657_s1 + $0x1e0] sm:$0xff]  ;;  %v2495_v26 = vld [vmem:[%s4657_s1 + $0x1e8] sm:$0xff] }
  0xf9   :  { %v2492_v33 = vmul.f32 -1.442695, %v398_v32  ;;  %v2493_v25 = vmul.f32 -1.442695, %v400_v21  ;;  %v75_v18 = vld [vmem:[%s4656_s3] sm:$0xff] }
  0xfa   :  { %2744 = vpow2.f32 %v2491_v31 }
  0xfb   :  { %2746 = vpow2.f32 %v2492_v33 }
  0xfc   :  { %2748 = vpow2.f32 %v2493_v25 }
  0xfd   :  { %2750 = vtanh.f32 %v399_v28 }
 0x104   :  { %v2745_v29 = vpop.eup %2744 }
 0x105   :  { %v2747_v22 = vpop.eup %2746  ;;  %v404_v32 = vadd.f32 1.0, %v2745_v29 }
 0x106   :  { %v410_v59 = vadd.f32 1.0, %v2747_v22  ;;  %v2749_v31 = vpop.eup %2748 }
 0x107   :  { %2752 = vrcp.f32 %v404_v32  ;;  %v2751_v33 = vpop.eup %2750  ;;  %v417_v27 = vadd.f32 1.0, %v2749_v31 }
 0x108   :  { %2754 = vrcp.f32 %v410_v59 }
 0x109   :  { %2756 = vrcp.f32 %v417_v27 }
 0x111   :  { %v2753_v24 = vpop.eup %2752 }
 0x112   :  { %v2755_v38 = vpop.eup %2754  ;;  %v421_v63 = vmul.f32 %v2753_v24, %v2751_v33  ;;  %v2497_v24 = vld [vmem:[%s4657_s1 + $0x1f8] sm:$0xff] }
 0x113   :  { %v420_v21 = vmul.f32 %v2755_v38, %v75_v18 }
 0x115   :  { %v3574_v25 = vadd.f32 %v421_v63, %v420_v21  ;;  %v625_v28 = vpop.f32.mrb[4].mxu0 }
 0x116   :  { %v673_v29 = vadd.f32 %v2494_v37, %v625_v28  ;;  %v627_v22 = vpop.f32.mrb[5].mxu0  ;;  %v2496_v37 = vld [vmem:[%s4657_s1 + $0x1f0] sm:$0xff] }
 0x117   :  { %2758 = vtanh.f32 %v3574_v25  ;;  %v674_v32 = vadd.f32 %v2495_v26, %v627_v22  ;;  %v629_v59 = vpop.f32.mrb[6].mxu0  ;;  %v666_v38 = vpop.f32.mrb[4].mxu1 }
 0x118   :  { %v2530_v31 = vmul.f32 -1.442695, %v673_v29  ;;  %v630_v33 = vpop.f32.mrb[7].mxu0  ;;  %v668_v63 = vpop.f32.mrb[5].mxu1  ;;  %v675_v22 = vadd.f32 %v2496_v37, %v666_v38 }
 0x119   :  { %v2531_v18 = vmul.f32 -1.442695, %v674_v32  ;;  %v676_v21 = vadd.f32 %v2497_v24, %v668_v63  ;;  %v670_v27 = vpop.f32.mrb[6].mxu1  ;;  %v2757_v26 = vpop.eup %2756  ;;  %v76_v63 = vld [vmem:[%s4656_s3 + $0x8] sm:$0xff] }
 0x11a   :  { %2760 = vpow2.f32 %v2530_v31  ;;  %v671_v23 = vpop.f32.mrb[7].mxu1 }
 0x11b   :  { %2762 = vpow2.f32 %v2531_v18  ;;  %v2532_v28 = vmul.f32 -1.442695, %v676_v21 }
 0x11d   :  { %2764 = vpow2.f32 %v2532_v28 }
 0x11e   :  { %2766 = vtanh.f32 %v675_v22  ;;  %v4759_v22 = vld [vmem:[#allocation21_spill] sm:$0xff] }
 0x121   :  { %v2759_v29 = vpop.eup %2758 }
 0x122   :  { %v424_v32 = vmul.f32 %v2759_v29, %v2757_v26 }
 0x124   :  { %v2761_v59 = vpop.eup %2760  ;;  %701 = vst [vmem:[%s4658_s5] sm:$0xff] %v424_v32  ;;  %v709_v31 = vpack.c.bf16 %v424_v32, %v424_v32 }
 0x125   :  { %v2763_v33 = vpop.eup %2762  ;;  %v680_v18 = vadd.f32 1.0, %v2761_v59  ;;  %v4760_v59 = vld [vmem:[#allocation19_spill] sm:$0xff] }
 0x126   :  { %v686_v23 = vadd.f32 1.0, %v2763_v33  ;;  %743 = vmatmul.mubr.bf16.vlgmr.msra.gmra.mrb[8].mxu0 %v709_v31  ;;  %784 = vmatmul.mubr.bf16.vlgmr.msra.gmra.mrb[8].mxu1 %v709_v31  ;;  %v4761_v31 = vld [vmem:[#allocation20_spill] sm:$0xff] }
 0x127   :  { %2768 = vrcp.f32 %v680_v18  ;;  %827 = vmatpush1.bf16.msra.mxu0 %v3319_v35  ;;  %868 = vmatpush1.bf16.msra.mxu1 %v3357_v41  ;;  %v2765_v24 = vpop.eup %2764 }
 0x128   :  { %2770 = vrcp.f32 %v686_v23  ;;  %828 = vmatprep.subr.bf16.mxu0 %v3325_v36  ;;  %869 = vmatprep.subr.bf16.mxu1 %v3363_v42  ;;  %v2767_v38 = vpop.eup %2766  ;;  %v693_v27 = vadd.f32 1.0, %v2765_v24  ;;  %v4770_v24 = vld [vmem:[#allocation15_spill] sm:$0xff] }
 0x129   :  { %858 = vmatprep.mubr.bf16.mxu0 %v4758_v62  ;;  %899 = vmatprep.mubr.bf16.mxu1 %v4758_v62 }
 0x12a   :  { %2772 = vrcp.f32 %v693_v27  ;;  %v4774_v27 = vld [vmem:[#allocation17_spill] sm:$0xff] }
 0x12b   :  { %829 = vmatpush1.bf16.msra.mxu0 %v3344_v39  ;;  %870 = vmatpush1.bf16.msra.mxu1 %v3381_v45 }
 0x12c   :  { %830 = vmatprep.subr.bf16.mxu0 %v3351_v40  ;;  %871 = vmatprep.subr.bf16.mxu1 %v3387_v46 }
 0x12f   :  { %831 = vmatpush1.bf16.msra.mxu0 %v3369_v43  ;;  %872 = vmatpush1.bf16.msra.mxu1 %v3406_v49 }
 0x130   :  { %832 = vmatprep.subr.bf16.mxu0 %v3375_v44  ;;  %873 = vmatprep.subr.bf16.mxu1 %v3412_v50 }
 0x131   :  { %v2769_v21 = vpop.eup %2768 }
 0x132   :  { %v2771_v37 = vpop.eup %2770  ;;  %v697_v26 = vmul.f32 %v2769_v21, %v2767_v38  ;;  %v4771_v38 = vld [vmem:[#allocation10_spill] sm:$0xff]  ;;  %v4773_v21 = vld [vmem:[#allocation13_spill] sm:$0xff] }
 0x133   :  { %v696_v28 = vmul.f32 %v2771_v37, %v76_v63  ;;  %833 = vmatpush1.bf16.msra.mxu0 %v3394_v47  ;;  %874 = vmatpush1.bf16.msra.mxu1 %v3430_v53  ;;  %v4772_v63 = vld [vmem:[#allocation16_spill] sm:$0xff]  ;;  %v4775_v37 = vld [vmem:[#allocation14_spill] sm:$0xff] }
 0x134   :  { %834 = vmatprep.subr.bf16.mxu0 %v3400_v48  ;;  %875 = vmatprep.subr.bf16.mxu1 %v3436_v54  ;;  %v2773_v32 = vpop.eup %2772 }
 0x135   :  { %v3607_v29 = vadd.f32 %v697_v26, %v696_v28  ;;  %v4776_v26 = vld [vmem:[#allocation18_spill] sm:$0xff]  ;;  %v2534_v28 = vld [vmem:[%s4655_s0 + $0x20] sm:$0xff] }
 0x137   :  { %2774 = vtanh.f32 %v3607_v29  ;;  %835 = vmatpush1.bf16.msra.mxu0 %v3418_v51  ;;  %876 = vmatpush1.bf16.msra.mxu1 %v3454_v57 }
 0x138   :  { %836 = vmatprep.subr.bf16.mxu0 %v3424_v52  ;;  %877 = vmatprep.subr.bf16.mxu1 %v3460_v58 }
 0x13b   :  { %837 = vmatpush1.bf16.msra.mxu0 %v3442_v55  ;;  %878 = vmatpush1.bf16.msra.mxu1 %v3478_v61 }
 0x13c   :  { %838 = vmatprep.subr.bf16.mxu0 %v3448_v56  ;;  %879 = vmatprep.subr.bf16.mxu1 %v4759_v22 }
 0x13f   :  { %839 = vmatpush1.bf16.msra.mxu0 %v4760_v59  ;;  %880 = vmatpush1.bf16.msra.mxu1 %v3500_v34 }
 0x140   :  { %840 = vmatprep.subr.bf16.mxu0 %v4761_v31  ;;  %881 = vmatprep.subr.bf16.mxu1 %v3506_v1 }
 0x141   :  { %v2775_v33 = vpop.eup %2774 }
 0x142   :  { %v700_v18 = vmul.f32 %v2775_v33, %v2773_v32  ;;  %v2535_v32 = vld [vmem:[%s4655_s0 + $0x28] sm:$0xff] }
 0x143   :  { %841 = vmatpush1.bf16.msra.mxu0 %v3493_v30  ;;  %882 = vmatpush1.bf16.msra.mxu1 %v3513_v60 }
 0x144   :  { %2533 = vst [vmem:[%s4659_s6 + $0x38] sm:$0xff] %v700_v18  ;;  %v825_v23 = vpack.c.bf16 %v700_v18, %v700_v18  ;;  %946 = vmatprep.subr.bf16.mxu0 %v3126_v0  ;;  %987 = vmatprep.subr.bf16.mxu1 %v3156_v6  ;;  %v4762_v0 = vld [vmem:[#allocation7_spill] sm:$0xff] }
 0x146   :  { %859 = vmatmul.mubr.bf16.vlgmr.msra.gmra.mrb[12].mxu0 %v825_v23  ;;  %900 = vmatmul.mubr.bf16.vlgmr.msra.gmra.mrb[12].mxu1 %v825_v23 }
 0x147   :  { %947 = vmatpush1.bf16.msra.mxu0 %v3133_v2  ;;  %988 = vmatpush1.bf16.msra.mxu1 %v3161_v7  ;;  %v4763_v2 = vld [vmem:[#allocation4_spill] sm:$0xff]  ;;  %v4767_v7 = vld [vmem:[#allocation6_spill] sm:$0xff] }
 0x148   :  { %948 = vmatprep.subr.bf16.mxu0 %v3139_v3  ;;  %989 = vmatprep.subr.bf16.mxu1 %v3180_v10  ;;  %v4764_v3 = vld [vmem:[#allocation8_spill] sm:$0xff] }
 0x149   :  { %978 = vmatprep.mubr.bf16.mxu0 %v4758_v62  ;;  %1019 = vmatprep.mubr.bf16.mxu1 %v4758_v62 }
 0x14b   :  { %949 = vmatpush1.bf16.msra.mxu0 %v3145_v4  ;;  %990 = vmatpush1.bf16.msra.mxu1 %v3185_v11  ;;  %v4765_v4 = vld [vmem:[#allocation5_spill] sm:$0xff] }
 0x14c   :  { %950 = vmatprep.subr.bf16.mxu0 %v3151_v5  ;;  %991 = vmatprep.subr.bf16.mxu1 %v3202_v14  ;;  %v4766_v5 = vld [vmem:[#allocation11_spill] sm:$0xff] }
 0x14f   :  { %951 = vmatpush1.bf16.msra.mxu0 %v3167_v8  ;;  %992 = vmatpush1.bf16.msra.mxu1 %v3209_v15  ;;  %v4768_v8 = vld [vmem:[#allocation12_spill] sm:$0xff] }
 0x150   :  { %952 = vmatprep.subr.bf16.mxu0 %v3174_v9  ;;  %993 = vmatprep.subr.bf16.mxu1 %v3215_v16  ;;  %v4769_v9 = vld [vmem:[#allocation9_spill] sm:$0xff] }
 0x153   :  { %953 = vmatpush1.bf16.msra.mxu0 %v3192_v12  ;;  %994 = vmatpush1.bf16.msra.mxu1 %v3233_v19 }
 0x154   :  { %954 = vmatprep.subr.bf16.mxu0 %v3197_v13  ;;  %995 = vmatprep.subr.bf16.mxu1 %v3239_v20 }
 0x157   :  { %955 = vmatpush1.bf16.msra.mxu0 %v3221_v17  ;;  %996 = vmatpush1.bf16.msra.mxu1 %v4762_v0 }
 0x158   :  { %956 = vmatprep.subr.bf16.mxu0 %v4763_v2  ;;  %997 = vmatprep.subr.bf16.mxu1 %v4764_v3 }
 0x15b   :  { %957 = vmatpush1.bf16.msra.mxu0 %v4765_v4  ;;  %998 = vmatpush1.bf16.msra.mxu1 %v4766_v5 }
 0x15c   :  { %958 = vmatprep.subr.bf16.mxu0 %v4767_v7  ;;  %999 = vmatprep.subr.bf16.mxu1 %v4768_v8  ;;  %v2537_v7 = vld [vmem:[%s4655_s0 + $0x38] sm:$0xff] }
 0x15f   :  { %959 = vmatpush1.bf16.msra.mxu0 %v4769_v9  ;;  %1000 = vmatpush1.bf16.msra.mxu1 %v4770_v24 }
 0x160   :  { %960 = vmatprep.subr.bf16.mxu0 %v4771_v38  ;;  %1001 = vmatprep.subr.bf16.mxu1 %v4772_v63 }
 0x163   :  { %961 = vmatpush1.bf16.msra.mxu0 %v4773_v21  ;;  %1002 = vmatpush1.bf16.msra.mxu1 %v4774_v27 }
 0x164   :  { %1062 = vmatprep.subr.bf16.mxu0 %v4775_v37  ;;  %1103 = vmatprep.subr.bf16.mxu1 %v4776_v26 }
 0x1f9   :  { %v744_v33 = vpop.f32.mrb[8].mxu0  ;;  %v785_v18 = vpop.f32.mrb[8].mxu1 }
 0x1fa   :  { %v792_v23 = vadd.f32 %v2534_v28, %v744_v33  ;;  %v746_v63 = vpop.f32.mrb[9].mxu0  ;;  %v787_v38 = vpop.f32.mrb[9].mxu1  ;;  %v2536_v28 = vld [vmem:[%s4655_s0 + $0x30] sm:$0xff] }
 0x1fb   :  { %v793_v21 = vadd.f32 %v2535_v32, %v746_v63  ;;  %v748_v24 = vpop.f32.mrb[10].mxu0  ;;  %v789_v27 = vpop.f32.mrb[10].mxu1  ;;  %v795_v5 = vadd.f32 %v2537_v7, %v787_v38  ;;  %v794_v4 = vadd.f32 %v2536_v28, %v785_v18  ;;  %v2542_v18 = vld [vmem:[%s4657_s1 + $0x1c8] sm:$0xff] }
 0x1fc   :  { %v2538_v9 = vmul.f32 -1.442695, %v792_v23  ;;  %v749_v37 = vpop.f32.mrb[11].mxu0  ;;  %v790_v8 = vpop.f32.mrb[11].mxu1 }
 0x1fd   :  { %v2539_v26 = vmul.f32 -1.442695, %v793_v21  ;;  %v2540_v33 = vmul.f32 -1.442695, %v795_v5  ;;  %v2541_v5 = vld [vmem:[%s4657_s1 + $0x1c0] sm:$0xff] }
 0x1fe   :  { %2776 = vpow2.f32 %v2538_v9 }
 0x1ff   :  { %2778 = vpow2.f32 %v2539_v26 }
 0x200   :  { %2780 = vpow2.f32 %v2540_v33 }
 0x201   :  { %2782 = vtanh.f32 %v794_v4 }
 0x208   :  { %v2777_v63 = vpop.eup %2776 }
 0x209   :  { %v2779_v24 = vpop.eup %2778  ;;  %v799_v27 = vadd.f32 1.0, %v2777_v63 }
 0x20a   :  { %v805_v8 = vadd.f32 1.0, %v2779_v24  ;;  %v2781_v9 = vpop.eup %2780 }
 0x20b   :  { %2784 = vrcp.f32 %v799_v27  ;;  %v2783_v21 = vpop.eup %2782  ;;  %v812_v7 = vadd.f32 1.0, %v2781_v9 }
 0x20c   :  { %2786 = vrcp.f32 %v805_v8 }
 0x20d   :  { %2788 = vrcp.f32 %v812_v7  ;;  %v2543_v7 = vld [vmem:[%s4657_s1 + $0x1d0] sm:$0xff] }
 0x215   :  { %v2785_v37 = vpop.eup %2784 }
 0x216   :  { %v2787_v32 = vpop.eup %2786  ;;  %v816_v26 = vmul.f32 %v2785_v37, %v2783_v21 }
 0x217   :  { %v815_v38 = vmul.f32 %v2787_v32, %v3574_v25 }
 0x219   :  { %v3682_v4 = vadd.f32 %v816_v26, %v815_v38  ;;  %v860_v23 = vpop.f32.mrb[12].mxu0  ;;  %v901_v28 = vpop.f32.mrb[12].mxu1  ;;  %v2544_v26 = vld [vmem:[%s4657_s1 + $0x1d8] sm:$0xff] }
 0x21a   :  { %v908_v33 = vadd.f32 %v2541_v5, %v860_v23  ;;  %v862_v63 = vpop.f32.mrb[13].mxu0  ;;  %v903_v24 = vpop.f32.mrb[13].mxu1 }
 0x21b   :  { %2790 = vtanh.f32 %v3682_v4  ;;  %v909_v27 = vadd.f32 %v2542_v18, %v862_v63  ;;  %v864_v25 = vpop.f32.mrb[14].mxu0  ;;  %v905_v8 = vpop.f32.mrb[14].mxu1  ;;  %v911_v38 = vadd.f32 %v2544_v26, %v903_v24  ;;  %v910_v63 = vadd.f32 %v2543_v7, %v901_v28  ;;  %v3736_v7 = vld [vmem:[%s4653_s4 + $0x4] ss:$16 sps:$4 sm:$0xff]  }
 0x21c   :  { %v2545_v9 = vmul.f32 -1.442695, %v908_v33  ;;  %v865_v21 = vpop.f32.mrb[15].mxu0  ;;  %v906_v37 = vpop.f32.mrb[15].mxu1 }
 0x21d   :  { %v2546_v32 = vmul.f32 -1.442695, %v909_v27  ;;  %v2789_v5 = vpop.eup %2788  ;;  %v2547_v18 = vmul.f32 -1.442695, %v911_v38 }
 0x21e   :  { %2792 = vpow2.f32 %v2545_v9 }
 0x21f   :  { %2794 = vpow2.f32 %v2546_v32 }
 0x220   :  { %2796 = vpow2.f32 %v2547_v18  ;;  %v3764_v18 = vld [vmem:[%s4653_s4 + $0x20] ss:$16 sps:$4 sm:$0xff]  }
 0x221   :  { %2798 = vtanh.f32 %v910_v63  ;;  %v3771_v63 = vld [vmem:[%s4653_s4 + $0x44] ss:$16 sps:$4 sm:$0xff]  }
 0x225   :  { %v2791_v23 = vpop.eup %2790 }
 0x226   :  { %v819_v25 = vmul.f32 %v2791_v23, %v2789_v5  ;;  %v3743_v5 = vld [vmem:[%s4653_s4] ss:$16 sps:$4 sm:$0xff]   ;;  %v3749_v23 = vld [vmem:[%s4653_s4 + $0x8] ss:$16 sps:$4 sm:$0xff]  }
 0x228   :  { %v2793_v33 = vpop.eup %2792  ;;  %2548 = vst [vmem:[%s4658_s5 + $0x8] sm:$0xff] %v819_v25  ;;  %v945_v27 = vpack.c.bf16 %v819_v25, %v819_v25  ;;  %v4788_v25 = vld [vmem:[#allocation18_spill] sm:$0xff] }
 0x229   :  { %v2795_v8 = vpop.eup %2794  ;;  %v915_v9 = vadd.f32 1.0, %v2793_v33  ;;  %v2550_v33 = vld [vmem:[%s4655_s0 + $0x40] sm:$0xff] }
 0x22a   :  { %v921_v24 = vadd.f32 1.0, %v2795_v8  ;;  %979 = vmatmul.mubr.bf16.vlgmr.msra.gmra.mrb[16].mxu0 %v945_v27  ;;  %1020 = vmatmul.mubr.bf16.vlgmr.msra.gmra.mrb[16].mxu1 %v945_v27  ;;  %v2551_v27 = vld [vmem:[%s4655_s0 + $0x48] sm:$0xff] }
 0x22b   :  { %2800 = vrcp.f32 %v915_v9  ;;  %1063 = vmatpush1.bf16.msra.mxu0 %v3319_v35  ;;  %1104 = vmatpush1.bf16.msra.mxu1 %v3357_v41  ;;  %v2797_v35 = vpop.eup %2796 }
 0x22c   :  { %2802 = vrcp.f32 %v921_v24  ;;  %1064 = vmatprep.subr.bf16.mxu0 %v3325_v36  ;;  %1105 = vmatprep.subr.bf16.mxu1 %v3363_v42  ;;  %v2799_v36 = vpop.eup %2798 }
 0x22d   :  { %1094 = vmatprep.mubr.bf16.mxu0 %v4758_v62  ;;  %1135 = vmatprep.mubr.bf16.mxu1 %v4758_v62 }
 0x22f   :  { %1065 = vmatpush1.bf16.msra.mxu0 %v3344_v39  ;;  %1106 = vmatpush1.bf16.msra.mxu1 %v3381_v45  ;;  %v928_v39 = vadd.f32 1.0, %v2797_v35 }
 0x230   :  { %1066 = vmatprep.subr.bf16.mxu0 %v3351_v40  ;;  %1107 = vmatprep.subr.bf16.mxu1 %v3387_v46 }
 0x231   :  { %2804 = vrcp.f32 %v928_v39 }
 0x233   :  { %1067 = vmatpush1.bf16.msra.mxu0 %v3369_v43  ;;  %1108 = vmatpush1.bf16.msra.mxu1 %v3406_v49 }
 0x234   :  { %1068 = vmatprep.subr.bf16.mxu0 %v3375_v44  ;;  %1109 = vmatprep.subr.bf16.mxu1 %v3412_v50 }
 0x235   :  { %v2801_v28 = vpop.eup %2800 }
 0x236   :  { %v2803_v21 = vpop.eup %2802  ;;  %v932_v37 = vmul.f32 %v2801_v28, %v2799_v36 }
 0x237   :  { %v931_v32 = vmul.f32 %v2803_v21, %v3607_v29  ;;  %1069 = vmatpush1.bf16.msra.mxu0 %v3394_v47  ;;  %1110 = vmatpush1.bf16.msra.mxu1 %v3430_v53 }
 0x238   :  { %1070 = vmatprep.subr.bf16.mxu0 %v3400_v48  ;;  %1111 = vmatprep.subr.bf16.mxu1 %v3436_v54 }
 0x239   :  { %v3713_v40 = vadd.f32 %v932_v37, %v931_v32 }
 0x23b   :  { %2806 = vtanh.f32 %v3713_v40  ;;  %1071 = vmatpush1.bf16.msra.mxu0 %v3418_v51  ;;  %1112 = vmatpush1.bf16.msra.mxu1 %v3454_v57  ;;  %v2805_v43 = vpop.eup %2804 }
 0x23c   :  { %1072 = vmatprep.subr.bf16.mxu0 %v3424_v52  ;;  %1113 = vmatprep.subr.bf16.mxu1 %v3460_v58 }
 0x23f   :  { %1073 = vmatpush1.bf16.msra.mxu0 %v3442_v55  ;;  %1114 = vmatpush1.bf16.msra.mxu1 %v3478_v61 }
 0x240   :  { %1074 = vmatprep.subr.bf16.mxu0 %v3448_v56  ;;  %1115 = vmatprep.subr.bf16.mxu1 %v4759_v22 }
 0x243   :  { %1075 = vmatpush1.bf16.msra.mxu0 %v4760_v59  ;;  %1116 = vmatpush1.bf16.msra.mxu1 %v3500_v34 }
 0x244   :  { %1076 = vmatprep.subr.bf16.mxu0 %v4761_v31  ;;  %1117 = vmatprep.subr.bf16.mxu1 %v3506_v1 }
 0x245   :  { %v2807_v29 = vpop.eup %2806 }
 0x246   :  { %v935_v26 = vmul.f32 %v2807_v29, %v2805_v43 }
 0x247   :  { %1077 = vmatpush1.bf16.msra.mxu0 %v3493_v30  ;;  %1118 = vmatpush1.bf16.msra.mxu1 %v3513_v60 }
 0x248   :  { %2549 = vst [vmem:[%s4659_s6 + $0x30] sm:$0xff] %v935_v26  ;;  %v1061_v38 = vpack.c.bf16 %v935_v26, %v935_v26  ;;  %1182 = vmatprep.subr.bf16.mxu0 %v3736_v7  ;;  %1223 = vmatprep.subr.bf16.mxu1 %v3156_v6  ;;  %v3755_v6 = vld [vmem:[%s4653_s4 + $0x24] ss:$16 sps:$4 sm:$0xff]   ;;  %v2553_v26 = vld [vmem:[%s4655_s0 + $0x58] sm:$0xff] }
 0x24a   :  { %1095 = vmatmul.mubr.bf16.vlgmr.msra.gmra.mrb[20].mxu0 %v1061_v38  ;;  %1136 = vmatmul.mubr.bf16.vlgmr.msra.gmra.mrb[20].mxu1 %v1061_v38 }
 0x24b   :  { %1183 = vmatpush1.bf16.msra.mxu0 %v3743_v5  ;;  %1224 = vmatpush1.bf16.msra.mxu1 %v3749_v23 }
 0x24c   :  { %1184 = vmatprep.subr.bf16.mxu0 %v3755_v6  ;;  %1225 = vmatprep.subr.bf16.mxu1 %v3180_v10  ;;  %v3778_v10 = vld [vmem:[%s4653_s4 + $0x40] ss:$16 sps:$4 sm:$0xff]  }
 0x24d   :  { %1214 = vmatprep.mubr.bf16.mxu0 %v4758_v62  ;;  %1255 = vmatprep.mubr.bf16.mxu1 %v4758_v62 }
 0x24f   :  { %1185 = vmatpush1.bf16.msra.mxu0 %v3764_v18  ;;  %1226 = vmatpush1.bf16.msra.mxu1 %v3185_v11  ;;  %v3785_v11 = vld [vmem:[%s4653_s4 + $0x64] ss:$16 sps:$4 sm:$0xff]  }
 0x250   :  { %1186 = vmatprep.subr.bf16.mxu0 %v3771_v63  ;;  %1227 = vmatprep.subr.bf16.mxu1 %v3202_v14  ;;  %v4777_v14 = vld [vmem:[#allocation5_spill] sm:$0xff] }
 0x253   :  { %1187 = vmatpush1.bf16.msra.mxu0 %v3778_v10  ;;  %1228 = vmatpush1.bf16.msra.mxu1 %v3209_v15  ;;  %v4778_v15 = vld [vmem:[#allocation11_spill] sm:$0xff] }
 0x254   :  { %1188 = vmatprep.subr.bf16.mxu0 %v3785_v11  ;;  %1229 = vmatprep.subr.bf16.mxu1 %v3215_v16  ;;  %v4779_v16 = vld [vmem:[#allocation6_spill] sm:$0xff] }
 0x257   :  { %1189 = vmatpush1.bf16.msra.mxu0 %v3192_v12  ;;  %1230 = vmatpush1.bf16.msra.mxu1 %v3233_v19  ;;  %v4780_v12 = vld [vmem:[#allocation12_spill] sm:$0xff]  ;;  %v4781_v19 = vld [vmem:[#allocation9_spill] sm:$0xff] }
 0x258   :  { %1190 = vmatprep.subr.bf16.mxu0 %v3197_v13  ;;  %1231 = vmatprep.subr.bf16.mxu1 %v3239_v20  ;;  %v4782_v13 = vld [vmem:[#allocation15_spill] sm:$0xff]  ;;  %v4783_v20 = vld [vmem:[#allocation10_spill] sm:$0xff] }
 0x25b   :  { %1191 = vmatpush1.bf16.msra.mxu0 %v3221_v17  ;;  %1232 = vmatpush1.bf16.msra.mxu1 %v4762_v0  ;;  %v4784_v17 = vld [vmem:[#allocation16_spill] sm:$0xff]  ;;  %v4785_v0 = vld [vmem:[#allocation13_spill] sm:$0xff] }
 0x25c   :  { %1192 = vmatprep.subr.bf16.mxu0 %v4763_v2  ;;  %1233 = vmatprep.subr.bf16.mxu1 %v4764_v3  ;;  %v4786_v2 = vld [vmem:[#allocation17_spill] sm:$0xff]  ;;  %v4787_v3 = vld [vmem:[#allocation14_spill] sm:$0xff] }
 0x25f   :  { %1193 = vmatpush1.bf16.msra.mxu0 %v4777_v14  ;;  %1234 = vmatpush1.bf16.msra.mxu1 %v4778_v15  ;;  %v2552_v14 = vld [vmem:[%s4655_s0 + $0x50] sm:$0xff] }
 0x260   :  { %1194 = vmatprep.subr.bf16.mxu0 %v4779_v16  ;;  %1235 = vmatprep.subr.bf16.mxu1 %v4780_v12 }
 0x263   :  { %1195 = vmatpush1.bf16.msra.mxu0 %v4781_v19  ;;  %1236 = vmatpush1.bf16.msra.mxu1 %v4782_v13 }
 0x264   :  { %1196 = vmatprep.subr.bf16.mxu0 %v4783_v20  ;;  %1237 = vmatprep.subr.bf16.mxu1 %v4784_v17 }
 0x267   :  { %1197 = vmatpush1.bf16.msra.mxu0 %v4785_v0  ;;  %1238 = vmatpush1.bf16.msra.mxu1 %v4786_v2 }
 0x268   :  { %1298 = vmatprep.subr.bf16.mxu0 %v4787_v3  ;;  %1339 = vmatprep.subr.bf16.mxu1 %v4788_v25 }
 0x2fd   :  { %v980_v8 = vpop.f32.mrb[16].mxu0  ;;  %v1021_v9 = vpop.f32.mrb[16].mxu1 }
 0x2fe   :  { %v1028_v24 = vadd.f32 %v2550_v33, %v980_v8  ;;  %v982_v35 = vpop.f32.mrb[17].mxu0  ;;  %v1023_v36 = vpop.f32.mrb[17].mxu1  ;;  %v1030_v16 = vadd.f32 %v2552_v14, %v1021_v9  ;;  %v2557_v8 = vld [vmem:[%s4657_s1 + $0x1a0] sm:$0xff]  ;;  %v2558_v9 = vld [vmem:[%s4657_s1 + $0x1a8] sm:$0xff]  ;;  %v2560_v14 = vld [vmem:[%s4657_s1 + $0x1b8] sm:$0xff] }
 0x2ff   :  { %v1029_v28 = vadd.f32 %v2551_v27, %v982_v35  ;;  %v984_v21 = vpop.f32.mrb[18].mxu0  ;;  %v1025_v37 = vpop.f32.mrb[18].mxu1  ;;  %v1031_v38 = vadd.f32 %v2553_v26, %v1023_v36 }
 0x300   :  { %v2554_v39 = vmul.f32 -1.442695, %v1028_v24  ;;  %v985_v32 = vpop.f32.mrb[19].mxu0  ;;  %v1026_v43 = vpop.f32.mrb[19].mxu1 }
 0x301   :  { %v2555_v29 = vmul.f32 -1.442695, %v1029_v28  ;;  %v2556_v15 = vmul.f32 -1.442695, %v1031_v38 }
 0x302   :  { %2808 = vpow2.f32 %v2554_v39 }
 0x303   :  { %2810 = vpow2.f32 %v2555_v29 }
 0x304   :  { %2812 = vpow2.f32 %v2556_v15 }
 0x305   :  { %2814 = vtanh.f32 %v1030_v16  ;;  %v2559_v16 = vld [vmem:[%s4657_s1 + $0x1b0] sm:$0xff] }
 0x30c   :  { %v2809_v12 = vpop.eup %2808 }
 0x30d   :  { %v2811_v19 = vpop.eup %2810  ;;  %v1035_v13 = vadd.f32 1.0, %v2809_v12 }
 0x30e   :  { %v1041_v20 = vadd.f32 1.0, %v2811_v19  ;;  %v2813_v17 = vpop.eup %2812 }
 0x30f   :  { %2816 = vrcp.f32 %v1035_v13  ;;  %v2815_v0 = vpop.eup %2814  ;;  %v1048_v33 = vadd.f32 1.0, %v2813_v17 }
 0x310   :  { %2818 = vrcp.f32 %v1041_v20 }
 0x311   :  { %2820 = vrcp.f32 %v1048_v33 }
 0x319   :  { %v2817_v2 = vpop.eup %2816 }
 0x31a   :  { %v2819_v3 = vpop.eup %2818  ;;  %v1052_v25 = vmul.f32 %v2817_v2, %v2815_v0 }
 0x31b   :  { %v1051_v27 = vmul.f32 %v2819_v3, %v3682_v4  ;;  %v2821_v12 = vpop.eup %2820 }
 0x31d   :  { %v3828_v24 = vadd.f32 %v1052_v25, %v1051_v27  ;;  %v1096_v35 = vpop.f32.mrb[20].mxu0  ;;  %v1137_v36 = vpop.f32.mrb[20].mxu1  ;;  %v3843_v27 = vld [vmem:[%s4653_s4 + $0x100] ss:$16 sps:$4 sm:$0xff]  }
 0x31e   :  { %v1144_v28 = vadd.f32 %v2557_v8, %v1096_v35  ;;  %v1098_v21 = vpop.f32.mrb[21].mxu0  ;;  %v1139_v37 = vpop.f32.mrb[21].mxu1  ;;  %v1146_v20 = vadd.f32 %v2559_v16, %v1137_v36  ;;  %v3850_v8 = vld [vmem:[%s4653_s4 + $0x124] ss:$16 sps:$4 sm:$0xff]   ;;  %v3873_v35 = vld [vmem:[%s4653_s4 + $0x140] ss:$16 sps:$4 sm:$0xff]  }
 0x31f   :  { %2822 = vtanh.f32 %v3828_v24  ;;  %v1145_v39 = vadd.f32 %v2558_v9, %v1098_v21  ;;  %v1100_v4 = vpop.f32.mrb[22].mxu0  ;;  %v1141_v32 = vpop.f32.mrb[22].mxu1  ;;  %v1147_v15 = vadd.f32 %v2560_v14, %v1139_v37  ;;  %v3859_v9 = vld [vmem:[%s4653_s4 + $0x120] ss:$16 sps:$4 sm:$0xff]   ;;  %v4061_v14 = vld [vmem:[%s4653_s4 + $0x104] ss:$16 sps:$4 sm:$0xff]  }
 0x320   :  { %v2561_v43 = vmul.f32 -1.442695, %v1144_v28  ;;  %v1101_v29 = vpop.f32.mrb[23].mxu0  ;;  %v1142_v26 = vpop.f32.mrb[23].mxu1  ;;  %v4025_v4 = vld [vmem:[%s4653_s4 + $0xc0] ss:$16 sps:$4 sm:$0xff]  }
 0x321   :  { %v2562_v38 = vmul.f32 -1.442695, %v1145_v39  ;;  %v2563_v13 = vmul.f32 -1.442695, %v1147_v15  ;;  %v4019_v39 = vld [vmem:[%s4653_s4 + $0xcc] ss:$16 sps:$4 sm:$0xff]  }
 0x322   :  { %2824 = vpow2.f32 %v2561_v43  ;;  %4793 = vst [vmem:[#allocation4_spill] sm:$0xff] %v4019_v39  ;;  %4794 = vst [vmem:[#allocation8_spill] sm:$0xff] %v4025_v4  ;;  %v4031_v32 = vld [vmem:[%s4653_s4 + $0xc8] ss:$16 sps:$4 sm:$0xff]   ;;  %v4037_v43 = vld [vmem:[%s4653_s4 + $0xe4] ss:$16 sps:$4 sm:$0xff]  }
 0x323   :  { %2826 = vpow2.f32 %v2562_v38  ;;  %4795 = vst [vmem:[#allocation5_spill] sm:$0xff] %v4031_v32  ;;  %4796 = vst [vmem:[#allocation11_spill] sm:$0xff] %v4037_v43  ;;  %v4043_v29 = vld [vmem:[%s4653_s4 + $0xec] ss:$16 sps:$4 sm:$0xff]   ;;  %v4049_v26 = vld [vmem:[%s4653_s4 + $0xe0] ss:$16 sps:$4 sm:$0xff]  }
 0x324   :  { %2828 = vpow2.f32 %v2563_v13  ;;  %4797 = vst [vmem:[#allocation6_spill] sm:$0xff] %v4043_v29  ;;  %4798 = vst [vmem:[#allocation12_spill] sm:$0xff] %v4049_v26  ;;  %v4055_v38 = vld [vmem:[%s4653_s4 + $0xe8] ss:$16 sps:$4 sm:$0xff]   ;;  %v4067_v15 = vld [vmem:[%s4653_s4 + $0x10c] ss:$16 sps:$4 sm:$0xff]  }
 0x325   :  { %2830 = vtanh.f32 %v1146_v20  ;;  %4799 = vst [vmem:[#allocation9_spill] sm:$0xff] %v4055_v38  ;;  %4800 = vst [vmem:[#allocation15_spill] sm:$0xff] %v4061_v14  ;;  %v2566_v16 = vld [vmem:[%s4655_s0 + $0x60] sm:$0xff] }
 0x326   :  { %4801 = vst [vmem:[#allocation10_spill] sm:$0xff] %v4067_v15 }
 0x329   :  { %v2823_v19 = vpop.eup %2822 }
 0x32a   :  { %v1055_v17 = vmul.f32 %v2823_v19, %v2821_v12  ;;  %v2567_v12 = vld [vmem:[%s4655_s0 + $0x68] sm:$0xff] }
 0x32c   :  { %v2825_v0 = vpop.eup %2824  ;;  %2564 = vst [vmem:[%s4658_s5 + $0x10] sm:$0xff] %v1055_v17  ;;  %v1181_v2 = vpack.c.bf16 %v1055_v17, %v1055_v17 }
 0x32d   :  { %v2827_v3 = vpop.eup %2826  ;;  %v1151_v25 = vadd.f32 1.0, %v2825_v0 }
 0x32e   :  { %v1157_v33 = vadd.f32 1.0, %v2827_v3  ;;  %1215 = vmatmul.mubr.bf16.vlgmr.msra.gmra.mrb[24].mxu0 %v1181_v2  ;;  %1256 = vmatmul.mubr.bf16.vlgmr.msra.gmra.mrb[24].mxu1 %v1181_v2 }
 0x32f   :  { %2832 = vrcp.f32 %v1151_v25  ;;  %1299 = vmatpush1.bf16.msra.mxu0 %v3843_v27  ;;  %1340 = vmatpush1.bf16.msra.mxu1 %v3357_v41  ;;  %v3866_v41 = vld [vmem:[%s4653_s4 + $0x144] ss:$16 sps:$4 sm:$0xff]  }
 0x330   :  { %2834 = vrcp.f32 %v1157_v33  ;;  %1300 = vmatprep.subr.bf16.mxu0 %v3850_v8  ;;  %1341 = vmatprep.subr.bf16.mxu1 %v3363_v42  ;;  %v2829_v42 = vpop.eup %2828 }
 0x331   :  { %1330 = vmatprep.mubr.bf16.mxu0 %v4758_v62  ;;  %1371 = vmatprep.mubr.bf16.mxu1 %v4758_v62  ;;  %v1164_v37 = vadd.f32 1.0, %v2829_v42 }
 0x333   :  { %1301 = vmatpush1.bf16.msra.mxu0 %v3859_v9  ;;  %1342 = vmatpush1.bf16.msra.mxu1 %v3381_v45  ;;  %v2831_v45 = vpop.eup %2830  ;;  %2836 = vrcp.f32 %v1164_v37  ;;  %v2568_v37 = vld [vmem:[%s4655_s0 + $0x70] sm:$0xff] }
 0x334   :  { %1302 = vmatprep.subr.bf16.mxu0 %v3866_v41  ;;  %1343 = vmatprep.subr.bf16.mxu1 %v3387_v46 }
 0x337   :  { %1303 = vmatpush1.bf16.msra.mxu0 %v3873_v35  ;;  %1344 = vmatpush1.bf16.msra.mxu1 %v3406_v49 }
 0x338   :  { %1304 = vmatprep.subr.bf16.mxu0 %v3375_v44  ;;  %1345 = vmatprep.subr.bf16.mxu1 %v3412_v50 }
 0x339   :  { %v2833_v36 = vpop.eup %2832 }
 0x33a   :  { %v2835_v28 = vpop.eup %2834  ;;  %v1168_v21 = vmul.f32 %v2833_v36, %v2831_v45 }
 0x33b   :  { %v1167_v46 = vmul.f32 %v2835_v28, %v3713_v40  ;;  %1305 = vmatpush1.bf16.msra.mxu0 %v3394_v47  ;;  %1346 = vmatpush1.bf16.msra.mxu1 %v3430_v53  ;;  %v3933_v53 = vld [vmem:[%s4653_s4 + $0x4c] ss:$16 sps:$4 sm:$0xff]   ;;  %v4013_v40 = vld [vmem:[%s4653_s4 + $0xc4] ss:$16 sps:$4 sm:$0xff]  }
 0x33c   :  { %1306 = vmatprep.subr.bf16.mxu0 %v3400_v48  ;;  %1347 = vmatprep.subr.bf16.mxu1 %v3436_v54  ;;  %v3940_v54 = vld [vmem:[%s4653_s4 + $0x48] ss:$16 sps:$4 sm:$0xff]   ;;  %4792 = vst [vmem:[#allocation7_spill] sm:$0xff] %v4013_v40 }
 0x33d   :  { %v3884_v49 = vadd.f32 %v1168_v21, %v1167_v46  ;;  %v2837_v44 = vpop.eup %2836  ;;  %v2569_v28 = vld [vmem:[%s4655_s0 + $0x78] sm:$0xff] }
 0x33f   :  { %2838 = vtanh.f32 %v3884_v49  ;;  %1307 = vmatpush1.bf16.msra.mxu0 %v3418_v51  ;;  %1348 = vmatpush1.bf16.msra.mxu1 %v3454_v57  ;;  %v3908_v51 = vld [vmem:[%s4653_s4 + $0xc] ss:$16 sps:$4 sm:$0xff]   ;;  %v3959_v57 = vld [vmem:[%s4653_s4 + $0x68] ss:$16 sps:$4 sm:$0xff]  }
 0x340   :  { %1308 = vmatprep.subr.bf16.mxu0 %v3424_v52  ;;  %1349 = vmatprep.subr.bf16.mxu1 %v3460_v58  ;;  %v3926_v52 = vld [vmem:[%s4653_s4 + $0x28] ss:$16 sps:$4 sm:$0xff]   ;;  %v3965_v58 = vld [vmem:[%s4653_s4 + $0x84] ss:$16 sps:$4 sm:$0xff]  }
 0x343   :  { %1309 = vmatpush1.bf16.msra.mxu0 %v3442_v55  ;;  %1350 = vmatpush1.bf16.msra.mxu1 %v3478_v61  ;;  %v3947_v55 = vld [vmem:[%s4653_s4 + $0x6c] ss:$16 sps:$4 sm:$0xff]   ;;  %v3977_v61 = vld [vmem:[%s4653_s4 + $0x80] ss:$16 sps:$4 sm:$0xff]  }
 0x344   :  { %1310 = vmatprep.subr.bf16.mxu0 %v3448_v56  ;;  %1351 = vmatprep.subr.bf16.mxu1 %v4759_v22  ;;  %v3953_v56 = vld [vmem:[%s4653_s4 + $0x60] ss:$16 sps:$4 sm:$0xff]   ;;  %v3995_v22 = vld [vmem:[%s4653_s4 + $0xac] ss:$16 sps:$4 sm:$0xff]  }
 0x345   :  { %4789 = vst [vmem:[#allocation21_spill] sm:$0xff] %v3995_v22 }
 0x347   :  { %1311 = vmatpush1.bf16.msra.mxu0 %v4760_v59  ;;  %1352 = vmatpush1.bf16.msra.mxu1 %v3500_v34  ;;  %v3989_v34 = vld [vmem:[%s4653_s4 + $0xa4] ss:$16 sps:$4 sm:$0xff]   ;;  %v4001_v59 = vld [vmem:[%s4653_s4 + $0xa0] ss:$16 sps:$4 sm:$0xff]  }
 0x348   :  { %1312 = vmatprep.subr.bf16.mxu0 %v4761_v31  ;;  %1353 = vmatprep.subr.bf16.mxu1 %v3506_v1  ;;  %v3917_v1 = vld [vmem:[%s4653_s4 + $0x2c] ss:$16 sps:$4 sm:$0xff]   ;;  %4790 = vst [vmem:[#allocation19_spill] sm:$0xff] %v4001_v59  ;;  %v4007_v31 = vld [vmem:[%s4653_s4 + $0xa8] ss:$16 sps:$4 sm:$0xff]  }
 0x349   :  { %v2839_v47 = vpop.eup %2838  ;;  %4791 = vst [vmem:[#allocation20_spill] sm:$0xff] %v4007_v31 }
 0x34a   :  { %v1171_v48 = vmul.f32 %v2839_v47, %v2837_v44 }
 0x34b   :  { %1313 = vmatpush1.bf16.msra.mxu0 %v3493_v30  ;;  %1354 = vmatpush1.bf16.msra.mxu1 %v3513_v60  ;;  %v3971_v60 = vld [vmem:[%s4653_s4 + $0x8c] ss:$16 sps:$4 sm:$0xff]   ;;  %v3983_v30 = vld [vmem:[%s4653_s4 + $0x88] ss:$16 sps:$4 sm:$0xff]  }
 0x34c   :  { %2565 = vst [vmem:[%s4659_s6 + $0x28] sm:$0xff] %v1171_v48  ;;  %v1297_v50 = vpack.c.bf16 %v1171_v48, %v1171_v48  ;;  %1418 = vmatprep.subr.bf16.mxu0 %v3736_v7  ;;  %1459 = vmatprep.subr.bf16.mxu1 %v3908_v51 }
 0x34e   :  { %1331 = vmatmul.mubr.bf16.vlgmr.msra.gmra.mrb[28].mxu0 %v1297_v50  ;;  %1372 = vmatmul.mubr.bf16.vlgmr.msra.gmra.mrb[28].mxu1 %v1297_v50 }
 0x34f   :  { %1419 = vmatpush1.bf16.msra.mxu0 %v3743_v5  ;;  %1460 = vmatpush1.bf16.msra.mxu1 %v3749_v23 }
 0x350   :  { %1420 = vmatprep.subr.bf16.mxu0 %v3755_v6  ;;  %1461 = vmatprep.subr.bf16.mxu1 %v3917_v1 }
 0x351   :  { %1450 = vmatprep.mubr.bf16.mxu0 %v4758_v62  ;;  %1491 = vmatprep.mubr.bf16.mxu1 %v4758_v62 }
 0x353   :  { %1421 = vmatpush1.bf16.msra.mxu0 %v3764_v18  ;;  %1462 = vmatpush1.bf16.msra.mxu1 %v3926_v52 }
 0x354   :  { %1422 = vmatprep.subr.bf16.mxu0 %v3771_v63  ;;  %1463 = vmatprep.subr.bf16.mxu1 %v3933_v53 }
 0x357   :  { %1423 = vmatpush1.bf16.msra.mxu0 %v3778_v10  ;;  %1464 = vmatpush1.bf16.msra.mxu1 %v3940_v54 }
 0x358   :  { %1424 = vmatprep.subr.bf16.mxu0 %v3785_v11  ;;  %1465 = vmatprep.subr.bf16.mxu1 %v3947_v55 }
 0x35b   :  { %1425 = vmatpush1.bf16.msra.mxu0 %v3953_v56  ;;  %1466 = vmatpush1.bf16.msra.mxu1 %v3959_v57 }
 0x35c   :  { %1426 = vmatprep.subr.bf16.mxu0 %v3965_v58  ;;  %1467 = vmatprep.subr.bf16.mxu1 %v3971_v60 }
 0x35f   :  { %1427 = vmatpush1.bf16.msra.mxu0 %v3977_v61  ;;  %1468 = vmatpush1.bf16.msra.mxu1 %v3983_v30 }
 0x360   :  { %1428 = vmatprep.subr.bf16.mxu0 %v3989_v34  ;;  %1469 = vmatprep.subr.bf16.mxu1 %v3995_v22 }
 0x363   :  { %1429 = vmatpush1.bf16.msra.mxu0 %v4001_v59  ;;  %1470 = vmatpush1.bf16.msra.mxu1 %v4007_v31 }
 0x364   :  { %1430 = vmatprep.subr.bf16.mxu0 %v4013_v40  ;;  %1471 = vmatprep.subr.bf16.mxu1 %v4019_v39 }
 0x367   :  { %1431 = vmatpush1.bf16.msra.mxu0 %v4025_v4  ;;  %1472 = vmatpush1.bf16.msra.mxu1 %v4031_v32 }
 0x368   :  { %1432 = vmatprep.subr.bf16.mxu0 %v4037_v43  ;;  %1473 = vmatprep.subr.bf16.mxu1 %v4043_v29 }
 0x36b   :  { %1433 = vmatpush1.bf16.msra.mxu0 %v4049_v26  ;;  %1474 = vmatpush1.bf16.msra.mxu1 %v4055_v38 }
 0x36c   :  { %1534 = vmatprep.subr.bf16.mxu0 %v4061_v14  ;;  %1575 = vmatprep.subr.bf16.mxu1 %v4067_v15 }
 0x401   :  { %v1216_v19 = vpop.f32.mrb[24].mxu0  ;;  %v1257_v13 = vpop.f32.mrb[24].mxu1 }
 0x402   :  { %v1264_v20 = vadd.f32 %v2566_v16, %v1216_v19  ;;  %v1218_v17 = vpop.f32.mrb[25].mxu0  ;;  %v1259_v0 = vpop.f32.mrb[25].mxu1  ;;  %v1266_v44 = vadd.f32 %v2568_v37, %v1257_v13  ;;  %v2573_v13 = vld [vmem:[%s4657_s1 + $0x180] sm:$0xff] }
 0x403   :  { %v1265_v2 = vadd.f32 %v2567_v12, %v1218_v17  ;;  %v1220_v3 = vpop.f32.mrb[26].mxu0  ;;  %v1261_v25 = vpop.f32.mrb[26].mxu1  ;;  %v1267_v21 = vadd.f32 %v2569_v28, %v1259_v0 }
 0x404   :  { %v2570_v33 = vmul.f32 -1.442695, %v1264_v20  ;;  %v1221_v42 = vpop.f32.mrb[27].mxu0  ;;  %v1262_v45 = vpop.f32.mrb[27].mxu1  ;;  %v2574_v25 = vld [vmem:[%s4657_s1 + $0x188] sm:$0xff] }
 0x405   :  { %v2571_v36 = vmul.f32 -1.442695, %v1265_v2  ;;  %v2572_v46 = vmul.f32 -1.442695, %v1267_v21 }
 0x406   :  { %2840 = vpow2.f32 %v2570_v33 }
 0x407   :  { %2842 = vpow2.f32 %v2571_v36 }
 0x408   :  { %2844 = vpow2.f32 %v2572_v46 }
 0x409   :  { %2846 = vtanh.f32 %v1266_v44 }
 0x410   :  { %v2841_v47 = vpop.eup %2840 }
 0x411   :  { %v2843_v48 = vpop.eup %2842  ;;  %v1271_v50 = vadd.f32 1.0, %v2841_v47 }
 0x412   :  { %v1277_v16 = vadd.f32 1.0, %v2843_v48  ;;  %v2845_v12 = vpop.eup %2844 }
 0x413   :  { %2848 = vrcp.f32 %v1271_v50  ;;  %v2847_v19 = vpop.eup %2846  ;;  %v1284_v0 = vadd.f32 1.0, %v2845_v12 }
 0x414   :  { %2850 = vrcp.f32 %v1277_v16  ;;  %v2576_v16 = vld [vmem:[%s4657_s1 + $0x198] sm:$0xff] }
 0x415   :  { %2852 = vrcp.f32 %v1284_v0 }
 0x41d   :  { %v2849_v20 = vpop.eup %2848 }
 0x41e   :  { %v2851_v17 = vpop.eup %2850  ;;  %v1288_v2 = vmul.f32 %v2849_v20, %v2847_v19  ;;  %v2575_v19 = vld [vmem:[%s4657_s1 + $0x190] sm:$0xff] }
 0x41f   :  { %v1287_v3 = vmul.f32 %v2851_v17, %v3828_v24  ;;  %v2853_v20 = vpop.eup %2852 }
 0x421   :  { %v4089_v33 = vadd.f32 %v1288_v2, %v1287_v3  ;;  %v1332_v42 = vpop.f32.mrb[28].mxu0  ;;  %v1373_v45 = vpop.f32.mrb[28].mxu1 }
 0x422   :  { %v1380_v36 = vadd.f32 %v2573_v13, %v1332_v42  ;;  %v1334_v28 = vpop.f32.mrb[29].mxu0  ;;  %v1375_v21 = vpop.f32.mrb[29].mxu1  ;;  %v1382_v0 = vadd.f32 %v2575_v19, %v1373_v45  ;;  %v4105_v45 = vld [vmem:[%s4653_s4 + $0x108] ss:$16 sps:$4 sm:$0xff]  }
 0x423   :  { %2854 = vtanh.f32 %v4089_v33  ;;  %v1381_v37 = vadd.f32 %v2574_v25, %v1334_v28  ;;  %v1336_v24 = vpop.f32.mrb[30].mxu0  ;;  %v1377_v46 = vpop.f32.mrb[30].mxu1  ;;  %v1383_v12 = vadd.f32 %v2576_v16, %v1375_v21  ;;  %v4112_v21 = vld [vmem:[%s4653_s4 + $0x12c] ss:$16 sps:$4 sm:$0xff]  }
 0x424   :  { %v2577_v44 = vmul.f32 -1.442695, %v1380_v36  ;;  %v1337_v47 = vpop.f32.mrb[31].mxu0  ;;  %v1378_v48 = vpop.f32.mrb[31].mxu1  ;;  %v4128_v24 = vld [vmem:[%s4653_s4 + $0x14c] ss:$16 sps:$4 sm:$0xff]  }
 0x425   :  { %v2578_v50 = vmul.f32 -1.442695, %v1381_v37  ;;  %v2579_v2 = vmul.f32 -1.442695, %v1383_v12  ;;  %v4121_v37 = vld [vmem:[%s4653_s4 + $0x128] ss:$16 sps:$4 sm:$0xff]  }
 0x426   :  { %2856 = vpow2.f32 %v2577_v44  ;;  %v4135_v44 = vld [vmem:[%s4653_s4 + $0x148] ss:$16 sps:$4 sm:$0xff]   ;;  %v4141_v48 = vld [vmem:[%s4653_s4 + $0x164] ss:$16 sps:$4 sm:$0xff]  }
 0x427   :  { %2858 = vpow2.f32 %v2578_v50  ;;  %v4147_v50 = vld [vmem:[%s4653_s4 + $0x16c] ss:$16 sps:$4 sm:$0xff]  }
 0x428   :  { %2860 = vpow2.f32 %v2579_v2  ;;  %v4154_v2 = vld [vmem:[%s4653_s4 + $0x160] ss:$16 sps:$4 sm:$0xff]  }
 0x429   :  { %2862 = vtanh.f32 %v1382_v0  ;;  %v4160_v0 = vld [vmem:[%s4653_s4 + $0x168] ss:$16 sps:$4 sm:$0xff]  }
 0x42d   :  { %v2855_v17 = vpop.eup %2854 }
 0x42e   :  { %v1291_v3 = vmul.f32 %v2855_v17, %v2853_v20 }
 0x430   :  { %v2857_v13 = vpop.eup %2856  ;;  %2580 = vst [vmem:[%s4658_s5 + $0x18] sm:$0xff] %v1291_v3  ;;  %v1417_v25 = vpack.c.bf16 %v1291_v3, %v1291_v3  ;;  %v4166_v3 = vld [vmem:[%s4653_s4 + $0x184] ss:$16 sps:$4 sm:$0xff]  }
 0x431   :  { %v2859_v42 = vpop.eup %2858  ;;  %v1387_v36 = vadd.f32 1.0, %v2857_v13 }
 0x432   :  { %v1393_v28 = vadd.f32 1.0, %v2859_v42  ;;  %1451 = vmatmul.mubr.bf16.vlgmr.msra.gmra.mrb[32].mxu0 %v1417_v25  ;;  %1492 = vmatmul.mubr.bf16.vlgmr.msra.gmra.mrb[32].mxu1 %v1417_v25  ;;  %v2861_v46 = vpop.eup %2860  ;;  %v4181_v25 = vld [vmem:[%s4653_s4 + $0x180] ss:$16 sps:$4 sm:$0xff]   ;;  %v4187_v42 = vld [vmem:[%s4653_s4 + $0x188] ss:$16 sps:$4 sm:$0xff]  }
 0x433   :  { %2864 = vrcp.f32 %v1387_v36  ;;  %1535 = vmatpush1.bf16.msra.mxu0 %v3843_v27  ;;  %1576 = vmatpush1.bf16.msra.mxu1 %v4105_v45  ;;  %v2863_v47 = vpop.eup %2862  ;;  %v1400_v20 = vadd.f32 1.0, %v2861_v46  ;;  %v4193_v36 = vld [vmem:[%s4653_s4 + $0x1a4] ss:$16 sps:$4 sm:$0xff]   ;;  %v4205_v46 = vld [vmem:[%s4653_s4 + $0x1a0] ss:$16 sps:$4 sm:$0xff]  }
 0x434   :  { %2866 = vrcp.f32 %v1393_v28  ;;  %1536 = vmatprep.subr.bf16.mxu0 %v3850_v8  ;;  %1577 = vmatprep.subr.bf16.mxu1 %v4112_v21  ;;  %v4199_v28 = vld [vmem:[%s4653_s4 + $0x1ac] ss:$16 sps:$4 sm:$0xff]  }
 0x435   :  { %1566 = vmatprep.mubr.bf16.mxu0 %v4758_v62  ;;  %1607 = vmatprep.mubr.bf16.mxu1 %v4758_v62  ;;  %2868 = vrcp.f32 %v1400_v20  ;;  %v4235_v20 = vld [vmem:[%s4653_s4 + $0x1c8] ss:$16 sps:$4 sm:$0xff]  }
 0x436   :  { %4806 = vst [vmem:[#allocation18_spill] sm:$0xff] %v4235_v20 }
 0x437   :  { %1537 = vmatpush1.bf16.msra.mxu0 %v3859_v9  ;;  %1578 = vmatpush1.bf16.msra.mxu1 %v4121_v37 }
 0x438   :  { %1538 = vmatprep.subr.bf16.mxu0 %v3866_v41  ;;  %1579 = vmatprep.subr.bf16.mxu1 %v4128_v24 }
 0x43b   :  { %1539 = vmatpush1.bf16.msra.mxu0 %v3873_v35  ;;  %1580 = vmatpush1.bf16.msra.mxu1 %v4135_v44 }
 0x43c   :  { %1540 = vmatprep.subr.bf16.mxu0 %v4141_v48  ;;  %1581 = vmatprep.subr.bf16.mxu1 %v4147_v50 }
 0x43d   :  { %v2865_v16 = vpop.eup %2864 }
 0x43e   :  { %v2867_v12 = vpop.eup %2866  ;;  %v1404_v19 = vmul.f32 %v2865_v16, %v2863_v47  ;;  %v4211_v47 = vld [vmem:[%s4653_s4 + $0x1a8] ss:$16 sps:$4 sm:$0xff]   ;;  %v4217_v16 = vld [vmem:[%s4653_s4 + $0x1c4] ss:$16 sps:$4 sm:$0xff]  }
 0x43f   :  { %v1403_v17 = vmul.f32 %v2867_v12, %v3884_v49  ;;  %1541 = vmatpush1.bf16.msra.mxu0 %v4154_v2  ;;  %1582 = vmatpush1.bf16.msra.mxu1 %v4160_v0  ;;  %v4172_v49 = vld [vmem:[%s4653_s4 + $0x18c] ss:$16 sps:$4 sm:$0xff]   ;;  %4802 = vst [vmem:[#allocation16_spill] sm:$0xff] %v4211_v47  ;;  %4803 = vst [vmem:[#allocation13_spill] sm:$0xff] %v4217_v16 }
 0x440   :  { %1542 = vmatprep.subr.bf16.mxu0 %v4166_v3  ;;  %1583 = vmatprep.subr.bf16.mxu1 %v4172_v49  ;;  %v4223_v12 = vld [vmem:[%s4653_s4 + $0x1cc] ss:$16 sps:$4 sm:$0xff]  }
 0x441   :  { %v4175_v13 = vadd.f32 %v1404_v19, %v1403_v17  ;;  %4804 = vst [vmem:[#allocation17_spill] sm:$0xff] %v4223_v12  ;;  %v4229_v19 = vld [vmem:[%s4653_s4 + $0x1c0] ss:$16 sps:$4 sm:$0xff]   ;;  %v2869_v17 = vpop.eup %2868 }
 0x442   :  { %4805 = vst [vmem:[#allocation14_spill] sm:$0xff] %v4229_v19 }
 0x443   :  { %2870 = vtanh.f32 %v4175_v13  ;;  %1543 = vmatpush1.bf16.msra.mxu0 %v4181_v25  ;;  %1584 = vmatpush1.bf16.msra.mxu1 %v4187_v42 }
 0x444   :  { %1544 = vmatprep.subr.bf16.mxu0 %v4193_v36  ;;  %1585 = vmatprep.subr.bf16.mxu1 %v4199_v28 }
 0x447   :  { %1545 = vmatpush1.bf16.msra.mxu0 %v4205_v46  ;;  %1586 = vmatpush1.bf16.msra.mxu1 %v4211_v47 }
 0x448   :  { %1546 = vmatprep.subr.bf16.mxu0 %v4217_v16  ;;  %1587 = vmatprep.subr.bf16.mxu1 %v4223_v12  ;;  %v4241_v16 = vld [vmem:[%s4653_s4 + $0x1e4] ss:$16 sps:$4 sm:$0xff]   ;;  %v4247_v12 = vld [vmem:[%s4653_s4 + $0x1ec] ss:$16 sps:$4 sm:$0xff]  }
 0x449   :  { %4807 = vst [vmem:[#allocation22_spill] sm:$0xff] %v4241_v16  ;;  %4808 = vst [vmem:[#allocation23_spill] sm:$0xff] %v4247_v12 }
 0x44b   :  { %1547 = vmatpush1.bf16.msra.mxu0 %v4229_v19  ;;  %1588 = vmatpush1.bf16.msra.mxu1 %v4235_v20  ;;  %v4253_v20 = vld [vmem:[%s4653_s4 + $0x1e0] ss:$16 sps:$4 sm:$0xff]  }
 0x44c   :  { %1548 = vmatprep.subr.bf16.mxu0 %v4241_v16  ;;  %1589 = vmatprep.subr.bf16.mxu1 %v4247_v12  ;;  %v4259_v16 = vld [vmem:[%s4653_s4 + $0x1e8] ss:$16 sps:$4 sm:$0xff]  }
 0x44d   :  { %v2871_v19 = vpop.eup %2870 }
 0x44e   :  { %v1407_v47 = vmul.f32 %v2871_v19, %v2869_v17 }
 0x44f   :  { %1549 = vmatpush1.bf16.msra.mxu0 %v4253_v20  ;;  %1590 = vmatpush1.bf16.msra.mxu1 %v4259_v16 }
 0x450   :  { %2581 = vst [vmem:[%s4659_s6 + $0x20] sm:$0xff] %v1407_v47  ;;  %v1533_v12 = vpack.c.bf16 %v1407_v47, %v1407_v47  ;;  %1654 = vmatprep.subr.bf16.mxu0 %v3736_v7  ;;  %1695 = vmatprep.subr.bf16.mxu1 %v3908_v51  ;;  %v2582_v47 = vld [vmem:[%s4655_s0 + $0x80] sm:$0xff] }
 0x452   :  { %1567 = vmatmul.mubr.bf16.vlgmr.msra.gmra.mrb[36].mxu0 %v1533_v12  ;;  %1608 = vmatmul.mubr.bf16.vlgmr.msra.gmra.mrb[36].mxu1 %v1533_v12  ;;  %v2583_v12 = vld [vmem:[%s4655_s0 + $0x88] sm:$0xff] }
 0x453   :  { %1655 = vmatpush1.bf16.msra.mxu0 %v3743_v5  ;;  %1696 = vmatpush1.bf16.msra.mxu1 %v3749_v23 }
 0x454   :  { %1656 = vmatprep.subr.bf16.mxu0 %v3755_v6  ;;  %1697 = vmatprep.subr.bf16.mxu1 %v3917_v1 }
 0x455   :  { %1686 = vmatprep.mubr.bf16.mxu0 %v4758_v62  ;;  %1727 = vmatprep.mubr.bf16.mxu1 %v4758_v62 }
 0x457   :  { %1657 = vmatpush1.bf16.msra.mxu0 %v3764_v18  ;;  %1698 = vmatpush1.bf16.msra.mxu1 %v3926_v52 }
 0x458   :  { %1658 = vmatprep.subr.bf16.mxu0 %v3771_v63  ;;  %1699 = vmatprep.subr.bf16.mxu1 %v3933_v53 }
 0x45b   :  { %1659 = vmatpush1.bf16.msra.mxu0 %v3778_v10  ;;  %1700 = vmatpush1.bf16.msra.mxu1 %v3940_v54 }
 0x45c   :  { %1660 = vmatprep.subr.bf16.mxu0 %v3785_v11  ;;  %1701 = vmatprep.subr.bf16.mxu1 %v3947_v55 }
 0x45f   :  { %1661 = vmatpush1.bf16.msra.mxu0 %v3953_v56  ;;  %1702 = vmatpush1.bf16.msra.mxu1 %v3959_v57 }
 0x460   :  { %1662 = vmatprep.subr.bf16.mxu0 %v3965_v58  ;;  %1703 = vmatprep.subr.bf16.mxu1 %v3971_v60 }
 0x463   :  { %1663 = vmatpush1.bf16.msra.mxu0 %v3977_v61  ;;  %1704 = vmatpush1.bf16.msra.mxu1 %v3983_v30 }
 0x464   :  { %1664 = vmatprep.subr.bf16.mxu0 %v3989_v34  ;;  %1705 = vmatprep.subr.bf16.mxu1 %v3995_v22 }
 0x467   :  { %1665 = vmatpush1.bf16.msra.mxu0 %v4001_v59  ;;  %1706 = vmatpush1.bf16.msra.mxu1 %v4007_v31  ;;  %v2585_v31 = vld [vmem:[%s4655_s0 + $0x98] sm:$0xff] }
 0x468   :  { %1666 = vmatprep.subr.bf16.mxu0 %v4013_v40  ;;  %1707 = vmatprep.subr.bf16.mxu1 %v4019_v39 }
 0x46b   :  { %1667 = vmatpush1.bf16.msra.mxu0 %v4025_v4  ;;  %1708 = vmatpush1.bf16.msra.mxu1 %v4031_v32 }
 0x46c   :  { %1668 = vmatprep.subr.bf16.mxu0 %v4037_v43  ;;  %1709 = vmatprep.subr.bf16.mxu1 %v4043_v29 }
 0x46f   :  { %1669 = vmatpush1.bf16.msra.mxu0 %v4049_v26  ;;  %1710 = vmatpush1.bf16.msra.mxu1 %v4055_v38 }
 0x470   :  { %1770 = vmatprep.subr.bf16.mxu0 %v4061_v14  ;;  %1811 = vmatprep.subr.bf16.mxu1 %v4067_v15 }
 0x505   :  { %v1452_v19 = vpop.f32.mrb[32].mxu0  ;;  %v1493_v17 = vpop.f32.mrb[32].mxu1 }
 0x506   :  { %v1500_v43 = vadd.f32 %v2582_v47, %v1452_v19  ;;  %v1454_v29 = vpop.f32.mrb[33].mxu0  ;;  %v1495_v32 = vpop.f32.mrb[33].mxu1  ;;  %v2584_v47 = vld [vmem:[%s4655_s0 + $0x90] sm:$0xff] }
 0x507   :  { %v1501_v26 = vadd.f32 %v2583_v12, %v1454_v29  ;;  %v1456_v4 = vpop.f32.mrb[34].mxu0  ;;  %v1497_v38 = vpop.f32.mrb[34].mxu1  ;;  %v1503_v59 = vadd.f32 %v2585_v31, %v1495_v32  ;;  %v1502_v22 = vadd.f32 %v2584_v47, %v1493_v17  ;;  %v2590_v12 = vld [vmem:[%s4657_s1 + $0x168] sm:$0xff] }
 0x508   :  { %v2586_v39 = vmul.f32 -1.442695, %v1500_v43  ;;  %v1457_v14 = vpop.f32.mrb[35].mxu0  ;;  %v1498_v40 = vpop.f32.mrb[35].mxu1 }
 0x509   :  { %v2587_v15 = vmul.f32 -1.442695, %v1501_v26  ;;  %v2588_v19 = vmul.f32 -1.442695, %v1503_v59  ;;  %v2589_v59 = vld [vmem:[%s4657_s1 + $0x160] sm:$0xff] }
 0x50a   :  { %2872 = vpow2.f32 %v2586_v39 }
 0x50b   :  { %2874 = vpow2.f32 %v2587_v15 }
 0x50c   :  { %2876 = vpow2.f32 %v2588_v19 }
 0x50d   :  { %2878 = vtanh.f32 %v1502_v22 }
 0x514   :  { %v2873_v29 = vpop.eup %2872 }
 0x515   :  { %v2875_v4 = vpop.eup %2874  ;;  %v1507_v38 = vadd.f32 1.0, %v2873_v29 }
 0x516   :  { %v1513_v40 = vadd.f32 1.0, %v2875_v4  ;;  %v2877_v39 = vpop.eup %2876 }
 0x517   :  { %2880 = vrcp.f32 %v1507_v38  ;;  %v2879_v43 = vpop.eup %2878  ;;  %v1520_v31 = vadd.f32 1.0, %v2877_v39 }
 0x518   :  { %2882 = vrcp.f32 %v1513_v40 }
 0x519   :  { %2884 = vrcp.f32 %v1520_v31  ;;  %v2591_v31 = vld [vmem:[%s4657_s1 + $0x170] sm:$0xff] }
 0x521   :  { %v2881_v26 = vpop.eup %2880 }
 0x522   :  { %v2883_v14 = vpop.eup %2882  ;;  %v1524_v15 = vmul.f32 %v2881_v26, %v2879_v43 }
 0x523   :  { %v1523_v32 = vmul.f32 %v2883_v14, %v4089_v33 }
 0x525   :  { %v4320_v22 = vadd.f32 %v1524_v15, %v1523_v32  ;;  %v1568_v17 = vpop.f32.mrb[36].mxu0  ;;  %v1609_v47 = vpop.f32.mrb[36].mxu1  ;;  %v2592_v15 = vld [vmem:[%s4657_s1 + $0x178] sm:$0xff] }
 0x526   :  { %v1616_v19 = vadd.f32 %v2589_v59, %v1568_v17  ;;  %v1570_v29 = vpop.f32.mrb[37].mxu0  ;;  %v1611_v4 = vpop.f32.mrb[37].mxu1 }
 0x527   :  { %2886 = vtanh.f32 %v4320_v22  ;;  %v1617_v38 = vadd.f32 %v2590_v12, %v1570_v29  ;;  %v1572_v33 = vpop.f32.mrb[38].mxu0  ;;  %v1613_v40 = vpop.f32.mrb[38].mxu1  ;;  %v1619_v32 = vadd.f32 %v2592_v15, %v1611_v4  ;;  %v1618_v29 = vadd.f32 %v2591_v31, %v1609_v47 }
 0x528   :  { %v2593_v39 = vmul.f32 -1.442695, %v1616_v19  ;;  %v1573_v43 = vpop.f32.mrb[39].mxu0  ;;  %v1614_v26 = vpop.f32.mrb[39].mxu1 }
 0x529   :  { %v2594_v14 = vmul.f32 -1.442695, %v1617_v38  ;;  %v2885_v59 = vpop.eup %2884  ;;  %v2595_v12 = vmul.f32 -1.442695, %v1619_v32 }
 0x52a   :  { %2888 = vpow2.f32 %v2593_v39 }
 0x52b   :  { %2890 = vpow2.f32 %v2594_v14 }
 0x52c   :  { %2892 = vpow2.f32 %v2595_v12  ;;  %v4811_v12 = vld [vmem:[#allocation17_spill] sm:$0xff] }
 0x52d   :  { %2894 = vtanh.f32 %v1618_v29  ;;  %v4812_v29 = vld [vmem:[#allocation14_spill] sm:$0xff] }
 0x531   :  { %v2887_v17 = vpop.eup %2886 }
 0x532   :  { %v1527_v33 = vmul.f32 %v2887_v17, %v2885_v59  ;;  %v4810_v17 = vld [vmem:[#allocation13_spill] sm:$0xff] }
 0x534   :  { %v2889_v19 = vpop.eup %2888  ;;  %2596 = vst [vmem:[%s4658_s5 + $0x20] sm:$0xff] %v1527_v33  ;;  %v1653_v38 = vpack.c.bf16 %v1527_v33, %v1527_v33  ;;  %v4813_v33 = vld [vmem:[#allocation18_spill] sm:$0xff] }
 0x535   :  { %v2891_v40 = vpop.eup %2890  ;;  %v1623_v39 = vadd.f32 1.0, %v2889_v19 }
 0x536   :  { %v1629_v4 = vadd.f32 1.0, %v2891_v40  ;;  %1687 = vmatmul.mubr.bf16.vlgmr.msra.gmra.mrb[40].mxu0 %v1653_v38  ;;  %1728 = vmatmul.mubr.bf16.vlgmr.msra.gmra.mrb[40].mxu1 %v1653_v38  ;;  %v2893_v47 = vpop.eup %2892  ;;  %v4814_v38 = vld [vmem:[#allocation22_spill] sm:$0xff]  ;;  %v4815_v40 = vld [vmem:[#allocation23_spill] sm:$0xff] }
 0x537   :  { %2896 = vrcp.f32 %v1623_v39  ;;  %1771 = vmatpush1.bf16.msra.mxu0 %v3843_v27  ;;  %1812 = vmatpush1.bf16.msra.mxu1 %v4105_v45  ;;  %v2895_v43 = vpop.eup %2894  ;;  %v1636_v32 = vadd.f32 1.0, %v2893_v47 }
 0x538   :  { %2898 = vrcp.f32 %v1629_v4  ;;  %1772 = vmatprep.subr.bf16.mxu0 %v3850_v8  ;;  %1813 = vmatprep.subr.bf16.mxu1 %v4112_v21 }
 0x539   :  { %1802 = vmatprep.mubr.bf16.mxu0 %v4758_v62  ;;  %1843 = vmatprep.mubr.bf16.mxu1 %v4758_v62  ;;  %2900 = vrcp.f32 %v1636_v32  ;;  %v4828_v32 = vld [vmem:[#allocation10_spill] sm:$0xff] }
 0x53b   :  { %1773 = vmatpush1.bf16.msra.mxu0 %v3859_v9  ;;  %1814 = vmatpush1.bf16.msra.mxu1 %v4121_v37 }
 0x53c   :  { %1774 = vmatprep.subr.bf16.mxu0 %v3866_v41  ;;  %1815 = vmatprep.subr.bf16.mxu1 %v4128_v24 }
 0x53f   :  { %1775 = vmatpush1.bf16.msra.mxu0 %v3873_v35  ;;  %1816 = vmatpush1.bf16.msra.mxu1 %v4135_v44 }
 0x540   :  { %1776 = vmatprep.subr.bf16.mxu0 %v4141_v48  ;;  %1817 = vmatprep.subr.bf16.mxu1 %v4147_v50 }
 0x541   :  { %v2897_v26 = vpop.eup %2896 }
 0x542   :  { %v2899_v14 = vpop.eup %2898  ;;  %v1640_v15 = vmul.f32 %v2897_v26, %v2895_v43  ;;  %v4824_v43 = vld [vmem:[#allocation6_spill] sm:$0xff]  ;;  %v4825_v26 = vld [vmem:[#allocation12_spill] sm:$0xff] }
 0x543   :  { %v1639_v31 = vmul.f32 %v2899_v14, %v4175_v13  ;;  %1777 = vmatpush1.bf16.msra.mxu0 %v4154_v2  ;;  %1818 = vmatpush1.bf16.msra.mxu1 %v4160_v0  ;;  %v4809_v13 = vld [vmem:[#allocation16_spill] sm:$0xff]  ;;  %v2901_v19 = vpop.eup %2900  ;;  %v4826_v14 = vld [vmem:[#allocation9_spill] sm:$0xff] }
 0x544   :  { %1778 = vmatprep.subr.bf16.mxu0 %v4166_v3  ;;  %1819 = vmatprep.subr.bf16.mxu1 %v4172_v49 }
 0x545   :  { %v4351_v59 = vadd.f32 %v1640_v15, %v1639_v31  ;;  %v4827_v15 = vld [vmem:[#allocation15_spill] sm:$0xff]  ;;  %v2598_v31 = vld [vmem:[%s4655_s0 + $0xa0] sm:$0xff] }
 0x547   :  { %2902 = vtanh.f32 %v4351_v59  ;;  %1779 = vmatpush1.bf16.msra.mxu0 %v4181_v25  ;;  %1820 = vmatpush1.bf16.msra.mxu1 %v4187_v42 }
 0x548   :  { %1780 = vmatprep.subr.bf16.mxu0 %v4193_v36  ;;  %1821 = vmatprep.subr.bf16.mxu1 %v4199_v28 }
 0x54b   :  { %1781 = vmatpush1.bf16.msra.mxu0 %v4205_v46  ;;  %1822 = vmatpush1.bf16.msra.mxu1 %v4809_v13 }
 0x54c   :  { %1782 = vmatprep.subr.bf16.mxu0 %v4810_v17  ;;  %1823 = vmatprep.subr.bf16.mxu1 %v4811_v12 }
 0x54f   :  { %1783 = vmatpush1.bf16.msra.mxu0 %v4812_v29  ;;  %1824 = vmatpush1.bf16.msra.mxu1 %v4813_v33 }
 0x550   :  { %1784 = vmatprep.subr.bf16.mxu0 %v4814_v38  ;;  %1825 = vmatprep.subr.bf16.mxu1 %v4815_v40 }
 0x551   :  { %v2903_v39 = vpop.eup %2902 }
 0x552   :  { %v1643_v4 = vmul.f32 %v2903_v39, %v2901_v19  ;;  %v2599_v19 = vld [vmem:[%s4655_s0 + $0xa8] sm:$0xff] }
 0x553   :  { %1785 = vmatpush1.bf16.msra.mxu0 %v4253_v20  ;;  %1826 = vmatpush1.bf16.msra.mxu1 %v4259_v16 }
 0x554   :  { %2597 = vst [vmem:[%s4659_s6 + $0x18] sm:$0xff] %v1643_v4  ;;  %v1769_v47 = vpack.c.bf16 %v1643_v4, %v1643_v4  ;;  %1890 = vmatprep.subr.bf16.mxu0 %v3736_v7  ;;  %1931 = vmatprep.subr.bf16.mxu1 %v3908_v51  ;;  %v4816_v7 = vld [vmem:[#allocation21_spill] sm:$0xff] }
 0x556   :  { %1803 = vmatmul.mubr.bf16.vlgmr.msra.gmra.mrb[44].mxu0 %v1769_v47  ;;  %1844 = vmatmul.mubr.bf16.vlgmr.msra.gmra.mrb[44].mxu1 %v1769_v47 }
 0x557   :  { %1891 = vmatpush1.bf16.msra.mxu0 %v3743_v5  ;;  %1932 = vmatpush1.bf16.msra.mxu1 %v3749_v23  ;;  %v4817_v5 = vld [vmem:[#allocation19_spill] sm:$0xff]  ;;  %v4818_v23 = vld [vmem:[#allocation20_spill] sm:$0xff] }
 0x558   :  { %1892 = vmatprep.subr.bf16.mxu0 %v3755_v6  ;;  %1933 = vmatprep.subr.bf16.mxu1 %v3917_v1  ;;  %v4819_v6 = vld [vmem:[#allocation7_spill] sm:$0xff] }
 0x559   :  { %1922 = vmatprep.mubr.bf16.mxu0 %v4758_v62  ;;  %1963 = vmatprep.mubr.bf16.mxu1 %v4758_v62 }
 0x55b   :  { %1893 = vmatpush1.bf16.msra.mxu0 %v3764_v18  ;;  %1934 = vmatpush1.bf16.msra.mxu1 %v3926_v52  ;;  %v4820_v18 = vld [vmem:[#allocation4_spill] sm:$0xff] }
 0x55c   :  { %1894 = vmatprep.subr.bf16.mxu0 %v3771_v63  ;;  %1935 = vmatprep.subr.bf16.mxu1 %v3933_v53  ;;  %v4821_v63 = vld [vmem:[#allocation8_spill] sm:$0xff] }
 0x55f   :  { %1895 = vmatpush1.bf16.msra.mxu0 %v3778_v10  ;;  %1936 = vmatpush1.bf16.msra.mxu1 %v3940_v54  ;;  %v4822_v10 = vld [vmem:[#allocation5_spill] sm:$0xff] }
 0x560   :  { %1896 = vmatprep.subr.bf16.mxu0 %v3785_v11  ;;  %1937 = vmatprep.subr.bf16.mxu1 %v3947_v55  ;;  %v4823_v11 = vld [vmem:[#allocation11_spill] sm:$0xff] }
 0x563   :  { %1897 = vmatpush1.bf16.msra.mxu0 %v3953_v56  ;;  %1938 = vmatpush1.bf16.msra.mxu1 %v3959_v57 }
 0x564   :  { %1898 = vmatprep.subr.bf16.mxu0 %v3965_v58  ;;  %1939 = vmatprep.subr.bf16.mxu1 %v3971_v60 }
 0x567   :  { %1899 = vmatpush1.bf16.msra.mxu0 %v3977_v61  ;;  %1940 = vmatpush1.bf16.msra.mxu1 %v3983_v30 }
 0x568   :  { %1900 = vmatprep.subr.bf16.mxu0 %v3989_v34  ;;  %1941 = vmatprep.subr.bf16.mxu1 %v4816_v7 }
 0x56b   :  { %1901 = vmatpush1.bf16.msra.mxu0 %v4817_v5  ;;  %1942 = vmatpush1.bf16.msra.mxu1 %v4818_v23 }
 0x56c   :  { %1902 = vmatprep.subr.bf16.mxu0 %v4819_v6  ;;  %1943 = vmatprep.subr.bf16.mxu1 %v4820_v18  ;;  %v2601_v6 = vld [vmem:[%s4655_s0 + $0xb8] sm:$0xff] }
 0x56f   :  { %1903 = vmatpush1.bf16.msra.mxu0 %v4821_v63  ;;  %1944 = vmatpush1.bf16.msra.mxu1 %v4822_v10 }
 0x570   :  { %1904 = vmatprep.subr.bf16.mxu0 %v4823_v11  ;;  %1945 = vmatprep.subr.bf16.mxu1 %v4824_v43 }
 0x573   :  { %1905 = vmatpush1.bf16.msra.mxu0 %v4825_v26  ;;  %1946 = vmatpush1.bf16.msra.mxu1 %v4826_v14 }
 0x574   :  { %2006 = vmatprep.subr.bf16.mxu0 %v4827_v15  ;;  %2047 = vmatprep.subr.bf16.mxu1 %v4828_v32 }
 0x609   :  { %v1688_v39 = vpop.f32.mrb[40].mxu0  ;;  %v1729_v4 = vpop.f32.mrb[40].mxu1 }
 0x60a   :  { %v1736_v47 = vadd.f32 %v2598_v31, %v1688_v39  ;;  %v1690_v43 = vpop.f32.mrb[41].mxu0  ;;  %v1731_v11 = vpop.f32.mrb[41].mxu1  ;;  %v2600_v31 = vld [vmem:[%s4655_s0 + $0xb0] sm:$0xff] }
 0x60b   :  { %v1737_v26 = vadd.f32 %v2599_v19, %v1690_v43  ;;  %v1692_v10 = vpop.f32.mrb[42].mxu0  ;;  %v1733_v14 = vpop.f32.mrb[42].mxu1  ;;  %v1739_v23 = vadd.f32 %v2601_v6, %v1731_v11  ;;  %v1738_v5 = vadd.f32 %v2600_v31, %v1729_v4  ;;  %v2606_v4 = vld [vmem:[%s4657_s1 + $0x148] sm:$0xff] }
 0x60c   :  { %v2602_v63 = vmul.f32 -1.442695, %v1736_v47  ;;  %v1693_v15 = vpop.f32.mrb[43].mxu0  ;;  %v1734_v18 = vpop.f32.mrb[43].mxu1 }
 0x60d   :  { %v2603_v32 = vmul.f32 -1.442695, %v1737_v26  ;;  %v2604_v39 = vmul.f32 -1.442695, %v1739_v23  ;;  %v2605_v23 = vld [vmem:[%s4657_s1 + $0x140] sm:$0xff] }
 0x60e   :  { %2904 = vpow2.f32 %v2602_v63 }
 0x60f   :  { %2906 = vpow2.f32 %v2603_v32 }
 0x610   :  { %2908 = vpow2.f32 %v2604_v39 }
 0x611   :  { %2910 = vtanh.f32 %v1738_v5 }
 0x618   :  { %v2905_v43 = vpop.eup %2904 }
 0x619   :  { %v2907_v10 = vpop.eup %2906  ;;  %v1743_v14 = vadd.f32 1.0, %v2905_v43 }
 0x61a   :  { %v1749_v18 = vadd.f32 1.0, %v2907_v10  ;;  %v2909_v63 = vpop.eup %2908 }
 0x61b   :  { %2912 = vrcp.f32 %v1743_v14  ;;  %v2911_v26 = vpop.eup %2910  ;;  %v1756_v6 = vadd.f32 1.0, %v2909_v63 }
 0x61c   :  { %2914 = vrcp.f32 %v1749_v18 }
 0x61d   :  { %2916 = vrcp.f32 %v1756_v6  ;;  %v2607_v6 = vld [vmem:[%s4657_s1 + $0x150] sm:$0xff] }
 0x625   :  { %v2913_v15 = vpop.eup %2912 }
 0x626   :  { %v2915_v19 = vpop.eup %2914  ;;  %v1760_v32 = vmul.f32 %v2913_v15, %v2911_v26 }
 0x627   :  { %v1759_v11 = vmul.f32 %v2915_v19, %v4320_v22 }
 0x629   :  { %v4426_v5 = vadd.f32 %v1760_v32, %v1759_v11  ;;  %v1804_v47 = vpop.f32.mrb[44].mxu0  ;;  %v1845_v31 = vpop.f32.mrb[44].mxu1  ;;  %v2608_v32 = vld [vmem:[%s4657_s1 + $0x158] sm:$0xff] }
 0x62a   :  { %v1852_v39 = vadd.f32 %v2605_v23, %v1804_v47  ;;  %v1806_v43 = vpop.f32.mrb[45].mxu0  ;;  %v1847_v10 = vpop.f32.mrb[45].mxu1 }
 0x62b   :  { %2918 = vtanh.f32 %v4426_v5  ;;  %v1853_v14 = vadd.f32 %v2606_v4, %v1806_v43  ;;  %v1808_v22 = vpop.f32.mrb[46].mxu0  ;;  %v1849_v18 = vpop.f32.mrb[46].mxu1  ;;  %v1855_v11 = vadd.f32 %v2608_v32, %v1847_v10  ;;  %v1854_v43 = vadd.f32 %v2607_v6, %v1845_v31  ;;  %v3064_v6 = vld [vmem:[%s4653_s4 + $0x4] ss:$16 sps:$4 sm:$0xff]  }
 0x62c   :  { %v2609_v63 = vmul.f32 -1.442695, %v1852_v39  ;;  %v1809_v26 = vpop.f32.mrb[47].mxu0  ;;  %v1850_v15 = vpop.f32.mrb[47].mxu1 }
 0x62d   :  { %v2610_v19 = vmul.f32 -1.442695, %v1853_v14  ;;  %v2917_v23 = vpop.eup %2916  ;;  %v2611_v4 = vmul.f32 -1.442695, %v1855_v11 }
 0x62e   :  { %2920 = vpow2.f32 %v2609_v63 }
 0x62f   :  { %2922 = vpow2.f32 %v2610_v19 }
 0x630   :  { %2924 = vpow2.f32 %v2611_v4  ;;  %v3067_v4 = vld [vmem:[%s4653_s4 + $0x24] ss:$16 sps:$4 sm:$0xff]  }
 0x631   :  { %2926 = vtanh.f32 %v1854_v43  ;;  %v3069_v43 = vld [vmem:[%s4653_s4 + $0x44] ss:$16 sps:$4 sm:$0xff]  }
 0x635   :  { %v2919_v47 = vpop.eup %2918 }
 0x636   :  { %v1763_v22 = vmul.f32 %v2919_v47, %v2917_v23  ;;  %v3065_v23 = vld [vmem:[%s4653_s4] ss:$16 sps:$4 sm:$0xff]   ;;  %v3066_v47 = vld [vmem:[%s4653_s4 + $0x8] ss:$16 sps:$4 sm:$0xff]  }
 0x638   :  { %v2921_v39 = vpop.eup %2920  ;;  %2612 = vst [vmem:[%s4658_s5 + $0x28] sm:$0xff] %v1763_v22  ;;  %v1889_v14 = vpack.c.bf16 %v1763_v22, %v1763_v22  ;;  %v3071_v22 = vld [vmem:[%s4653_s4 + $0x64] ss:$16 sps:$4 sm:$0xff]  }
 0x639   :  { %v2923_v18 = vpop.eup %2922  ;;  %v1859_v63 = vadd.f32 1.0, %v2921_v39  ;;  %v2614_v39 = vld [vmem:[%s4655_s0 + $0xc0] sm:$0xff] }
 0x63a   :  { %v1865_v10 = vadd.f32 1.0, %v2923_v18  ;;  %1923 = vmatmul.mubr.bf16.vlgmr.msra.gmra.mrb[48].mxu0 %v1889_v14  ;;  %1964 = vmatmul.mubr.bf16.vlgmr.msra.gmra.mrb[48].mxu1 %v1889_v14  ;;  %v2615_v14 = vld [vmem:[%s4655_s0 + $0xc8] sm:$0xff] }
 0x63b   :  { %2928 = vrcp.f32 %v1859_v63  ;;  %2007 = vmatpush1.bf16.msra.mxu0 %v3843_v27  ;;  %2048 = vmatpush1.bf16.msra.mxu1 %v4105_v45  ;;  %v2925_v27 = vpop.eup %2924 }
 0x63c   :  { %2930 = vrcp.f32 %v1865_v10  ;;  %2008 = vmatprep.subr.bf16.mxu0 %v3850_v8  ;;  %2049 = vmatprep.subr.bf16.mxu1 %v4112_v21  ;;  %v2927_v8 = vpop.eup %2926 }
 0x63d   :  { %2038 = vmatprep.mubr.bf16.mxu0 %v4758_v62  ;;  %2079 = vmatprep.mubr.bf16.mxu1 %v4758_v62 }
 0x63f   :  { %2009 = vmatpush1.bf16.msra.mxu0 %v3859_v9  ;;  %2050 = vmatpush1.bf16.msra.mxu1 %v4121_v37  ;;  %v1872_v9 = vadd.f32 1.0, %v2925_v27 }
 0x640   :  { %2010 = vmatprep.subr.bf16.mxu0 %v3866_v41  ;;  %2051 = vmatprep.subr.bf16.mxu1 %v4128_v24 }
 0x641   :  { %2932 = vrcp.f32 %v1872_v9 }
 0x643   :  { %2011 = vmatpush1.bf16.msra.mxu0 %v3873_v35  ;;  %2052 = vmatpush1.bf16.msra.mxu1 %v4135_v44 }
 0x644   :  { %2012 = vmatprep.subr.bf16.mxu0 %v4141_v48  ;;  %2053 = vmatprep.subr.bf16.mxu1 %v4147_v50 }
 0x645   :  { %v2929_v31 = vpop.eup %2928 }
 0x646   :  { %v2931_v26 = vpop.eup %2930  ;;  %v1876_v15 = vmul.f32 %v2929_v31, %v2927_v8 }
 0x647   :  { %v1875_v19 = vmul.f32 %v2931_v26, %v4351_v59  ;;  %2013 = vmatpush1.bf16.msra.mxu0 %v4154_v2  ;;  %2054 = vmatpush1.bf16.msra.mxu1 %v4160_v0 }
 0x648   :  { %2014 = vmatprep.subr.bf16.mxu0 %v4166_v3  ;;  %2055 = vmatprep.subr.bf16.mxu1 %v4172_v49 }
 0x649   :  { %v4457_v41 = vadd.f32 %v1876_v15, %v1875_v19 }
 0x64b   :  { %2934 = vtanh.f32 %v4457_v41  ;;  %2015 = vmatpush1.bf16.msra.mxu0 %v4181_v25  ;;  %2056 = vmatpush1.bf16.msra.mxu1 %v4187_v42  ;;  %v2933_v35 = vpop.eup %2932 }
 0x64c   :  { %2016 = vmatprep.subr.bf16.mxu0 %v4193_v36  ;;  %2057 = vmatprep.subr.bf16.mxu1 %v4199_v28 }
 0x64f   :  { %2017 = vmatpush1.bf16.msra.mxu0 %v4205_v46  ;;  %2058 = vmatpush1.bf16.msra.mxu1 %v4809_v13 }
 0x650   :  { %2018 = vmatprep.subr.bf16.mxu0 %v4810_v17  ;;  %2059 = vmatprep.subr.bf16.mxu1 %v4811_v12 }
 0x653   :  { %2019 = vmatpush1.bf16.msra.mxu0 %v4812_v29  ;;  %2060 = vmatpush1.bf16.msra.mxu1 %v4813_v33 }
 0x654   :  { %2020 = vmatprep.subr.bf16.mxu0 %v4814_v38  ;;  %2061 = vmatprep.subr.bf16.mxu1 %v4815_v40 }
 0x655   :  { %v2935_v59 = vpop.eup %2934 }
 0x656   :  { %v1879_v32 = vmul.f32 %v2935_v59, %v2933_v35 }
 0x657   :  { %2021 = vmatpush1.bf16.msra.mxu0 %v4253_v20  ;;  %2062 = vmatpush1.bf16.msra.mxu1 %v4259_v16 }
 0x658   :  { %2613 = vst [vmem:[%s4659_s6 + $0x10] sm:$0xff] %v1879_v32  ;;  %v2005_v11 = vpack.c.bf16 %v1879_v32, %v1879_v32  ;;  %2126 = vmatprep.subr.bf16.mxu0 %v3064_v6  ;;  %2167 = vmatprep.subr.bf16.mxu1 %v3908_v51  ;;  %v3068_v51 = vld [vmem:[%s4653_s4 + $0x20] ss:$16 sps:$4 sm:$0xff]   ;;  %v2617_v32 = vld [vmem:[%s4655_s0 + $0xd8] sm:$0xff] }
 0x659   :  { %v2616_v6 = vld [vmem:[%s4655_s0 + $0xd0] sm:$0xff] }
 0x65a   :  { %2039 = vmatmul.mubr.bf16.vlgmr.msra.gmra.mrb[52].mxu0 %v2005_v11  ;;  %2080 = vmatmul.mubr.bf16.vlgmr.msra.gmra.mrb[52].mxu1 %v2005_v11 }
 0x65b   :  { %2127 = vmatpush1.bf16.msra.mxu0 %v3065_v23  ;;  %2168 = vmatpush1.bf16.msra.mxu1 %v3066_v47 }
 0x65c   :  { %2128 = vmatprep.subr.bf16.mxu0 %v3067_v4  ;;  %2169 = vmatprep.subr.bf16.mxu1 %v3917_v1  ;;  %v3070_v1 = vld [vmem:[%s4653_s4 + $0x40] ss:$16 sps:$4 sm:$0xff]  }
 0x65d   :  { %2158 = vmatprep.mubr.bf16.mxu0 %v4758_v62  ;;  %2199 = vmatprep.mubr.bf16.mxu1 %v4758_v62 }
 0x65f   :  { %2129 = vmatpush1.bf16.msra.mxu0 %v3068_v51  ;;  %2170 = vmatpush1.bf16.msra.mxu1 %v3926_v52  ;;  %v4829_v52 = vld [vmem:[#allocation19_spill] sm:$0xff] }
 0x660   :  { %2130 = vmatprep.subr.bf16.mxu0 %v3069_v43  ;;  %2171 = vmatprep.subr.bf16.mxu1 %v3933_v53  ;;  %v4830_v53 = vld [vmem:[#allocation20_spill] sm:$0xff] }
 0x663   :  { %2131 = vmatpush1.bf16.msra.mxu0 %v3070_v1  ;;  %2172 = vmatpush1.bf16.msra.mxu1 %v3940_v54  ;;  %v4831_v54 = vld [vmem:[#allocation7_spill] sm:$0xff] }
 0x664   :  { %2132 = vmatprep.subr.bf16.mxu0 %v3071_v22  ;;  %2173 = vmatprep.subr.bf16.mxu1 %v3947_v55  ;;  %v4832_v55 = vld [vmem:[#allocation4_spill] sm:$0xff] }
 0x667   :  { %2133 = vmatpush1.bf16.msra.mxu0 %v3953_v56  ;;  %2174 = vmatpush1.bf16.msra.mxu1 %v3959_v57  ;;  %v4833_v56 = vld [vmem:[#allocation8_spill] sm:$0xff]  ;;  %v4834_v57 = vld [vmem:[#allocation5_spill] sm:$0xff] }
 0x668   :  { %2134 = vmatprep.subr.bf16.mxu0 %v3965_v58  ;;  %2175 = vmatprep.subr.bf16.mxu1 %v3971_v60  ;;  %v4835_v58 = vld [vmem:[#allocation11_spill] sm:$0xff]  ;;  %v4836_v60 = vld [vmem:[#allocation6_spill] sm:$0xff] }
 0x66b   :  { %2135 = vmatpush1.bf16.msra.mxu0 %v3977_v61  ;;  %2176 = vmatpush1.bf16.msra.mxu1 %v3983_v30  ;;  %v4837_v61 = vld [vmem:[#allocation12_spill] sm:$0xff]  ;;  %v4838_v30 = vld [vmem:[#allocation9_spill] sm:$0xff] }
 0x66c   :  { %2136 = vmatprep.subr.bf16.mxu0 %v3989_v34  ;;  %2177 = vmatprep.subr.bf16.mxu1 %v4816_v7  ;;  %v4839_v34 = vld [vmem:[#allocation15_spill] sm:$0xff]  ;;  %v4840_v7 = vld [vmem:[#allocation10_spill] sm:$0xff] }
 0x66f   :  { %2137 = vmatpush1.bf16.msra.mxu0 %v4829_v52  ;;  %2178 = vmatpush1.bf16.msra.mxu1 %v4830_v53 }
 0x670   :  { %2138 = vmatprep.subr.bf16.mxu0 %v4831_v54  ;;  %2179 = vmatprep.subr.bf16.mxu1 %v4832_v55 }
 0x673   :  { %2139 = vmatpush1.bf16.msra.mxu0 %v4833_v56  ;;  %2180 = vmatpush1.bf16.msra.mxu1 %v4834_v57 }
 0x674   :  { %2140 = vmatprep.subr.bf16.mxu0 %v4835_v58  ;;  %2181 = vmatprep.subr.bf16.mxu1 %v4836_v60  ;;  %v2621_v58 = vld [vmem:[%s4657_s1 + $0x120] sm:$0xff]  ;;  %v2622_v60 = vld [vmem:[%s4657_s1 + $0x128] sm:$0xff] }
 0x677   :  { %2141 = vmatpush1.bf16.msra.mxu0 %v4837_v61  ;;  %2182 = vmatpush1.bf16.msra.mxu1 %v4838_v30 }
 0x678   :  { %2241 = vmatprep.subr.bf16.mxu0 %v4839_v34  ;;  %2282 = vmatprep.subr.bf16.mxu1 %v4840_v7 }
 0x70d   :  { %v1924_v18 = vpop.f32.mrb[48].mxu0  ;;  %v1965_v63 = vpop.f32.mrb[48].mxu1 }
 0x70e   :  { %v1972_v10 = vadd.f32 %v2614_v39, %v1924_v18  ;;  %v1926_v27 = vpop.f32.mrb[49].mxu0  ;;  %v1967_v8 = vpop.f32.mrb[49].mxu1  ;;  %v1974_v47 = vadd.f32 %v2616_v6, %v1965_v63 }
 0x70f   :  { %v1973_v31 = vadd.f32 %v2615_v14, %v1926_v27  ;;  %v1928_v26 = vpop.f32.mrb[50].mxu0  ;;  %v1969_v15 = vpop.f32.mrb[50].mxu1  ;;  %v1975_v11 = vadd.f32 %v2617_v32, %v1967_v8 }
 0x710   :  { %v2618_v9 = vmul.f32 -1.442695, %v1972_v10  ;;  %v1929_v19 = vpop.f32.mrb[51].mxu0  ;;  %v1970_v35 = vpop.f32.mrb[51].mxu1  ;;  %v2624_v26 = vld [vmem:[%s4657_s1 + $0x138] sm:$0xff] }
 0x711   :  { %v2619_v59 = vmul.f32 -1.442695, %v1973_v31  ;;  %v2620_v23 = vmul.f32 -1.442695, %v1975_v11 }
 0x712   :  { %2936 = vpow2.f32 %v2618_v9  ;;  %v2623_v9 = vld [vmem:[%s4657_s1 + $0x130] sm:$0xff] }
 0x713   :  { %2938 = vpow2.f32 %v2619_v59 }
 0x714   :  { %2940 = vpow2.f32 %v2620_v23 }
 0x715   :  { %2942 = vtanh.f32 %v1974_v47 }
 0x71c   :  { %v2937_v4 = vpop.eup %2936 }
 0x71d   :  { %v2939_v51 = vpop.eup %2938  ;;  %v1979_v43 = vadd.f32 1.0, %v2937_v4 }
 0x71e   :  { %v1985_v1 = vadd.f32 1.0, %v2939_v51  ;;  %v2941_v22 = vpop.eup %2940 }
 0x71f   :  { %2944 = vrcp.f32 %v1979_v43  ;;  %v2943_v52 = vpop.eup %2942  ;;  %v1992_v56 = vadd.f32 1.0, %v2941_v22  ;;  %v3072_v43 = vld [vmem:[%s4653_s4 + $0x100] ss:$16 sps:$4 sm:$0xff]  }
 0x720   :  { %2946 = vrcp.f32 %v1985_v1  ;;  %v3073_v1 = vld [vmem:[%s4653_s4 + $0x124] ss:$16 sps:$4 sm:$0xff]   ;;  %v3074_v22 = vld [vmem:[%s4653_s4 + $0x120] ss:$16 sps:$4 sm:$0xff]  }
 0x721   :  { %2948 = vrcp.f32 %v1992_v56 }
 0x729   :  { %v2945_v53 = vpop.eup %2944 }
 0x72a   :  { %v2947_v54 = vpop.eup %2946  ;;  %v1996_v55 = vmul.f32 %v2945_v53, %v2943_v52 }
 0x72b   :  { %v1995_v57 = vmul.f32 %v2947_v54, %v4426_v5  ;;  %v2949_v19 = vpop.eup %2948 }
 0x72d   :  { %v4548_v61 = vadd.f32 %v1996_v55, %v1995_v57  ;;  %v2040_v30 = vpop.f32.mrb[52].mxu0  ;;  %v2081_v34 = vpop.f32.mrb[52].mxu1 }
 0x72e   :  { %v2088_v7 = vadd.f32 %v2621_v58, %v2040_v30  ;;  %v2042_v39 = vpop.f32.mrb[53].mxu0  ;;  %v2083_v14 = vpop.f32.mrb[53].mxu1  ;;  %v2090_v32 = vadd.f32 %v2623_v9, %v2081_v34 }
 0x72f   :  { %2950 = vtanh.f32 %v4548_v61  ;;  %v2089_v18 = vadd.f32 %v2622_v60, %v2042_v39  ;;  %v2044_v5 = vpop.f32.mrb[54].mxu0  ;;  %v2085_v63 = vpop.f32.mrb[54].mxu1  ;;  %v2091_v15 = vadd.f32 %v2624_v26, %v2083_v14 }
 0x730   :  { %v2625_v10 = vmul.f32 -1.442695, %v2088_v7  ;;  %v2045_v27 = vpop.f32.mrb[55].mxu0  ;;  %v2086_v8 = vpop.f32.mrb[55].mxu1 }
 0x731   :  { %v2626_v31 = vmul.f32 -1.442695, %v2089_v18  ;;  %v2627_v59 = vmul.f32 -1.442695, %v2091_v15  ;;  %v2637_v27 = vld [vmem:[%s4657_s1 + $0x100] sm:$0xff]  ;;  %v2638_v8 = vld [vmem:[%s4657_s1 + $0x108] sm:$0xff] }
 0x732   :  { %2952 = vpow2.f32 %v2625_v10 }
 0x733   :  { %2954 = vpow2.f32 %v2626_v31 }
 0x734   :  { %2956 = vpow2.f32 %v2627_v59 }
 0x735   :  { %2958 = vtanh.f32 %v2090_v32 }
 0x739   :  { %v2951_v35 = vpop.eup %2950 }
 0x73a   :  { %v1999_v11 = vmul.f32 %v2951_v35, %v2949_v19 }
 0x73c   :  { %v2953_v6 = vpop.eup %2952  ;;  %2628 = vst [vmem:[%s4658_s5 + $0x30] sm:$0xff] %v1999_v11  ;;  %v2125_v23 = vpack.c.bf16 %v1999_v11, %v1999_v11 }
 0x73d   :  { %v2955_v47 = vpop.eup %2954  ;;  %v2095_v4 = vadd.f32 1.0, %v2953_v6 }
 0x73e   :  { %v2101_v51 = vadd.f32 1.0, %v2955_v47  ;;  %2159 = vmatmul.mubr.bf16.vlgmr.msra.gmra.mrb[56].mxu0 %v2125_v23  ;;  %2200 = vmatmul.mubr.bf16.vlgmr.msra.gmra.mrb[56].mxu1 %v2125_v23  ;;  %v2957_v52 = vpop.eup %2956 }
 0x73f   :  { %2960 = vrcp.f32 %v2095_v4  ;;  %2242 = vmatpush1.bf16.msra.mxu0 %v3072_v43  ;;  %2283 = vmatpush1.bf16.msra.mxu1 %v4105_v45  ;;  %v3075_v45 = vld [vmem:[%s4653_s4 + $0x144] ss:$16 sps:$4 sm:$0xff]   ;;  %v2108_v55 = vadd.f32 1.0, %v2957_v52  ;;  %v2640_v4 = vld [vmem:[%s4657_s1 + $0x118] sm:$0xff] }
 0x740   :  { %2962 = vrcp.f32 %v2101_v51  ;;  %2243 = vmatprep.subr.bf16.mxu0 %v3073_v1  ;;  %2284 = vmatprep.subr.bf16.mxu1 %v4112_v21  ;;  %v3076_v21 = vld [vmem:[%s4653_s4 + $0x140] ss:$16 sps:$4 sm:$0xff]  }
 0x741   :  { %2273 = vmatprep.mubr.bf16.mxu0 %v4758_v62  ;;  %2314 = vmatprep.mubr.bf16.mxu1 %v4758_v62  ;;  %v2959_v62 = vpop.eup %2958  ;;  %2964 = vrcp.f32 %v2108_v55  ;;  %v2639_v43 = vld [vmem:[%s4657_s1 + $0x110] sm:$0xff] }
 0x743   :  { %2244 = vmatpush1.bf16.msra.mxu0 %v3074_v22  ;;  %2285 = vmatpush1.bf16.msra.mxu1 %v4121_v37 }
 0x744   :  { %2245 = vmatprep.subr.bf16.mxu0 %v3075_v45  ;;  %2286 = vmatprep.subr.bf16.mxu1 %v4128_v24 }
 0x747   :  { %2246 = vmatpush1.bf16.msra.mxu0 %v3076_v21  ;;  %2287 = vmatpush1.bf16.msra.mxu1 %v4135_v44 }
 0x748   :  { %2247 = vmatprep.subr.bf16.mxu0 %v4141_v48  ;;  %2288 = vmatprep.subr.bf16.mxu1 %v4147_v50 }
 0x749   :  { %v2961_v37 = vpop.eup %2960 }
 0x74a   :  { %v2963_v53 = vpop.eup %2962  ;;  %v2112_v54 = vmul.f32 %v2961_v37, %v2959_v62 }
 0x74b   :  { %v2111_v56 = vmul.f32 %v2963_v53, %v4457_v41  ;;  %2248 = vmatpush1.bf16.msra.mxu0 %v4154_v2  ;;  %2289 = vmatpush1.bf16.msra.mxu1 %v4160_v0  ;;  %v2965_v44 = vpop.eup %2964  ;;  %v2630_v0 = vld [vmem:[%s4655_s0 + $0xe0] sm:$0xff] }
 0x74c   :  { %2249 = vmatprep.subr.bf16.mxu0 %v4166_v3  ;;  %2290 = vmatprep.subr.bf16.mxu1 %v4172_v49  ;;  %v2631_v3 = vld [vmem:[%s4655_s0 + $0xe8] sm:$0xff] }
 0x74d   :  { %v4589_v24 = vadd.f32 %v2112_v54, %v2111_v56 }
 0x74f   :  { %2966 = vtanh.f32 %v4589_v24  ;;  %2250 = vmatpush1.bf16.msra.mxu0 %v4181_v25  ;;  %2291 = vmatpush1.bf16.msra.mxu1 %v4187_v42 }
 0x750   :  { %2251 = vmatprep.subr.bf16.mxu0 %v4193_v36  ;;  %2292 = vmatprep.subr.bf16.mxu1 %v4199_v28 }
 0x753   :  { %2252 = vmatpush1.bf16.msra.mxu0 %v4205_v46  ;;  %2293 = vmatpush1.bf16.msra.mxu1 %v4809_v13 }
 0x754   :  { %2253 = vmatprep.subr.bf16.mxu0 %v4810_v17  ;;  %2294 = vmatprep.subr.bf16.mxu1 %v4811_v12 }
 0x757   :  { %2254 = vmatpush1.bf16.msra.mxu0 %v4812_v29  ;;  %2295 = vmatpush1.bf16.msra.mxu1 %v4813_v33  ;;  %v2633_v33 = vld [vmem:[%s4655_s0 + $0xf8] sm:$0xff] }
 0x758   :  { %2255 = vmatprep.subr.bf16.mxu0 %v4814_v38  ;;  %2296 = vmatprep.subr.bf16.mxu1 %v4815_v40  ;;  %v2632_v40 = vld [vmem:[%s4655_s0 + $0xf0] sm:$0xff] }
 0x759   :  { %v2967_v48 = vpop.eup %2966 }
 0x75a   :  { %v2115_v50 = vmul.f32 %v2967_v48, %v2965_v44 }
 0x75b   :  { %2256 = vmatpush1.bf16.msra.mxu0 %v4253_v20  ;;  %2297 = vmatpush1.bf16.msra.mxu1 %v4259_v16 }
 0x75c   :  { %2629 = vst [vmem:[%s4659_s6 + $0x8] sm:$0xff] %v2115_v50  ;;  %v2240_v2 = vpack.c.bf16 %v2115_v50, %v2115_v50 }
 0x75e   :  { %2274 = vmatmul.mubr.bf16.vlgmr.msra.gmra.mrb[60].mxu0 %v2240_v2  ;;  %2315 = vmatmul.mubr.bf16.vlgmr.msra.gmra.mrb[60].mxu1 %v2240_v2 }
 0x811   :  { %v2160_v49 = vpop.f32.mrb[56].mxu0  ;;  %v2201_v25 = vpop.f32.mrb[56].mxu1 }
 0x812   :  { %v2208_v42 = vadd.f32 %v2630_v0, %v2160_v49  ;;  %v2162_v36 = vpop.f32.mrb[57].mxu0  ;;  %v2203_v28 = vpop.f32.mrb[57].mxu1  ;;  %v2210_v57 = vadd.f32 %v2632_v40, %v2201_v25 }
 0x813   :  { %v2209_v46 = vadd.f32 %v2631_v3, %v2162_v36  ;;  %v2164_v16 = vpop.f32.mrb[58].mxu0  ;;  %v2205_v20 = vpop.f32.mrb[58].mxu1  ;;  %v2211_v38 = vadd.f32 %v2633_v33, %v2203_v28 }
 0x814   :  { %v2634_v13 = vmul.f32 -1.442695, %v2208_v42  ;;  %v2165_v17 = vpop.f32.mrb[59].mxu0  ;;  %v2206_v12 = vpop.f32.mrb[59].mxu1 }
 0x815   :  { %v2635_v29 = vmul.f32 -1.442695, %v2209_v46  ;;  %v2636_v41 = vmul.f32 -1.442695, %v2211_v38 }
 0x816   :  { %2968 = vpow2.f32 %v2634_v13 }
 0x817   :  { %2970 = vpow2.f32 %v2635_v29 }
 0x818   :  { %2972 = vpow2.f32 %v2636_v41 }
 0x819   :  { %2974 = vtanh.f32 %v2210_v57 }
 0x820   :  { %v2969_v58 = vpop.eup %2968 }
 0x821   :  { %v2971_v60 = vpop.eup %2970  ;;  %v2215_v30 = vadd.f32 1.0, %v2969_v58 }
 0x822   :  { %v2221_v34 = vadd.f32 1.0, %v2971_v60  ;;  %v2973_v7 = vpop.eup %2972 }
 0x823   :  { %2976 = vrcp.f32 %v2215_v30  ;;  %v2975_v39 = vpop.eup %2974  ;;  %v2228_v63 = vadd.f32 1.0, %v2973_v7 }
 0x824   :  { %2978 = vrcp.f32 %v2221_v34 }
 0x825   :  { %2980 = vrcp.f32 %v2228_v63 }
 0x82d   :  { %v2977_v14 = vpop.eup %2976 }
 0x82e   :  { %v2979_v18 = vpop.eup %2978  ;;  %v2232_v5 = vmul.f32 %v2977_v14, %v2975_v39 }
 0x82f   :  { %v2231_v10 = vmul.f32 %v2979_v18, %v4548_v61  ;;  %v2981_v1 = vpop.eup %2980 }
 0x831   :  { %v2233_v31 = vadd.f32 %v2232_v5, %v2231_v10  ;;  %v2275_v26 = vpop.f32.mrb[60].mxu0  ;;  %v2316_v15 = vpop.f32.mrb[60].mxu1 }
 0x832   :  { %v2323_v9 = vadd.f32 %v2637_v27, %v2275_v26  ;;  %v2277_v19 = vpop.f32.mrb[61].mxu0  ;;  %v2318_v35 = vpop.f32.mrb[61].mxu1  ;;  %v2325_v21 = vadd.f32 %v2639_v43, %v2316_v15 }
 0x833   :  { %2982 = vtanh.f32 %v2233_v31  ;;  %2358 = vst [vmem:[%s4660_s8] sm:$0xff] %v2233_v31  ;;  %v2324_v61 = vadd.f32 %v2638_v8, %v2277_v19  ;;  %v2279_v59 = vpop.f32.mrb[62].mxu0  ;;  %v2320_v32 = vpop.f32.mrb[62].mxu1  ;;  %v2326_v51 = vadd.f32 %v2640_v4, %v2318_v35 }
 0x834   :  { %v2641_v11 = vmul.f32 -1.442695, %v2323_v9  ;;  %v2280_v6 = vpop.f32.mrb[63].mxu0  ;;  %v2321_v23 = vpop.f32.mrb[63].mxu1 }
 0x835   :  { %v2642_v47 = vmul.f32 -1.442695, %v2324_v61  ;;  %v2643_v45 = vmul.f32 -1.442695, %v2326_v51 }
 0x836   :  { %2984 = vpow2.f32 %v2641_v11 }
 0x837   :  { %2986 = vpow2.f32 %v2642_v47 }
 0x838   :  { %2988 = vpow2.f32 %v2643_v45 }
 0x839   :  { %2990 = vtanh.f32 %v2325_v21 }
 0x83d   :  { %v2983_v22 = vpop.eup %2982 }
 0x83e   :  { %v2235_v52 = vmul.f32 %v2983_v22, %v2981_v1 }
 0x840   :  { %v2985_v62 = vpop.eup %2984  ;;  %2644 = vst [vmem:[%s4658_s5 + $0x38] sm:$0xff] %v2235_v52  ;;  %2357 = vst [vmem:[%s4661_s7] sm:$0xff] %v2235_v52 }
 0x841   :  { %v2987_v37 = vpop.eup %2986  ;;  %v2330_v53 = vadd.f32 1.0, %v2985_v62 }
 0x842   :  { %v2336_v54 = vadd.f32 1.0, %v2987_v37  ;;  %v2989_v55 = vpop.eup %2988 }
 0x843   :  { %2992 = vrcp.f32 %v2330_v53  ;;  %v2991_v56 = vpop.eup %2990  ;;  %v2343_v2 = vadd.f32 1.0, %v2989_v55 }
 0x844   :  { %2994 = vrcp.f32 %v2336_v54 }
 0x845   :  { %2996 = vrcp.f32 %v2343_v2 }
 0x84d   :  { %v2993_v44 = vpop.eup %2992 }
 0x84e   :  { %v2995_v48 = vpop.eup %2994  ;;  %v2347_v50 = vmul.f32 %v2993_v44, %v2991_v56 }
 0x84f   :  { %v2346_v0 = vmul.f32 %v2995_v48, %v4589_v24  ;;  %v2997_v49 = vpop.eup %2996 }
 0x851   :  { %v2348_v3 = vadd.f32 %v2347_v50, %v2346_v0 }
 0x853   :  { %2998 = vtanh.f32 %v2348_v3  ;;  %2646 = vst [vmem:[%s4660_s8 + $0x8] sm:$0xff] %v2348_v3 }
 0x85d   :  { %v2999_v25 = vpop.eup %2998 }
 0x85e   :  { %v2350_v42 = vmul.f32 %v2999_v25, %v2997_v49 }
 0x860   :  { %2353 = vst [vmem:[%s4659_s6] sm:$0xff] %v2350_v42  ;;  %2645 = vst [vmem:[%s4661_s7 + $0x8] sm:$0xff] %v2350_v42 }

</bundles_post_ra>
